<compile_context>
chip_gen: v5e
topology: v5e:2x2
jax: 0.10.0
libtpu: 0.0.40
codegen_flags: <defaults>
</compile_context>

<pallas_src>
import functools

import numpy as np

import jax
import jax.numpy as jnp
from jax.experimental import pallas as pl
from jax.experimental.pallas import tpu as pltpu


def _edge_masks(H, W):
    """(9, H*W) f32 masks: 1 where the 3x3 tap reads a real pixel, 0 where it
    would read the zero padding (also kills the flat-roll wrap-around)."""
    r = np.arange(H * W)
    yy, xx = r // W, r % W
    ms = []
    for dy in range(3):
        for dx in range(3):
            oy, ox = dy - 1, dx - 1
            ok = ((yy + oy >= 0) & (yy + oy < H) &
                  (xx + ox >= 0) & (xx + ox < W))
            ms.append(ok.astype(np.float32))
    return np.stack(ms, axis=0)


def _unet_kernel(x_ref, m_ref, w1_ref, b1_ref, w2_ref, b2_ref, w3_ref, b3_ref,
                 o_ref, *, H, W, C, bb):
    # x_ref : (bb, 1, HW)  input rows (lane-dense)
    # m_ref : (9, HW) f32  edge masks
    # w1_ref: (C, 9)  f32  layer-1 weights (tap on lanes)
    # w2_ref: (9, C, C) bf16   per-tap (Cout, Cin) weights
    # w3_ref: (9, 1, C) bf16
    # b*_ref: biases, (C,1)/(C,1)/(1,1) f32
    # o_ref : (bb, 1, HW) output rows (lane-dense)
    HW = H * W
    f32 = jnp.float32
    bf16 = jnp.bfloat16
    CENTER = 4
    offs = tuple((dy - 1) * W + (dx - 1) for dy in range(3) for dx in range(3))

    masks = m_ref[...]          # (9, HW) f32
    w1 = w1_ref[...]            # (C, 9)  f32
    b1 = b1_ref[...]            # (C, 1)  f32
    b2 = b2_ref[...]            # (C, 1)  f32
    b3 = b3_ref[...]            # (1, 1)  f32

    def tap(v, t):
        # v: (rows, HW) f32 -> same shape, shifted by the tap offset along the
        # flattened pixel (lane) axis, with padding positions zeroed.
        d = offs[t]
        out = v if d == 0 else pltpu.roll(v, (-d) % HW, axis=1)   # XLU rotate
        if t != CENTER:
            out = out * masks[t:t + 1, :]                          # (1,HW) bcast
        return out

    for b in range(bb):
        # ----- layer 1: Conv2d(1, C, 3, pad=1) + ReLU  (VPU broadcast-FMA) ---
        x_row = x_ref[b].astype(f32)                    # (1, HW)
        acc1 = jnp.zeros((C, HW), f32)
        for t in range(9):
            acc1 = acc1 + tap(x_row, t) * w1[:, t:t + 1]   # (1,HW)*(C,1)
        act1 = jnp.maximum(acc1 + b1, 0.0)              # (C, HW) f32

        # ----- layer 2: Conv2d(C, C, 3, pad=1) + ReLU  (9 MXU matmuls) -------
        acc2 = jnp.zeros((C, HW), f32)
        for t in range(9):
            s = tap(act1, t).astype(bf16)               # (C, HW) bf16
            acc2 = acc2 + jnp.dot(w2_ref[t], s, preferred_element_type=f32)
        act2 = jnp.maximum(acc2 + b2, 0.0)              # (C, HW) f32

        # ----- layer 3: Conv2d(C, 1, 3, pad=1)  (9 MXU matmuls, row output) --
        acc3 = jnp.zeros((1, HW), f32)
        for t in range(9):
            s = tap(act2, t).astype(bf16)
            acc3 = acc3 + jnp.dot(w3_ref[t], s, preferred_element_type=f32)
        o_ref[b] = (acc3 + b3).astype(o_ref.dtype)      # lane-dense (1, HW)


def init_params(key):
    """Deterministic params matching nn.Conv2d shapes (Cout, Cin, 3, 3)."""
    shapes = [(64, 1, 3, 3), (64, 64, 3, 3), (1, 64, 3, 3)]
    params = []
    for (cout, cin, kh, kw) in shapes:
        kw_key, kb_key, key = jax.random.split(key, 3)
        fan_in = cin * kh * kw
        bound = 1.0 / (fan_in ** 0.5)
        w = jax.random.uniform(kw_key, (cout, cin, kh, kw),
                               minval=-bound, maxval=bound, dtype=jnp.float32)
        b = jax.random.uniform(kb_key, (cout,), minval=-bound, maxval=bound,
                               dtype=jnp.float32)
        params.append((w, b))
    return params


def prep_params(params):
    """One-time weight prep: per-tap (Cout, Cin) layout; MXU layers in bf16."""
    (w1, b1), (w2, b2), (w3, b3) = params
    C = w1.shape[0]

    def taps(w):  # (O, I, 3, 3) -> (9, O, I), tap index = dy*3 + dx
        o, i, kh, kw = w.shape
        return jnp.transpose(w, (2, 3, 0, 1)).reshape(kh * kw, o, i)

    return dict(
        w1=w1.reshape(C, 9).astype(jnp.float32),     # (C, 9)   f32 (VPU layer)
        b1=b1.reshape(C, 1).astype(jnp.float32),
        w2=taps(w2).astype(jnp.bfloat16),            # (9, C, C) bf16 (MXU)
        b2=b2.reshape(C, 1).astype(jnp.float32),
        w3=taps(w3).astype(jnp.bfloat16),            # (9, 1, C) bf16 (MXU)
        b3=b3.reshape(1, 1).astype(jnp.float32),
    )


@functools.partial(jax.jit, static_argnames=("batch_block",))
def unet_forward(x_nchw, t, p, batch_block=1):
    del t  # unused, exactly as in the PyTorch module's forward(x, t)
    N, cin, H, W = x_nchw.shape
    assert cin == 1
    HW = H * W
    C = p["w2"].shape[1]
    bb = batch_block
    assert N % bb == 0
    # Pure reshapes (Cin == Cout == 1): no transpose kernels around the call.
    x_in = x_nchw.reshape(N, 1, HW)
    masks = jnp.asarray(_edge_masks(H, W))           # baked compile-time const

    kernel = functools.partial(_unet_kernel, H=H, W=W, C=C, bb=bb)
    out = pl.pallas_call(
        kernel,
        out_shape=jax.ShapeDtypeStruct((N, 1, HW), x_nchw.dtype),
        grid_spec=pltpu.PrefetchScalarGridSpec(
            num_scalar_prefetch=0,
            grid=(N // bb,),                         # batch -> 2 TCs on v7x
            in_specs=[
                pl.BlockSpec((bb, 1, HW), lambda n: (n, 0, 0)),
                pl.BlockSpec(masks.shape, lambda n: (0, 0)),
                pl.BlockSpec(p["w1"].shape, lambda n: (0, 0)),
                pl.BlockSpec(p["b1"].shape, lambda n: (0, 0)),
                pl.BlockSpec(p["w2"].shape, lambda n: (0, 0, 0)),
                pl.BlockSpec(p["b2"].shape, lambda n: (0, 0)),
                pl.BlockSpec(p["w3"].shape, lambda n: (0, 0, 0)),
                pl.BlockSpec(p["b3"].shape, lambda n: (0, 0)),
            ],
            out_specs=pl.BlockSpec((bb, 1, HW), lambda n: (n, 0, 0)),
        ),
        compiler_params=pltpu.CompilerParams(
            dimension_semantics=("parallel",)),
    )(x_in, masks, p["w1"], p["b1"], p["w2"], p["b2"], p["w3"], p["b3"])

    return out.reshape(N, 1, H, W)


def unet_reference(x, params):
    """Pure-JAX reference (f32) for a correctness sanity check."""
    def conv(h, w, b):
        y = jax.lax.conv_general_dilated(
            h, w, window_strides=(1, 1), padding=((1, 1), (1, 1)),
            dimension_numbers=("NCHW", "OIHW", "NCHW"))
        return y + b.reshape(1, -1, 1, 1)
    (w1, b1), (w2, b2), (w3, b3) = params
    h = jax.nn.relu(conv(x, w1, b1))
    h = jax.nn.relu(conv(h, w2, b2))
    return conv(h, w3, b3)


if __name__ == "__main__":
    key = jax.random.PRNGKey(0)
    pkey, xkey = jax.random.split(key)
    params = init_params(pkey)
    prepped = prep_params(params)

    # Conv2d(1, ...) => single input channel; batch=2, spatial=16.
    x = jax.random.normal(xkey, (2, 1, 16, 16), dtype=jnp.float32)
    t = jnp.zeros((2,), dtype=jnp.float32)  # unused, matches forward(x, t)

    out = unet_forward(x, t, prepped)
    jax.block_until_ready(out)
    assert out.shape == (2, 1, 16, 16), out.shape

    # Sanity check vs. pure-JAX conv (loose tolerance: bf16 MXU inputs).
    ref = unet_reference(x, params)
    err = float(jnp.max(jnp.abs(out - ref)))
    assert err < 5e-2, f"max abs error {err}"
    print("KERNEL_OK")
</pallas_src>

<mosaic_0001>
module attributes {stable_mosaic.version = 11 : i64} {
  func.func @_unet_kernel(%arg0: i32, %arg1: memref<1x1x256xf32, #tpu.memory_space<vmem>>, %arg2: memref<9x256xf32, #tpu.memory_space<vmem>>, %arg3: memref<64x9xf32, #tpu.memory_space<vmem>>, %arg4: memref<64x1xf32, #tpu.memory_space<vmem>>, %arg5: memref<9x64x64xbf16, #tpu.memory_space<vmem>>, %arg6: memref<64x1xf32, #tpu.memory_space<vmem>>, %arg7: memref<9x1x64xbf16, #tpu.memory_space<vmem>>, %arg8: memref<1x1xf32, #tpu.memory_space<vmem>>, %arg9: memref<1x1x256xf32, #tpu.memory_space<vmem>>) attributes {dimension_semantics = [#tpu.dimension_semantics<parallel>], iteration_bounds = array<i64: 2>, scalar_prefetch = 0 : i64, scratch_operands = 0 : i64, tpu.core_type = #tpu.core_type<tc>, window_params = [{transform_indices = @transform_0, window_bounds = array<i64: 1, 1, 256>}, {pipeline_mode = #tpu.pipeline_mode<synchronous>, transform_indices = @transform_1, window_bounds = array<i64: 9, 256>}, {pipeline_mode = #tpu.pipeline_mode<synchronous>, transform_indices = @transform_2, window_bounds = array<i64: 64, 9>}, {pipeline_mode = #tpu.pipeline_mode<synchronous>, transform_indices = @transform_3, window_bounds = array<i64: 64, 1>}, {pipeline_mode = #tpu.pipeline_mode<synchronous>, transform_indices = @transform_4, window_bounds = array<i64: 9, 64, 64>}, {pipeline_mode = #tpu.pipeline_mode<synchronous>, transform_indices = @transform_5, window_bounds = array<i64: 64, 1>}, {pipeline_mode = #tpu.pipeline_mode<synchronous>, transform_indices = @transform_6, window_bounds = array<i64: 9, 1, 64>}, {pipeline_mode = #tpu.pipeline_mode<synchronous>, transform_indices = @transform_7, window_bounds = array<i64: 1, 1>}, {transform_indices = @transform_8, window_bounds = array<i64: 1, 1, 256>}]} {
    %c0 = arith.constant 0 : index
    %c0_0 = arith.constant 0 : index
    %0 = vector.load %arg2[%c0, %c0_0] : memref<9x256xf32, #tpu.memory_space<vmem>>, vector<9x256xf32>
    %c0_1 = arith.constant 0 : index
    %c0_2 = arith.constant 0 : index
    %1 = vector.load %arg3[%c0_1, %c0_2] : memref<64x9xf32, #tpu.memory_space<vmem>>, vector<64x9xf32>
    %c0_3 = arith.constant 0 : index
    %c0_4 = arith.constant 0 : index
    %2 = vector.load %arg4[%c0_3, %c0_4] : memref<64x1xf32, #tpu.memory_space<vmem>>, vector<64x1xf32>
    %c0_5 = arith.constant 0 : index
    %c0_6 = arith.constant 0 : index
    %3 = vector.load %arg6[%c0_5, %c0_6] : memref<64x1xf32, #tpu.memory_space<vmem>>, vector<64x1xf32>
    %c0_7 = arith.constant 0 : index
    %c0_8 = arith.constant 0 : index
    %4 = vector.load %arg8[%c0_7, %c0_8] : memref<1x1xf32, #tpu.memory_space<vmem>>, vector<1x1xf32>
    %c0_9 = arith.constant 0 : index
    %c0_10 = arith.constant 0 : index
    %c0_11 = arith.constant 0 : index
    %5 = vector.load %arg1[%c0_9, %c0_10, %c0_11] : memref<1x1x256xf32, #tpu.memory_space<vmem>>, vector<1x1x256xf32>
    %6 = vector.shape_cast %5 : vector<1x1x256xf32> to vector<1x256xf32>
    %cst = arith.constant 0.000000e+00 : f32
    %7 = vector.broadcast %cst : f32 to vector<64x256xf32>
    %c17_i32 = arith.constant 17 : i32
    %8 = tpu.dynamic_rotate %6 by %c17_i32 dim 1 : vector<1x256xf32>, i32 -> vector<1x256xf32>
    %9 = vector.extract_strided_slice %0 {offsets = [0, 0], sizes = [1, 256], strides = [1, 1]} : vector<9x256xf32> to vector<1x256xf32>
    %10 = arith.mulf %8, %9 : vector<1x256xf32>
    %11 = vector.extract_strided_slice %1 {offsets = [0, 0], sizes = [64, 1], strides = [1, 1]} : vector<64x9xf32> to vector<64x1xf32>
    %12 = vector.broadcast %10 : vector<1x256xf32> to vector<64x256xf32>
    %13 = vector.broadcast %11 : vector<64x1xf32> to vector<64x256xf32>
    %14 = arith.mulf %12, %13 : vector<64x256xf32>
    %15 = arith.addf %7, %14 : vector<64x256xf32>
    %c16_i32 = arith.constant 16 : i32
    %16 = tpu.dynamic_rotate %6 by %c16_i32 dim 1 : vector<1x256xf32>, i32 -> vector<1x256xf32>
    %17 = vector.extract_strided_slice %0 {offsets = [1, 0], sizes = [1, 256], strides = [1, 1]} : vector<9x256xf32> to vector<1x256xf32>
    %18 = arith.mulf %16, %17 : vector<1x256xf32>
    %19 = vector.extract_strided_slice %1 {offsets = [0, 1], sizes = [64, 1], strides = [1, 1]} : vector<64x9xf32> to vector<64x1xf32>
    %20 = vector.broadcast %18 : vector<1x256xf32> to vector<64x256xf32>
    %21 = vector.broadcast %19 : vector<64x1xf32> to vector<64x256xf32>
    %22 = arith.mulf %20, %21 : vector<64x256xf32>
    %23 = arith.addf %15, %22 : vector<64x256xf32>
    %c15_i32 = arith.constant 15 : i32
    %24 = tpu.dynamic_rotate %6 by %c15_i32 dim 1 : vector<1x256xf32>, i32 -> vector<1x256xf32>
    %25 = vector.extract_strided_slice %0 {offsets = [2, 0], sizes = [1, 256], strides = [1, 1]} : vector<9x256xf32> to vector<1x256xf32>
    %26 = arith.mulf %24, %25 : vector<1x256xf32>
    %27 = vector.extract_strided_slice %1 {offsets = [0, 2], sizes = [64, 1], strides = [1, 1]} : vector<64x9xf32> to vector<64x1xf32>
    %28 = vector.broadcast %26 : vector<1x256xf32> to vector<64x256xf32>
    %29 = vector.broadcast %27 : vector<64x1xf32> to vector<64x256xf32>
    %30 = arith.mulf %28, %29 : vector<64x256xf32>
    %31 = arith.addf %23, %30 : vector<64x256xf32>
    %c1_i32 = arith.constant 1 : i32
    %32 = tpu.dynamic_rotate %6 by %c1_i32 dim 1 : vector<1x256xf32>, i32 -> vector<1x256xf32>
    %33 = vector.extract_strided_slice %0 {offsets = [3, 0], sizes = [1, 256], strides = [1, 1]} : vector<9x256xf32> to vector<1x256xf32>
    %34 = arith.mulf %32, %33 : vector<1x256xf32>
    %35 = vector.extract_strided_slice %1 {offsets = [0, 3], sizes = [64, 1], strides = [1, 1]} : vector<64x9xf32> to vector<64x1xf32>
    %36 = vector.broadcast %34 : vector<1x256xf32> to vector<64x256xf32>
    %37 = vector.broadcast %35 : vector<64x1xf32> to vector<64x256xf32>
    %38 = arith.mulf %36, %37 : vector<64x256xf32>
    %39 = arith.addf %31, %38 : vector<64x256xf32>
    %40 = vector.extract_strided_slice %1 {offsets = [0, 4], sizes = [64, 1], strides = [1, 1]} : vector<64x9xf32> to vector<64x1xf32>
    %41 = vector.broadcast %6 : vector<1x256xf32> to vector<64x256xf32>
    %42 = vector.broadcast %40 : vector<64x1xf32> to vector<64x256xf32>
    %43 = arith.mulf %41, %42 : vector<64x256xf32>
    %44 = arith.addf %39, %43 : vector<64x256xf32>
    %c255_i32 = arith.constant 255 : i32
    %45 = tpu.dynamic_rotate %6 by %c255_i32 dim 1 : vector<1x256xf32>, i32 -> vector<1x256xf32>
    %46 = vector.extract_strided_slice %0 {offsets = [5, 0], sizes = [1, 256], strides = [1, 1]} : vector<9x256xf32> to vector<1x256xf32>
    %47 = arith.mulf %45, %46 : vector<1x256xf32>
    %48 = vector.extract_strided_slice %1 {offsets = [0, 5], sizes = [64, 1], strides = [1, 1]} : vector<64x9xf32> to vector<64x1xf32>
    %49 = vector.broadcast %47 : vector<1x256xf32> to vector<64x256xf32>
    %50 = vector.broadcast %48 : vector<64x1xf32> to vector<64x256xf32>
    %51 = arith.mulf %49, %50 : vector<64x256xf32>
    %52 = arith.addf %44, %51 : vector<64x256xf32>
    %c241_i32 = arith.constant 241 : i32
    %53 = tpu.dynamic_rotate %6 by %c241_i32 dim 1 : vector<1x256xf32>, i32 -> vector<1x256xf32>
    %54 = vector.extract_strided_slice %0 {offsets = [6, 0], sizes = [1, 256], strides = [1, 1]} : vector<9x256xf32> to vector<1x256xf32>
    %55 = arith.mulf %53, %54 : vector<1x256xf32>
    %56 = vector.extract_strided_slice %1 {offsets = [0, 6], sizes = [64, 1], strides = [1, 1]} : vector<64x9xf32> to vector<64x1xf32>
    %57 = vector.broadcast %55 : vector<1x256xf32> to vector<64x256xf32>
    %58 = vector.broadcast %56 : vector<64x1xf32> to vector<64x256xf32>
    %59 = arith.mulf %57, %58 : vector<64x256xf32>
    %60 = arith.addf %52, %59 : vector<64x256xf32>
    %c240_i32 = arith.constant 240 : i32
    %61 = tpu.dynamic_rotate %6 by %c240_i32 dim 1 : vector<1x256xf32>, i32 -> vector<1x256xf32>
    %62 = vector.extract_strided_slice %0 {offsets = [7, 0], sizes = [1, 256], strides = [1, 1]} : vector<9x256xf32> to vector<1x256xf32>
    %63 = arith.mulf %61, %62 : vector<1x256xf32>
    %64 = vector.extract_strided_slice %1 {offsets = [0, 7], sizes = [64, 1], strides = [1, 1]} : vector<64x9xf32> to vector<64x1xf32>
    %65 = vector.broadcast %63 : vector<1x256xf32> to vector<64x256xf32>
    %66 = vector.broadcast %64 : vector<64x1xf32> to vector<64x256xf32>
    %67 = arith.mulf %65, %66 : vector<64x256xf32>
    %68 = arith.addf %60, %67 : vector<64x256xf32>
    %c239_i32 = arith.constant 239 : i32
    %69 = tpu.dynamic_rotate %6 by %c239_i32 dim 1 : vector<1x256xf32>, i32 -> vector<1x256xf32>
    %70 = vector.extract_strided_slice %0 {offsets = [8, 0], sizes = [1, 256], strides = [1, 1]} : vector<9x256xf32> to vector<1x256xf32>
    %71 = arith.mulf %69, %70 : vector<1x256xf32>
    %72 = vector.extract_strided_slice %1 {offsets = [0, 8], sizes = [64, 1], strides = [1, 1]} : vector<64x9xf32> to vector<64x1xf32>
    %73 = vector.broadcast %71 : vector<1x256xf32> to vector<64x256xf32>
    %74 = vector.broadcast %72 : vector<64x1xf32> to vector<64x256xf32>
    %75 = arith.mulf %73, %74 : vector<64x256xf32>
    %76 = arith.addf %68, %75 : vector<64x256xf32>
    %77 = vector.broadcast %2 : vector<64x1xf32> to vector<64x256xf32>
    %78 = arith.addf %76, %77 : vector<64x256xf32>
    %cst_12 = arith.constant 0.000000e+00 : f32
    %79 = vector.broadcast %cst_12 : f32 to vector<64x256xf32>
    %80 = arith.maximumf %78, %79 : vector<64x256xf32>
    %cst_13 = arith.constant 0.000000e+00 : f32
    %81 = vector.broadcast %cst_13 : f32 to vector<64x256xf32>
    %c17_i32_14 = arith.constant 17 : i32
    %82 = tpu.dynamic_rotate %80 by %c17_i32_14 dim 1 : vector<64x256xf32>, i32 -> vector<64x256xf32>
    %83 = vector.extract_strided_slice %0 {offsets = [0, 0], sizes = [1, 256], strides = [1, 1]} : vector<9x256xf32> to vector<1x256xf32>
    %84 = vector.broadcast %83 : vector<1x256xf32> to vector<64x256xf32>
    %85 = arith.mulf %82, %84 : vector<64x256xf32>
    %86 = arith.truncf %85 : vector<64x256xf32> to vector<64x256xbf16>
    %c0_15 = arith.constant 0 : index
    %c0_16 = arith.constant 0 : index
    %c0_17 = arith.constant 0 : index
    %87 = vector.load %arg5[%c0_15, %c0_16, %c0_17] : memref<9x64x64xbf16, #tpu.memory_space<vmem>>, vector<1x64x64xbf16>
    %88 = vector.shape_cast %87 : vector<1x64x64xbf16> to vector<64x64xbf16>
    %cst_18 = arith.constant dense<0.000000e+00> : vector<64x256xf32>
    %89 = tpu.matmul %88, %86, %cst_18 {dimension_numbers = #tpu.dot_dimension_numbers<[1], [0], [0], [1], [0, 0, 1, 1], [], []>} : vector<64x64xbf16>, vector<64x256xbf16>, vector<64x256xf32> -> vector<64x256xf32>
    %90 = arith.addf %81, %89 : vector<64x256xf32>
    %c16_i32_19 = arith.constant 16 : i32
    %91 = tpu.dynamic_rotate %80 by %c16_i32_19 dim 1 : vector<64x256xf32>, i32 -> vector<64x256xf32>
    %92 = vector.extract_strided_slice %0 {offsets = [1, 0], sizes = [1, 256], strides = [1, 1]} : vector<9x256xf32> to vector<1x256xf32>
    %93 = vector.broadcast %92 : vector<1x256xf32> to vector<64x256xf32>
    %94 = arith.mulf %91, %93 : vector<64x256xf32>
    %95 = arith.truncf %94 : vector<64x256xf32> to vector<64x256xbf16>
    %c1 = arith.constant 1 : index
    %c0_20 = arith.constant 0 : index
    %c0_21 = arith.constant 0 : index
    %96 = vector.load %arg5[%c1, %c0_20, %c0_21] : memref<9x64x64xbf16, #tpu.memory_space<vmem>>, vector<1x64x64xbf16>
    %97 = vector.shape_cast %96 : vector<1x64x64xbf16> to vector<64x64xbf16>
    %cst_22 = arith.constant dense<0.000000e+00> : vector<64x256xf32>
    %98 = tpu.matmul %97, %95, %cst_22 {dimension_numbers = #tpu.dot_dimension_numbers<[1], [0], [0], [1], [0, 0, 1, 1], [], []>} : vector<64x64xbf16>, vector<64x256xbf16>, vector<64x256xf32> -> vector<64x256xf32>
    %99 = arith.addf %90, %98 : vector<64x256xf32>
    %c15_i32_23 = arith.constant 15 : i32
    %100 = tpu.dynamic_rotate %80 by %c15_i32_23 dim 1 : vector<64x256xf32>, i32 -> vector<64x256xf32>
    %101 = vector.extract_strided_slice %0 {offsets = [2, 0], sizes = [1, 256], strides = [1, 1]} : vector<9x256xf32> to vector<1x256xf32>
    %102 = vector.broadcast %101 : vector<1x256xf32> to vector<64x256xf32>
    %103 = arith.mulf %100, %102 : vector<64x256xf32>
    %104 = arith.truncf %103 : vector<64x256xf32> to vector<64x256xbf16>
    %c2 = arith.constant 2 : index
    %c0_24 = arith.constant 0 : index
    %c0_25 = arith.constant 0 : index
    %105 = vector.load %arg5[%c2, %c0_24, %c0_25] : memref<9x64x64xbf16, #tpu.memory_space<vmem>>, vector<1x64x64xbf16>
    %106 = vector.shape_cast %105 : vector<1x64x64xbf16> to vector<64x64xbf16>
    %cst_26 = arith.constant dense<0.000000e+00> : vector<64x256xf32>
    %107 = tpu.matmul %106, %104, %cst_26 {dimension_numbers = #tpu.dot_dimension_numbers<[1], [0], [0], [1], [0, 0, 1, 1], [], []>} : vector<64x64xbf16>, vector<64x256xbf16>, vector<64x256xf32> -> vector<64x256xf32>
    %108 = arith.addf %99, %107 : vector<64x256xf32>
    %c1_i32_27 = arith.constant 1 : i32
    %109 = tpu.dynamic_rotate %80 by %c1_i32_27 dim 1 : vector<64x256xf32>, i32 -> vector<64x256xf32>
    %110 = vector.extract_strided_slice %0 {offsets = [3, 0], sizes = [1, 256], strides = [1, 1]} : vector<9x256xf32> to vector<1x256xf32>
    %111 = vector.broadcast %110 : vector<1x256xf32> to vector<64x256xf32>
    %112 = arith.mulf %109, %111 : vector<64x256xf32>
    %113 = arith.truncf %112 : vector<64x256xf32> to vector<64x256xbf16>
    %c3 = arith.constant 3 : index
    %c0_28 = arith.constant 0 : index
    %c0_29 = arith.constant 0 : index
    %114 = vector.load %arg5[%c3, %c0_28, %c0_29] : memref<9x64x64xbf16, #tpu.memory_space<vmem>>, vector<1x64x64xbf16>
    %115 = vector.shape_cast %114 : vector<1x64x64xbf16> to vector<64x64xbf16>
    %cst_30 = arith.constant dense<0.000000e+00> : vector<64x256xf32>
    %116 = tpu.matmul %115, %113, %cst_30 {dimension_numbers = #tpu.dot_dimension_numbers<[1], [0], [0], [1], [0, 0, 1, 1], [], []>} : vector<64x64xbf16>, vector<64x256xbf16>, vector<64x256xf32> -> vector<64x256xf32>
    %117 = arith.addf %108, %116 : vector<64x256xf32>
    %118 = arith.truncf %80 : vector<64x256xf32> to vector<64x256xbf16>
    %c4 = arith.constant 4 : index
    %c0_31 = arith.constant 0 : index
    %c0_32 = arith.constant 0 : index
    %119 = vector.load %arg5[%c4, %c0_31, %c0_32] : memref<9x64x64xbf16, #tpu.memory_space<vmem>>, vector<1x64x64xbf16>
    %120 = vector.shape_cast %119 : vector<1x64x64xbf16> to vector<64x64xbf16>
    %cst_33 = arith.constant dense<0.000000e+00> : vector<64x256xf32>
    %121 = tpu.matmul %120, %118, %cst_33 {dimension_numbers = #tpu.dot_dimension_numbers<[1], [0], [0], [1], [0, 0, 1, 1], [], []>} : vector<64x64xbf16>, vector<64x256xbf16>, vector<64x256xf32> -> vector<64x256xf32>
    %122 = arith.addf %117, %121 : vector<64x256xf32>
    %c255_i32_34 = arith.constant 255 : i32
    %123 = tpu.dynamic_rotate %80 by %c255_i32_34 dim 1 : vector<64x256xf32>, i32 -> vector<64x256xf32>
    %124 = vector.extract_strided_slice %0 {offsets = [5, 0], sizes = [1, 256], strides = [1, 1]} : vector<9x256xf32> to vector<1x256xf32>
    %125 = vector.broadcast %124 : vector<1x256xf32> to vector<64x256xf32>
    %126 = arith.mulf %123, %125 : vector<64x256xf32>
    %127 = arith.truncf %126 : vector<64x256xf32> to vector<64x256xbf16>
    %c5 = arith.constant 5 : index
    %c0_35 = arith.constant 0 : index
    %c0_36 = arith.constant 0 : index
    %128 = vector.load %arg5[%c5, %c0_35, %c0_36] : memref<9x64x64xbf16, #tpu.memory_space<vmem>>, vector<1x64x64xbf16>
    %129 = vector.shape_cast %128 : vector<1x64x64xbf16> to vector<64x64xbf16>
    %cst_37 = arith.constant dense<0.000000e+00> : vector<64x256xf32>
    %130 = tpu.matmul %129, %127, %cst_37 {dimension_numbers = #tpu.dot_dimension_numbers<[1], [0], [0], [1], [0, 0, 1, 1], [], []>} : vector<64x64xbf16>, vector<64x256xbf16>, vector<64x256xf32> -> vector<64x256xf32>
    %131 = arith.addf %122, %130 : vector<64x256xf32>
    %c241_i32_38 = arith.constant 241 : i32
    %132 = tpu.dynamic_rotate %80 by %c241_i32_38 dim 1 : vector<64x256xf32>, i32 -> vector<64x256xf32>
    %133 = vector.extract_strided_slice %0 {offsets = [6, 0], sizes = [1, 256], strides = [1, 1]} : vector<9x256xf32> to vector<1x256xf32>
    %134 = vector.broadcast %133 : vector<1x256xf32> to vector<64x256xf32>
    %135 = arith.mulf %132, %134 : vector<64x256xf32>
    %136 = arith.truncf %135 : vector<64x256xf32> to vector<64x256xbf16>
    %c6 = arith.constant 6 : index
    %c0_39 = arith.constant 0 : index
    %c0_40 = arith.constant 0 : index
    %137 = vector.load %arg5[%c6, %c0_39, %c0_40] : memref<9x64x64xbf16, #tpu.memory_space<vmem>>, vector<1x64x64xbf16>
    %138 = vector.shape_cast %137 : vector<1x64x64xbf16> to vector<64x64xbf16>
    %cst_41 = arith.constant dense<0.000000e+00> : vector<64x256xf32>
    %139 = tpu.matmul %138, %136, %cst_41 {dimension_numbers = #tpu.dot_dimension_numbers<[1], [0], [0], [1], [0, 0, 1, 1], [], []>} : vector<64x64xbf16>, vector<64x256xbf16>, vector<64x256xf32> -> vector<64x256xf32>
    %140 = arith.addf %131, %139 : vector<64x256xf32>
    %c240_i32_42 = arith.constant 240 : i32
    %141 = tpu.dynamic_rotate %80 by %c240_i32_42 dim 1 : vector<64x256xf32>, i32 -> vector<64x256xf32>
    %142 = vector.extract_strided_slice %0 {offsets = [7, 0], sizes = [1, 256], strides = [1, 1]} : vector<9x256xf32> to vector<1x256xf32>
    %143 = vector.broadcast %142 : vector<1x256xf32> to vector<64x256xf32>
    %144 = arith.mulf %141, %143 : vector<64x256xf32>
    %145 = arith.truncf %144 : vector<64x256xf32> to vector<64x256xbf16>
    %c7 = arith.constant 7 : index
    %c0_43 = arith.constant 0 : index
    %c0_44 = arith.constant 0 : index
    %146 = vector.load %arg5[%c7, %c0_43, %c0_44] : memref<9x64x64xbf16, #tpu.memory_space<vmem>>, vector<1x64x64xbf16>
    %147 = vector.shape_cast %146 : vector<1x64x64xbf16> to vector<64x64xbf16>
    %cst_45 = arith.constant dense<0.000000e+00> : vector<64x256xf32>
    %148 = tpu.matmul %147, %145, %cst_45 {dimension_numbers = #tpu.dot_dimension_numbers<[1], [0], [0], [1], [0, 0, 1, 1], [], []>} : vector<64x64xbf16>, vector<64x256xbf16>, vector<64x256xf32> -> vector<64x256xf32>
    %149 = arith.addf %140, %148 : vector<64x256xf32>
    %c239_i32_46 = arith.constant 239 : i32
    %150 = tpu.dynamic_rotate %80 by %c239_i32_46 dim 1 : vector<64x256xf32>, i32 -> vector<64x256xf32>
    %151 = vector.extract_strided_slice %0 {offsets = [8, 0], sizes = [1, 256], strides = [1, 1]} : vector<9x256xf32> to vector<1x256xf32>
    %152 = vector.broadcast %151 : vector<1x256xf32> to vector<64x256xf32>
    %153 = arith.mulf %150, %152 : vector<64x256xf32>
    %154 = arith.truncf %153 : vector<64x256xf32> to vector<64x256xbf16>
    %c8 = arith.constant 8 : index
    %c0_47 = arith.constant 0 : index
    %c0_48 = arith.constant 0 : index
    %155 = vector.load %arg5[%c8, %c0_47, %c0_48] : memref<9x64x64xbf16, #tpu.memory_space<vmem>>, vector<1x64x64xbf16>
    %156 = vector.shape_cast %155 : vector<1x64x64xbf16> to vector<64x64xbf16>
    %cst_49 = arith.constant dense<0.000000e+00> : vector<64x256xf32>
    %157 = tpu.matmul %156, %154, %cst_49 {dimension_numbers = #tpu.dot_dimension_numbers<[1], [0], [0], [1], [0, 0, 1, 1], [], []>} : vector<64x64xbf16>, vector<64x256xbf16>, vector<64x256xf32> -> vector<64x256xf32>
    %158 = arith.addf %149, %157 : vector<64x256xf32>
    %159 = vector.broadcast %3 : vector<64x1xf32> to vector<64x256xf32>
    %160 = arith.addf %158, %159 : vector<64x256xf32>
    %cst_50 = arith.constant 0.000000e+00 : f32
    %161 = vector.broadcast %cst_50 : f32 to vector<64x256xf32>
    %162 = arith.maximumf %160, %161 : vector<64x256xf32>
    %cst_51 = arith.constant 0.000000e+00 : f32
    %163 = vector.broadcast %cst_51 : f32 to vector<1x256xf32>
    %c17_i32_52 = arith.constant 17 : i32
    %164 = tpu.dynamic_rotate %162 by %c17_i32_52 dim 1 : vector<64x256xf32>, i32 -> vector<64x256xf32>
    %165 = vector.extract_strided_slice %0 {offsets = [0, 0], sizes = [1, 256], strides = [1, 1]} : vector<9x256xf32> to vector<1x256xf32>
    %166 = vector.broadcast %165 : vector<1x256xf32> to vector<64x256xf32>
    %167 = arith.mulf %164, %166 : vector<64x256xf32>
    %168 = arith.truncf %167 : vector<64x256xf32> to vector<64x256xbf16>
    %c0_53 = arith.constant 0 : index
    %c0_54 = arith.constant 0 : index
    %c0_55 = arith.constant 0 : index
    %169 = vector.load %arg7[%c0_53, %c0_54, %c0_55] : memref<9x1x64xbf16, #tpu.memory_space<vmem>>, vector<1x1x64xbf16>
    %170 = vector.shape_cast %169 : vector<1x1x64xbf16> to vector<1x64xbf16>
    %cst_56 = arith.constant dense<0.000000e+00> : vector<1x256xf32>
    %171 = tpu.matmul %170, %168, %cst_56 {dimension_numbers = #tpu.dot_dimension_numbers<[1], [0], [0], [1], [0, 0, 1, 1], [], []>} : vector<1x64xbf16>, vector<64x256xbf16>, vector<1x256xf32> -> vector<1x256xf32>
    %172 = arith.addf %163, %171 : vector<1x256xf32>
    %c16_i32_57 = arith.constant 16 : i32
    %173 = tpu.dynamic_rotate %162 by %c16_i32_57 dim 1 : vector<64x256xf32>, i32 -> vector<64x256xf32>
    %174 = vector.extract_strided_slice %0 {offsets = [1, 0], sizes = [1, 256], strides = [1, 1]} : vector<9x256xf32> to vector<1x256xf32>
    %175 = vector.broadcast %174 : vector<1x256xf32> to vector<64x256xf32>
    %176 = arith.mulf %173, %175 : vector<64x256xf32>
    %177 = arith.truncf %176 : vector<64x256xf32> to vector<64x256xbf16>
    %c1_58 = arith.constant 1 : index
    %c0_59 = arith.constant 0 : index
    %c0_60 = arith.constant 0 : index
    %178 = vector.load %arg7[%c1_58, %c0_59, %c0_60] : memref<9x1x64xbf16, #tpu.memory_space<vmem>>, vector<1x1x64xbf16>
    %179 = vector.shape_cast %178 : vector<1x1x64xbf16> to vector<1x64xbf16>
    %cst_61 = arith.constant dense<0.000000e+00> : vector<1x256xf32>
    %180 = tpu.matmul %179, %177, %cst_61 {dimension_numbers = #tpu.dot_dimension_numbers<[1], [0], [0], [1], [0, 0, 1, 1], [], []>} : vector<1x64xbf16>, vector<64x256xbf16>, vector<1x256xf32> -> vector<1x256xf32>
    %181 = arith.addf %172, %180 : vector<1x256xf32>
    %c15_i32_62 = arith.constant 15 : i32
    %182 = tpu.dynamic_rotate %162 by %c15_i32_62 dim 1 : vector<64x256xf32>, i32 -> vector<64x256xf32>
    %183 = vector.extract_strided_slice %0 {offsets = [2, 0], sizes = [1, 256], strides = [1, 1]} : vector<9x256xf32> to vector<1x256xf32>
    %184 = vector.broadcast %183 : vector<1x256xf32> to vector<64x256xf32>
    %185 = arith.mulf %182, %184 : vector<64x256xf32>
    %186 = arith.truncf %185 : vector<64x256xf32> to vector<64x256xbf16>
    %c2_63 = arith.constant 2 : index
    %c0_64 = arith.constant 0 : index
    %c0_65 = arith.constant 0 : index
    %187 = vector.load %arg7[%c2_63, %c0_64, %c0_65] : memref<9x1x64xbf16, #tpu.memory_space<vmem>>, vector<1x1x64xbf16>
    %188 = vector.shape_cast %187 : vector<1x1x64xbf16> to vector<1x64xbf16>
    %cst_66 = arith.constant dense<0.000000e+00> : vector<1x256xf32>
    %189 = tpu.matmul %188, %186, %cst_66 {dimension_numbers = #tpu.dot_dimension_numbers<[1], [0], [0], [1], [0, 0, 1, 1], [], []>} : vector<1x64xbf16>, vector<64x256xbf16>, vector<1x256xf32> -> vector<1x256xf32>
    %190 = arith.addf %181, %189 : vector<1x256xf32>
    %c1_i32_67 = arith.constant 1 : i32
    %191 = tpu.dynamic_rotate %162 by %c1_i32_67 dim 1 : vector<64x256xf32>, i32 -> vector<64x256xf32>
    %192 = vector.extract_strided_slice %0 {offsets = [3, 0], sizes = [1, 256], strides = [1, 1]} : vector<9x256xf32> to vector<1x256xf32>
    %193 = vector.broadcast %192 : vector<1x256xf32> to vector<64x256xf32>
    %194 = arith.mulf %191, %193 : vector<64x256xf32>
    %195 = arith.truncf %194 : vector<64x256xf32> to vector<64x256xbf16>
    %c3_68 = arith.constant 3 : index
    %c0_69 = arith.constant 0 : index
    %c0_70 = arith.constant 0 : index
    %196 = vector.load %arg7[%c3_68, %c0_69, %c0_70] : memref<9x1x64xbf16, #tpu.memory_space<vmem>>, vector<1x1x64xbf16>
    %197 = vector.shape_cast %196 : vector<1x1x64xbf16> to vector<1x64xbf16>
    %cst_71 = arith.constant dense<0.000000e+00> : vector<1x256xf32>
    %198 = tpu.matmul %197, %195, %cst_71 {dimension_numbers = #tpu.dot_dimension_numbers<[1], [0], [0], [1], [0, 0, 1, 1], [], []>} : vector<1x64xbf16>, vector<64x256xbf16>, vector<1x256xf32> -> vector<1x256xf32>
    %199 = arith.addf %190, %198 : vector<1x256xf32>
    %200 = arith.truncf %162 : vector<64x256xf32> to vector<64x256xbf16>
    %c4_72 = arith.constant 4 : index
    %c0_73 = arith.constant 0 : index
    %c0_74 = arith.constant 0 : index
    %201 = vector.load %arg7[%c4_72, %c0_73, %c0_74] : memref<9x1x64xbf16, #tpu.memory_space<vmem>>, vector<1x1x64xbf16>
    %202 = vector.shape_cast %201 : vector<1x1x64xbf16> to vector<1x64xbf16>
    %cst_75 = arith.constant dense<0.000000e+00> : vector<1x256xf32>
    %203 = tpu.matmul %202, %200, %cst_75 {dimension_numbers = #tpu.dot_dimension_numbers<[1], [0], [0], [1], [0, 0, 1, 1], [], []>} : vector<1x64xbf16>, vector<64x256xbf16>, vector<1x256xf32> -> vector<1x256xf32>
    %204 = arith.addf %199, %203 : vector<1x256xf32>
    %c255_i32_76 = arith.constant 255 : i32
    %205 = tpu.dynamic_rotate %162 by %c255_i32_76 dim 1 : vector<64x256xf32>, i32 -> vector<64x256xf32>
    %206 = vector.extract_strided_slice %0 {offsets = [5, 0], sizes = [1, 256], strides = [1, 1]} : vector<9x256xf32> to vector<1x256xf32>
    %207 = vector.broadcast %206 : vector<1x256xf32> to vector<64x256xf32>
    %208 = arith.mulf %205, %207 : vector<64x256xf32>
    %209 = arith.truncf %208 : vector<64x256xf32> to vector<64x256xbf16>
    %c5_77 = arith.constant 5 : index
    %c0_78 = arith.constant 0 : index
    %c0_79 = arith.constant 0 : index
    %210 = vector.load %arg7[%c5_77, %c0_78, %c0_79] : memref<9x1x64xbf16, #tpu.memory_space<vmem>>, vector<1x1x64xbf16>
    %211 = vector.shape_cast %210 : vector<1x1x64xbf16> to vector<1x64xbf16>
    %cst_80 = arith.constant dense<0.000000e+00> : vector<1x256xf32>
    %212 = tpu.matmul %211, %209, %cst_80 {dimension_numbers = #tpu.dot_dimension_numbers<[1], [0], [0], [1], [0, 0, 1, 1], [], []>} : vector<1x64xbf16>, vector<64x256xbf16>, vector<1x256xf32> -> vector<1x256xf32>
    %213 = arith.addf %204, %212 : vector<1x256xf32>
    %c241_i32_81 = arith.constant 241 : i32
    %214 = tpu.dynamic_rotate %162 by %c241_i32_81 dim 1 : vector<64x256xf32>, i32 -> vector<64x256xf32>
    %215 = vector.extract_strided_slice %0 {offsets = [6, 0], sizes = [1, 256], strides = [1, 1]} : vector<9x256xf32> to vector<1x256xf32>
    %216 = vector.broadcast %215 : vector<1x256xf32> to vector<64x256xf32>
    %217 = arith.mulf %214, %216 : vector<64x256xf32>
    %218 = arith.truncf %217 : vector<64x256xf32> to vector<64x256xbf16>
    %c6_82 = arith.constant 6 : index
    %c0_83 = arith.constant 0 : index
    %c0_84 = arith.constant 0 : index
    %219 = vector.load %arg7[%c6_82, %c0_83, %c0_84] : memref<9x1x64xbf16, #tpu.memory_space<vmem>>, vector<1x1x64xbf16>
    %220 = vector.shape_cast %219 : vector<1x1x64xbf16> to vector<1x64xbf16>
    %cst_85 = arith.constant dense<0.000000e+00> : vector<1x256xf32>
    %221 = tpu.matmul %220, %218, %cst_85 {dimension_numbers = #tpu.dot_dimension_numbers<[1], [0], [0], [1], [0, 0, 1, 1], [], []>} : vector<1x64xbf16>, vector<64x256xbf16>, vector<1x256xf32> -> vector<1x256xf32>
    %222 = arith.addf %213, %221 : vector<1x256xf32>
    %c240_i32_86 = arith.constant 240 : i32
    %223 = tpu.dynamic_rotate %162 by %c240_i32_86 dim 1 : vector<64x256xf32>, i32 -> vector<64x256xf32>
    %224 = vector.extract_strided_slice %0 {offsets = [7, 0], sizes = [1, 256], strides = [1, 1]} : vector<9x256xf32> to vector<1x256xf32>
    %225 = vector.broadcast %224 : vector<1x256xf32> to vector<64x256xf32>
    %226 = arith.mulf %223, %225 : vector<64x256xf32>
    %227 = arith.truncf %226 : vector<64x256xf32> to vector<64x256xbf16>
    %c7_87 = arith.constant 7 : index
    %c0_88 = arith.constant 0 : index
    %c0_89 = arith.constant 0 : index
    %228 = vector.load %arg7[%c7_87, %c0_88, %c0_89] : memref<9x1x64xbf16, #tpu.memory_space<vmem>>, vector<1x1x64xbf16>
    %229 = vector.shape_cast %228 : vector<1x1x64xbf16> to vector<1x64xbf16>
    %cst_90 = arith.constant dense<0.000000e+00> : vector<1x256xf32>
    %230 = tpu.matmul %229, %227, %cst_90 {dimension_numbers = #tpu.dot_dimension_numbers<[1], [0], [0], [1], [0, 0, 1, 1], [], []>} : vector<1x64xbf16>, vector<64x256xbf16>, vector<1x256xf32> -> vector<1x256xf32>
    %231 = arith.addf %222, %230 : vector<1x256xf32>
    %c239_i32_91 = arith.constant 239 : i32
    %232 = tpu.dynamic_rotate %162 by %c239_i32_91 dim 1 : vector<64x256xf32>, i32 -> vector<64x256xf32>
    %233 = vector.extract_strided_slice %0 {offsets = [8, 0], sizes = [1, 256], strides = [1, 1]} : vector<9x256xf32> to vector<1x256xf32>
    %234 = vector.broadcast %233 : vector<1x256xf32> to vector<64x256xf32>
    %235 = arith.mulf %232, %234 : vector<64x256xf32>
    %236 = arith.truncf %235 : vector<64x256xf32> to vector<64x256xbf16>
    %c8_92 = arith.constant 8 : index
    %c0_93 = arith.constant 0 : index
    %c0_94 = arith.constant 0 : index
    %237 = vector.load %arg7[%c8_92, %c0_93, %c0_94] : memref<9x1x64xbf16, #tpu.memory_space<vmem>>, vector<1x1x64xbf16>
    %238 = vector.shape_cast %237 : vector<1x1x64xbf16> to vector<1x64xbf16>
    %cst_95 = arith.constant dense<0.000000e+00> : vector<1x256xf32>
    %239 = tpu.matmul %238, %236, %cst_95 {dimension_numbers = #tpu.dot_dimension_numbers<[1], [0], [0], [1], [0, 0, 1, 1], [], []>} : vector<1x64xbf16>, vector<64x256xbf16>, vector<1x256xf32> -> vector<1x256xf32>
    %240 = arith.addf %231, %239 : vector<1x256xf32>
    %241 = vector.broadcast %4 : vector<1x1xf32> to vector<1x256xf32>
    %242 = arith.addf %240, %241 : vector<1x256xf32>
    %c0_96 = arith.constant 0 : index
    %c0_97 = arith.constant 0 : index
    %c0_98 = arith.constant 0 : index
    %243 = vector.load %arg9[%c0_96, %c0_97, %c0_98] : memref<1x1x256xf32, #tpu.memory_space<vmem>>, vector<1x1x256xf32>
    %244 = vector.shape_cast %243 : vector<1x1x256xf32> to vector<1x256xf32>
    %245 = vector.shape_cast %242 : vector<1x256xf32> to vector<1x1x256xf32>
    tpu.vector_store %arg9[%c0_96, %c0_97, %c0_98], %245 {strides = array<i32>} : memref<1x1x256xf32, #tpu.memory_space<vmem>>, vector<1x1x256xf32>,
    return
  }
  func.func @transform_0(%arg0: i32) -> (i32, i32, i32) {
    %c0_i32 = arith.constant 0 : i32
    %c0_i32_0 = arith.constant 0 : i32
    %c0_i32_1 = arith.constant 0 : i32
    return %arg0, %c0_i32, %c0_i32_0 : i32, i32, i32
  }
  func.func @transform_1(%arg0: i32) -> (i32, i32) {
    %c0_i32 = arith.constant 0 : i32
    %c0_i32_0 = arith.constant 0 : i32
    %c0_i32_1 = arith.constant 0 : i32
    return %c0_i32, %c0_i32_0 : i32, i32
  }
  func.func @transform_2(%arg0: i32) -> (i32, i32) {
    %c0_i32 = arith.constant 0 : i32
    %c0_i32_0 = arith.constant 0 : i32
    %c0_i32_1 = arith.constant 0 : i32
    return %c0_i32, %c0_i32_0 : i32, i32
  }
  func.func @transform_3(%arg0: i32) -> (i32, i32) {
    %c0_i32 = arith.constant 0 : i32
    %c0_i32_0 = arith.constant 0 : i32
    %c0_i32_1 = arith.constant 0 : i32
    return %c0_i32, %c0_i32_0 : i32, i32
  }
  func.func @transform_4(%arg0: i32) -> (i32, i32, i32) {
    %c0_i32 = arith.constant 0 : i32
    %c0_i32_0 = arith.constant 0 : i32
    %c0_i32_1 = arith.constant 0 : i32
    %c0_i32_2 = arith.constant 0 : i32
    return %c0_i32, %c0_i32_0, %c0_i32_1 : i32, i32, i32
  }
  func.func @transform_5(%arg0: i32) -> (i32, i32) {
    %c0_i32 = arith.constant 0 : i32
    %c0_i32_0 = arith.constant 0 : i32
    %c0_i32_1 = arith.constant 0 : i32
    return %c0_i32, %c0_i32_0 : i32, i32
  }
  func.func @transform_6(%arg0: i32) -> (i32, i32, i32) {
    %c0_i32 = arith.constant 0 : i32
    %c0_i32_0 = arith.constant 0 : i32
    %c0_i32_1 = arith.constant 0 : i32
    %c0_i32_2 = arith.constant 0 : i32
    return %c0_i32, %c0_i32_0, %c0_i32_1 : i32, i32, i32
  }
  func.func @transform_7(%arg0: i32) -> (i32, i32) {
    %c0_i32 = arith.constant 0 : i32
    %c0_i32_0 = arith.constant 0 : i32
    %c0_i32_1 = arith.constant 0 : i32
    return %c0_i32, %c0_i32_0 : i32, i32
  }
  func.func @transform_8(%arg0: i32) -> (i32, i32, i32) {
    %c0_i32 = arith.constant 0 : i32
    %c0_i32_0 = arith.constant 0 : i32
    %c0_i32_1 = arith.constant 0 : i32
    return %arg0, %c0_i32, %c0_i32_0 : i32, i32, i32
  }
}

</mosaic_0001>

<bundles_post_ra>
// kernel: unet_forward.1
= control target key start
LH: loop header
LB: loop body
LE: loop exit
PB: predicated region body
PF: predicated region fallthrough
CT: control target
= control target key end

     0   :  { %s7280_s0 = inlined_call_operand.vmem [shape: f32[2,1,256], index: 0, kind: input, shape index: {}]   ;;  %s7281_s1 = inlined_call_operand.vmem [shape: f32[9,256], index: 1, kind: input, shape index: {}]   ;;  %s7282_s2 = inlined_call_operand.vmem [shape: f32[64,9], index: 2, kind: input, shape index: {}]   ;;  %s7283_s3 = inlined_call_operand.vmem [shape: f32[64,1], index: 3, kind: input, shape index: {}]   ;;  %s7284_s4 = inlined_call_operand.hbm [shape: bf16[9,64,64], index: 4, kind: input, shape index: {}]   ;;  %s7285_s5 = inlined_call_operand.vmem [shape: f32[64,1], index: 5, kind: input, shape index: {}]   ;;  %s7286_s6 = inlined_call_operand.vmem [shape: bf16[9,1,64], index: 6, kind: input, shape index: {}]   ;;  %s7287_s7 = inlined_call_operand.<no memory space> [shape: f32[1,1], index: 7, kind: input, shape index: {}]   ;;  %s7288_s8 = inlined_call_operand.vmem [shape: f32[2,1,256], index: 8, kind: output, shape index: {}]  }
   0x1   :  { %v13_v0 = vstv %s7287_s7 }
   0x2   :  { %14 = vst [vmem:[#allocation2] sm:$0x1] %v13_v0 }
   0x3   :  { %15 = vsyncpa [#allocation4], 0  ;;  %s4235_s29 = smov 0  }
   0x4 LB: > { %s245_s10 = sshll.u32 %s7284_s4, 4  ;;  %s3763_s11 = sadd.s32 4294967295, %s4165_s29   ;;  %s4165_s29 = sphi %s4235_s29, %s21_s29   ;;  %s246_s10 = int_to_ptr.hbm [resolvable:$true] %s245_s10 }
   0x5   : > { %p3765_p0 = scmp.ge.s32.totalorder %s4165_s29, 1  ;;  %p225_p1 = scmp.lt.s32.totalorder %s4165_s29, 3 }
   0x6   : > { %p4060_p2 = scmp.eq.s32.totalorder %s3763_s11, 0  ;;  %s4167_s7 = smov [#allocation3]  }
   0x7   : > { %p226_p3 = pnand %p3765_p0, %p225_p1  ;;  %s247_s12 = sshll.u32 %s4167_s7, 4  ;;  %s248_s12 = int_to_ptr.vmem [resolvable:$true] %s247_s12 }
   0x8   : > { %s4168_s13 = smov 64   ;;  %s4169_s14 = smov 4  }
   0x9   : > { %p4056_p4 = pneg %p226_p3  ;;  %279 = sbr.rel (%p226_p3) target bundleno = 1583 (0x62f), region = 52 }
   0xb   : > { %p4057_p5 = pnand %p4060_p2, %p4056_p4 }
   0xd   : > { %4059 = dma.hbm_to_vmem [thread:$0]  (!%p4057_p5), %s246_s10, 4608, %s248_s12, [#allocation4], %s4168_s13, %s4168_s13, %s4169_s14  }
   0xe   : > { %4160 = dma.done.wait (%p4060_p2), [#allocation4], 4608  }
   0xf   : > { %4162 = vsyncadd (%p4060_p2), [#allocation4], 4294962688  ;;  %p312_p6 = scmp.lt.s32.totalorder %s3763_s11, 1  ;;  %v4170_v1 = vmov 0   ;;  %v4171_v2 = vmov 1   ;;  %v4259_v3 = vld [vmem:[%s7282_s2 + $0x10] sm:$0xff] }
  0x10   : > { %4091 = vset.pattern.permute.xlu2 %v4170_v1  ;;  %4090 = vset.pattern.permute.xlu1 %v4170_v1  ;;  %v4264_v4 = vld [vmem:[%s7282_s2] sm:$0xff]  ;;  %s4172_s23 = smov 17   ;;  %v4275_v7 = vld [vmem:[%s7282_s2 + $0x18] sm:$0xff]  ;;  %v4280_v8 = vld [vmem:[%s7282_s2 + $0x8] sm:$0xff]  ;;  %s4173_s7 = smov 16   ;;  %v4174_v14 = vmov 2  }
  0x11   : > { %s7602_s11 = smov (!%p312_p6, %s3763_s11), 1  ;;  %4094 = vset.pattern.permute.xlu0 %v4171_v2  ;;  %381 = vperm.xlu2 %4091, %v4259_v3   ;;  %v4291_v10 = vld [vmem:[%s7282_s2 + $0x30] sm:$0xff]  ;;  %v4296_v11 = vld [vmem:[%s7282_s2 + $0x28] sm:$0xff]  ;;  %v4305_v12 = vld [vmem:[%s7282_s2 + $0x38] sm:$0xff]  ;;  %s4175_s17 = smov 15   ;;  %v4177_v15 = vmov 3  }
  0x12   : > { %s3770_s15 = sshll.u32 %s7602_s11, 1  ;;  %371 = vperm.xlu1 %4090, %v4264_v4   ;;  %v4317_v13 = vld [vmem:[%s7282_s2 + $0x20] sm:$0xff]  ;;  %v4178_v16 = vmov 4   ;;  %s4179_s19 = smov 127   ;;  %v4180_v19 = vmov 5   ;;  %v4181_v27 = vmov 6  }
  0x13   : > { %s315_s18 = scalar_lea.vmem %s7280_s0, %s3770_s15  ;;  %s4182_s20 = smov 112   ;;  %v4183_v34 = vmov 7   ;;  %v4185_v44 = vmov 8   ;;  %v335_v56 = vld [vmem:[%s7283_s3 + $0x10] sm:$0xff]  ;;  %v340_v59 = vld [vmem:[%s7283_s3 + $0x38] sm:$0xff]  ;;  %vm1313_vm8 = vcmask 523264  }
  0x14   : > { %v350_v5 = vld [vmem:[%s315_s18] sm:$0x3]  ;;  %s4176_s18 = smov 1   ;;  %s4184_s21 = smov 111   ;;  %vm3690_vm9 = vcmask 1040384  }
  0x15   : > { %v4268_v6 = vperm.slane %v350_v5, 0  ;;  %v4282_v9 = vperm.slane %v350_v5, 1  ;;  %s4186_s22 = smov 113  }
  0x17   : > { %356 = vrot.lane.b32.xlu0 %v4268_v6, %s4172_s23  ;;  %7401 = vst [vmem:[#allocation6_spill] sm:$0xff] %v4282_v9 }
  0x19   : > { %386 = vperm.xlu2 %4091, %v4275_v7  }
  0x1a   : > { %376 = vperm.xlu1 %4090, %v4280_v8  }
  0x1f   : > { %358 = vrot.lane.b32.xlu0 %v4282_v9, %s4172_s23 }
  0x21   : > { %401 = vperm.xlu2 %4091, %v4291_v10  }
  0x22   : > { %396 = vperm.xlu1 %4090, %v4296_v11  }
  0x27   : > { %443 = vrot.lane.b32.xlu0 %v4282_v9, %s4173_s7 }
  0x29   : > { %441 = vrot.lane.b32.xlu2 %v4268_v6, %s4173_s7 }
  0x2a   : > { %406 = vperm.xlu1 %4090, %v4305_v12   ;;  %4093 = vset.pattern.permute.xlu2 %v4171_v2 }
  0x2f   : > { %467 = vperm.xlu0 %4094, %v4259_v3  }
  0x31   : > { %463 = vperm.xlu2 %4093, %v4280_v8  }
  0x32   : > { %4092 = vset.pattern.permute.xlu1 %v4171_v2 }
  0x33   : > { %459 = vperm.xlu1 %4092, %v4264_v4  }
  0x37   : > { %487 = vperm.xlu0 %4094, %v4305_v12  }
  0x39   : > { %475 = vperm.xlu2 %4093, %v4317_v13  }
  0x3b   : > { %471 = vperm.xlu1 %4092, %v4275_v7  }
  0x3f   : > { %4095 = vset.pattern.permute.xlu0 %v4174_v14 }
  0x40   : > { %538 = vperm.xlu0 %4095, %v4264_v4  }
  0x41   : > { %483 = vperm.xlu2 %4093, %v4291_v10  }
  0x43   : > { %479 = vperm.xlu1 %4092, %v4296_v11  }
  0x48   : > { %558 = vperm.xlu0 %4095, %v4296_v11  }
  0x49   : > { %524 = vrot.lane.b32.xlu2 %v4282_v9, %s4175_s17 }
  0x4a   : > { %4097 = vset.pattern.permute.xlu2 %v4174_v14 }
  0x4b   : > { %522 = vrot.lane.b32.xlu1 %v4268_v6, %s4175_s17 }
  0x4c   : > { %4096 = vset.pattern.permute.xlu1 %v4174_v14 }
  0x50   : > { %601 = vrot.lane.b32.xlu0 %v4268_v6, %s4176_s18 }
  0x51   : > { %4099 = vset.pattern.permute.xlu0 %v4177_v15  ;;  %546 = vperm.xlu2 %4097, %v4259_v3  }
  0x53   : > { %542 = vperm.xlu1 %4096, %v4280_v8  }
  0x58   : > { %621 = vperm.xlu0 %4099, %v4280_v8  }
  0x59   : > { %554 = vperm.xlu2 %4097, %v4317_v13  }
  0x5b   : > { %550 = vperm.xlu1 %4096, %v4275_v7  }
  0x60   : > { %641 = vperm.xlu0 %4099, %v4291_v10  }
  0x61   : > { %566 = vperm.xlu2 %4097, %v4305_v12  }
  0x63   : > { %562 = vperm.xlu1 %4096, %v4291_v10  }
  0x68   : > { %4102 = vset.pattern.permute.xlu0 %v4178_v16 }
  0x69   : > { %685 = vperm.xlu0 %4102, %v4280_v8   ;;  %4098 = vset.pattern.permute.xlu2 %v4177_v15 }
  0x6a   : > { %617 = vperm.xlu2 %4098, %v4264_v4  }
  0x6b   : > { %603 = vrot.lane.b32.xlu1 %v4282_v9, %s4176_s18  ;;  %v4343_v17 = vpop.permute.xlu2 %381 }
  0x6c   : > { %4100 = vset.pattern.permute.xlu1 %v4177_v15 }
  0x71   : > { %705 = vperm.xlu0 %4102, %v4291_v10  }
  0x72   : > { %629 = vperm.xlu2 %4098, %v4275_v7  }
  0x73   : > { %625 = vperm.xlu1 %4100, %v4259_v3   ;;  %v4348_v18 = vpop.permute.xlu2 %386 }
  0x79   : > { %746 = vrot.lane.b32.xlu0 %v4282_v9, %s4179_s19 }
  0x7a   : > { %4106 = vset.pattern.permute.xlu0 %v4180_v19  ;;  %637 = vperm.xlu2 %4098, %v4296_v11  }
  0x7b   : > { %633 = vperm.xlu1 %4100, %v4317_v13   ;;  %v4354_v20 = vpop.permute.xlu2 %401 }
  0x7c   : > { %7402 = vst [vmem:[#allocation7_spill] sm:$0xff] %v4354_v20 }
  0x81   : > { %768 = vperm.xlu0 %4106, %v4259_v3  }
  0x82   : > { %4101 = vset.pattern.permute.xlu2 %v4178_v16 }
  0x83   : > { %645 = vperm.xlu1 %4100, %v4305_v12   ;;  %v4358_v21 = vpop.permute.xlu2 %441  ;;  %681 = vperm.xlu2 %4101, %v4264_v4  }
  0x84   : > { %v4361_v22 = vpop.permute.xlu1 %371 }
  0x89   : > { %v4363_v23 = vpop.permute.xlu0 %356  ;;  %788 = vperm.xlu0 %4106, %v4305_v12  }
  0x8b   : > { %4103 = vset.pattern.permute.xlu1 %v4178_v16  ;;  %v4366_v24 = vpop.permute.xlu2 %463  ;;  %693 = vperm.xlu2 %4101, %v4275_v7  }
  0x8c   : > { %689 = vperm.xlu1 %4103, %v4259_v3   ;;  %v4370_v25 = vpop.permute.xlu1 %376 }
  0x91   : > { %v4372_v26 = vpop.permute.xlu0 %358  ;;  %4107 = vset.pattern.permute.xlu0 %v4181_v27 }
  0x92   : > { %839 = vperm.xlu0 %4107, %v4264_v4  }
  0x93   : > { %v4375_v28 = vpop.permute.xlu2 %475  ;;  %701 = vperm.xlu2 %4101, %v4296_v11  }
  0x94   : > { %697 = vperm.xlu1 %4103, %v4317_v13   ;;  %v4379_v29 = vpop.permute.xlu1 %396 }
  0x95   : > { %7403 = vst [vmem:[#allocation8_spill] sm:$0xff] %v4379_v29 }
  0x99   : > { %v4381_v30 = vpop.permute.xlu0 %443 }
  0x9a   : > { %859 = vperm.xlu0 %4107, %v4296_v11  }
  0x9b   : > { %v4384_v31 = vpop.permute.xlu2 %483  ;;  %744 = vrot.lane.b32.xlu2 %v4268_v6, %s4179_s19 }
  0x9c   : > { %709 = vperm.xlu1 %4103, %v4305_v12   ;;  %v4389_v32 = vpop.permute.xlu1 %406  ;;  %4105 = vset.pattern.permute.xlu2 %v4180_v19 }
  0xa1   : > { %v4391_v33 = vpop.permute.xlu0 %467 }
  0xa2   : > { %902 = vrot.lane.b32.xlu0 %v4268_v6, %s4182_s20 }
  0xa3   : > { %4111 = vset.pattern.permute.xlu0 %v4183_v34  ;;  %764 = vperm.xlu2 %4105, %v4280_v8   ;;  %v4396_v35 = vpop.permute.xlu2 %524 }
  0xa4   : > { %4104 = vset.pattern.permute.xlu1 %v4180_v19 }
  0xa5   : > { %760 = vperm.xlu1 %4104, %v4264_v4   ;;  %v4399_v36 = vpop.permute.xlu1 %459 }
  0xa6   : > { %7404 = vst [vmem:[#allocation9_spill] sm:$0xff] %v4399_v36 }
  0xa9   : > { %v4401_v37 = vpop.permute.xlu0 %487 }
  0xaa   : > { %922 = vperm.xlu0 %4111, %v4280_v8  }
  0xab   : > { %776 = vperm.xlu2 %4105, %v4317_v13   ;;  %v4405_v38 = vpop.permute.xlu2 %546 }
  0xac   : > { %7405 = vst [vmem:[#allocation10_spill] sm:$0xff] %v4405_v38 }
  0xad   : > { %772 = vperm.xlu1 %4104, %v4275_v7   ;;  %v4408_v39 = vpop.permute.xlu1 %471 }
  0xae   : > { %7406 = vst [vmem:[#allocation11_spill] sm:$0xff] %v4408_v39 }
  0xb2   : > { %942 = vperm.xlu0 %4111, %v4291_v10   ;;  %v4411_v40 = vpop.permute.xlu0 %538 }
  0xb3   : > { %7407 = vst [vmem:[#allocation12_spill] sm:$0xff] %v4411_v40  ;;  %784 = vperm.xlu2 %4105, %v4291_v10   ;;  %v4414_v41 = vpop.permute.xlu2 %554 }
  0xb5   : > { %780 = vperm.xlu1 %4104, %v4296_v11   ;;  %v4417_v42 = vpop.permute.xlu1 %479 }
  0xb6   : > { %7408 = vst [vmem:[#allocation13_spill] sm:$0xff] %v4417_v42 }
  0xba   : > { %983 = vrot.lane.b32.xlu0 %v4282_v9, %s4184_s21  ;;  %v4421_v43 = vpop.permute.xlu0 %558 }
  0xbb   : > { %7409 = vst [vmem:[#allocation14_spill] sm:$0xff] %v4421_v43  ;;  %4115 = vset.pattern.permute.xlu0 %v4185_v44  ;;  %825 = vrot.lane.b32.xlu2 %v4282_v9, %s4186_s22  ;;  %v4425_v45 = vpop.permute.xlu2 %566 }
  0xbc   : > { %4109 = vset.pattern.permute.xlu2 %v4181_v27 }
  0xbd   : > { %823 = vrot.lane.b32.xlu1 %v4268_v6, %s4186_s22  ;;  %v4429_v46 = vpop.permute.xlu1 %522 }
  0xbe   : > { %4108 = vset.pattern.permute.xlu1 %v4181_v27 }
  0xc2   : > { %1001 = vperm.xlu0 %4115, %v4259_v3   ;;  %v4432_v47 = vpop.permute.xlu0 %601 }
  0xc3   : > { %847 = vperm.xlu2 %4109, %v4259_v3  }
  0xc4   : > { %v4438_v49 = vpop.permute.xlu2 %617 }
  0xc5   : > { %843 = vperm.xlu1 %4108, %v4280_v8   ;;  %v4436_v48 = vpop.permute.xlu1 %542  ;;  %7411 = vst [vmem:[#allocation16_spill] sm:$0xff] %v4438_v49 }
  0xc6   : > { %7410 = vst [vmem:[#allocation15_spill] sm:$0xff] %v4436_v48 }
  0xca   : > { %1021 = vperm.xlu0 %4115, %v4305_v12   ;;  %v4441_v50 = vpop.permute.xlu0 %621 }
  0xcb   : > { %855 = vperm.xlu2 %4109, %v4317_v13  }
  0xcc   : > { %v4447_v52 = vpop.permute.xlu2 %629 }
  0xcd   : > { %851 = vperm.xlu1 %4108, %v4275_v7   ;;  %v4445_v51 = vpop.permute.xlu1 %550  ;;  %7413 = vst [vmem:[#allocation18_spill] sm:$0xff] %v4447_v52 }
  0xce   : > { %7412 = vst [vmem:[#allocation17_spill] sm:$0xff] %v4445_v51 }
  0xd2   : > { %4116 = vset.pattern.permute.xlu0 %v4170_v1  ;;  %v4450_v53 = vpop.permute.xlu0 %641 }
  0xd3   : > { %7414 = vst [vmem:[#allocation19_spill] sm:$0xff] %v4450_v53  ;;  %391 = vperm.xlu0 %4116, %v4317_v13   ;;  %867 = vperm.xlu2 %4109, %v4305_v12  }
  0xd4   : > { %v4457_v55 = vpop.permute.xlu2 %637 }
  0xd5   : > { %863 = vperm.xlu1 %4108, %v4291_v10   ;;  %v4455_v54 = vpop.permute.xlu1 %562  ;;  %7416 = vst [vmem:[#allocation21_spill] sm:$0xff] %v4457_v55 }
  0xd6   : > { %7415 = vst [vmem:[#allocation20_spill] sm:$0xff] %v4455_v54 }
  0xdb   : > { %v4462_v57 = vpop.permute.xlu0 %685  ;;  %1068 = vperm.xlu0 %4116, %v335_v56   ;;  %4110 = vset.pattern.permute.xlu2 %v4183_v34 }
  0xdc   : > { %7417 = vst [vmem:[#allocation22_spill] sm:$0xff] %v4462_v57  ;;  %918 = vperm.xlu2 %4110, %v4264_v4  }
  0xdd   : > { %904 = vrot.lane.b32.xlu1 %v4282_v9, %s4182_s20  ;;  %v4467_v58 = vpop.permute.xlu1 %603  ;;  %v4472_v60 = vpop.permute.xlu2 %681 }
  0xde   : > { %7418 = vst [vmem:[#allocation23_spill] sm:$0xff] %v4472_v60  ;;  %4112 = vset.pattern.permute.xlu1 %v4183_v34 }
  0xe3   : > { %v4474_v61 = vpop.permute.xlu0 %705  ;;  %1093 = vperm.xlu0 %4116, %v340_v59  }
  0xe4   : > { %7419 = vst [vmem:[#allocation24_spill] sm:$0xff] %v4474_v61  ;;  %930 = vperm.xlu2 %4110, %v4275_v7   ;;  %v7302_v61 = vlaneseq }
  0xe5   : > { %v4477_v62 = vpop.permute.xlu1 %625  ;;  %926 = vperm.xlu1 %4112, %v4259_v3   ;;  %v4480_v63 = vpop.permute.xlu2 %693 }
  0xe6   : > { %7420 = vst [vmem:[#allocation25_spill] sm:$0xff] %v4477_v62 }
  0xe7   : > { %7421 = vst [vmem:[#allocation26_spill] sm:$0xff] %v4480_v63  ;;  %v338_v63 = vld [vmem:[%s7283_s3 + $0x28] sm:$0xff] }
  0xeb   : > { %v4482_v0 = vpop.permute.xlu0 %746 }
  0xec   : > { %7422 = vst [vmem:[#allocation27_spill] sm:$0xff] %v4482_v0  ;;  %938 = vperm.xlu2 %4110, %v4296_v11  }
  0xed   : > { %v4485_v2 = vpop.permute.xlu1 %633  ;;  %934 = vperm.xlu1 %4112, %v4317_v13   ;;  %v4488_v5 = vpop.permute.xlu2 %701 }
  0xee   : > { %7423 = vst [vmem:[#allocation28_spill] sm:$0xff] %v4488_v5  ;;  %v336_v5 = vld [vmem:[%s7283_s3 + $0x18] sm:$0xff] }
  0xf3   : > { %v4490_v14 = vpop.permute.xlu0 %768 }
  0xf4   : > { %7424 = vst [vmem:[#allocation29_spill] sm:$0xff] %v4490_v14  ;;  %981 = vrot.lane.b32.xlu2 %v4268_v6, %s4184_s21 }
  0xf5   : > { %v4494_v15 = vpop.permute.xlu1 %645  ;;  %946 = vperm.xlu1 %4112, %v4305_v12   ;;  %v4497_v3 = vpop.permute.xlu2 %744  ;;  %4114 = vset.pattern.permute.xlu2 %v4185_v44 }
  0xf6   : > { %7425 = vst [vmem:[#allocation30_spill] sm:$0xff] %v4497_v3 }
  0xfb   : > { %v4499_v16 = vpop.permute.xlu0 %788 }
  0xfc   : > { %7426 = vst [vmem:[#allocation31_spill] sm:$0xff] %v4499_v16  ;;  %997 = vperm.xlu2 %4114, %v4280_v8  }
  0xfd   : > { %4113 = vset.pattern.permute.xlu1 %v4185_v44  ;;  %v4502_v19 = vpop.permute.xlu2 %764 }
  0xfe   : > { %7427 = vst [vmem:[#allocation32_spill] sm:$0xff] %v4502_v19  ;;  %v4504_v27 = vpop.permute.xlu1 %689  ;;  %993 = vperm.xlu1 %4113, %v4264_v4   ;;  %v334_v4 = vld [vmem:[%s7283_s3 + $0x8] sm:$0xff] }
  0xff   : > { %7428 = vst [vmem:[#allocation33_spill] sm:$0xff] %v4504_v27 }
 0x104   : > { %v4507_v34 = vpop.permute.xlu0 %839  ;;  %1009 = vperm.xlu2 %4114, %v4317_v13  }
 0x105   : > { %7429 = vst [vmem:[#allocation34_spill] sm:$0xff] %v4507_v34  ;;  %v4510_v56 = vpop.permute.xlu2 %776 }
 0x106   : > { %7430 = vst [vmem:[#allocation35_spill] sm:$0xff] %v4510_v56  ;;  %v4512_v12 = vpop.permute.xlu1 %697  ;;  %1005 = vperm.xlu1 %4113, %v4275_v7   ;;  %v333_v7 = vld [vmem:[%s7283_s3] sm:$0xff] }
 0x10c   : > { %v4515_v59 = vpop.permute.xlu0 %859  ;;  %1017 = vperm.xlu2 %4114, %v4291_v10  }
 0x10d   : > { %7431 = vst [vmem:[#allocation36_spill] sm:$0xff] %v4515_v59  ;;  %v4518_v8 = vpop.permute.xlu2 %784 }
 0x10e   : > { %7432 = vst [vmem:[#allocation37_spill] sm:$0xff] %v4518_v8  ;;  %v4520_v44 = vpop.permute.xlu1 %709  ;;  %1013 = vperm.xlu1 %4113, %v4296_v11   ;;  %v337_v11 = vld [vmem:[%s7283_s3 + $0x20] sm:$0xff] }
 0x114   : > { %4118 = vset.pattern.permute.xlu2 %v4170_v1  ;;  %v4535_v59 = vpop.permute.xlu0 %902 }
 0x115   : > { %1063 = vperm.xlu2 %4118, %v334_v4   ;;  %v4530_v13 = vpop.permute.xlu2 %825  ;;  %7435 = vst [vmem:[#allocation40_spill] sm:$0xff] %v4535_v59 }
 0x116   : > { %7433 = vst [vmem:[#allocation38_spill] sm:$0xff] %v4530_v13  ;;  %4117 = vset.pattern.permute.xlu1 %v4170_v1 }
 0x117   : > { %v4533_v10 = vpop.permute.xlu1 %760  ;;  %1058 = vperm.xlu1 %4117, %v333_v7   ;;  %v339_v7 = vld [vmem:[%s7283_s3 + $0x30] sm:$0xff] }
 0x118   : > { %7434 = vst [vmem:[#allocation39_spill] sm:$0xff] %v4533_v10 }
 0x11c   : > { %v4547_v1 = vpop.permute.xlu0 %922 }
 0x11d   : > { %1078 = vperm.xlu2 %4118, %v337_v11   ;;  %v4543_v55 = vpop.permute.xlu2 %847  ;;  %7438 = vst [vmem:[#allocation43_spill] sm:$0xff] %v4547_v1 }
 0x11e   : > { %7436 = vst [vmem:[#allocation41_spill] sm:$0xff] %v4543_v55 }
 0x11f   : > { %v4545_v4 = vpop.permute.xlu1 %772  ;;  %1073 = vperm.xlu1 %4117, %v336_v5  }
 0x120   : > { %7437 = vst [vmem:[#allocation42_spill] sm:$0xff] %v4545_v4 }
 0x124   : > { %v4559_v11 = vpop.permute.xlu0 %942 }
 0x125   : > { %1088 = vperm.xlu2 %4118, %v339_v7   ;;  %v4555_v8 = vpop.permute.xlu2 %855  ;;  %7441 = vst [vmem:[#allocation46_spill] sm:$0xff] %v4559_v11  ;;  %v4572_v7 = vand.u32 127, %v7302_v61 }
 0x126   : > { %7439 = vst [vmem:[#allocation44_spill] sm:$0xff] %v4555_v8 }
 0x127   : > { %v4557_v34 = vpop.permute.xlu1 %780  ;;  %1083 = vperm.xlu1 %4117, %v338_v63   ;;  %7446 = vst [vmem:[#allocation51_spill] sm:$0xff] %v4572_v7  ;;  %vm362_vm0 = vcmp.lt.s32.totalorder %v4572_v7, 17  ;;  %vm445_vm1 = vcmp.lt.s32.totalorder %v4572_v7, 16  ;;  %v4579_v63 = vld [vmem:[%s7281_s1] sm:$0xff]  ;;  %vm526_vm2 = vcmp.lt.s32.totalorder %v4572_v7, 15  ;;  %vm605_vm3 = vcmp.lt.s32.totalorder %v4572_v7, 1 }
 0x128   : > { %7440 = vst [vmem:[#allocation45_spill] sm:$0xff] %v4557_v34  ;;  %v450_v34 = vrot.slane %v4579_v63, 1  ;;  %v364_v11 = vsel %vm362_vm0, %v4372_v26, %v4363_v23  ;;  %v447_v61 = vsel %vm445_vm1, %v4381_v30, %v4358_v21  ;;  %v528_v60 = vsel %vm526_vm2, %v4396_v35, %v4429_v46 }
 0x129   : > { %7447 = vst [vmem:[#allocation52_spill] sm:$0xff] %v4579_v63  ;;  %v365_v49 = vmul.f32 %v364_v11, %v4579_v63  ;;  %v608_v42 = vrot.slane %v4579_v63, 3  ;;  %vm748_vm4 = vcmp.lt.s32.totalorder %v4572_v7, 127  ;;  %vm827_vm5 = vcmp.lt.s32.totalorder %v4572_v7, 113 }
 0x12a   : > { %v454_v40 = vmul.f32 %v450_v34, %v447_v61  ;;  %vm985_vm6 = vcmp.lt.s32.totalorder %v4572_v7, 111  ;;  %vm906_vm7 = vcmp.lt.s32.totalorder %v4572_v7, 112 }
 0x12c   : > { %v4565_v52 = vpop.permute.xlu0 %983  ;;  %v4611_v9 = vperm.slane %v454_v40, 0 }
 0x12d   : > { %v4561_v4 = vpop.permute.xlu2 %867  ;;  %7443 = vst [vmem:[#allocation48_spill] sm:$0xff] %v4565_v52 }
 0x12e   : > { %7442 = vst [vmem:[#allocation47_spill] sm:$0xff] %v4561_v4 }
 0x12f   : > { %v4563_v5 = vpop.permute.xlu1 %823 }
 0x134   : > { %v4601_v54 = vpop.permute.xlu0 %1001 }
 0x135   : > { %7450 = vst [vmem:[#allocation55_spill] sm:$0xff] %v4601_v54 }
 0x136   : > { %v4567_v10 = vpop.permute.xlu2 %918 }
 0x137   : > { %7444 = vst [vmem:[#allocation49_spill] sm:$0xff] %v4567_v10  ;;  %v4569_v51 = vpop.permute.xlu1 %843  ;;  %v529_v10 = vrot.slane %v4579_v63, 2 }
 0x138   : > { %7445 = vst [vmem:[#allocation50_spill] sm:$0xff] %v4569_v51 }
 0x139   : > { %v533_v39 = vmul.f32 %v529_v10, %v528_v60  ;;  %v494_v60 = vmul.f32 %v4391_v33, %v4611_v9  ;;  %v751_v10 = vrot.slane %v4579_v63, 5 }
 0x13b   : > { %v4613_v8 = vperm.slane %v533_v39, 0 }
 0x13c   : > { %v4637_v11 = vpop.permute.xlu0 %1021 }
 0x13d   : > { %7453 = vst [vmem:[#allocation58_spill] sm:$0xff] %v4637_v11 }
 0x13e   : > { %v4592_v53 = vpop.permute.xlu2 %930 }
 0x13f   : > { %7448 = vst [vmem:[#allocation53_spill] sm:$0xff] %v4592_v53  ;;  %v4594_v43 = vpop.permute.xlu1 %851  ;;  %v607_v53 = vsel %vm605_vm3, %v4467_v58, %v4432_v47 }
 0x140   : > { %7449 = vst [vmem:[#allocation54_spill] sm:$0xff] %v4594_v43  ;;  %v4609_v43 = vperm.slane %v365_v49, 0  ;;  %v612_v4 = vmul.f32 %v608_v42, %v607_v53  ;;  %v830_v49 = vrot.slane %v4579_v63, 6  ;;  %v749_v42 = vsel %vm748_vm4, %v4497_v3, %v4482_v0 }
 0x141   : > { %v828_v53 = vsel %vm827_vm5, %v4563_v5, %v4530_v13  ;;  %v755_v16 = vmul.f32 %v751_v10, %v749_v42  ;;  %v716_v3 = vmul.f32 %v4504_v27, %v4268_v6 }
 0x142   : > { %v413_v40 = vmul.f32 %v4343_v17, %v4609_v43  ;;  %v4627_v39 = vperm.slane %v612_v4, 0  ;;  %v834_v36 = vmul.f32 %v830_v49, %v828_v53 }
 0x143   : > { %v4663_v49 = vperm.slane %v755_v16, 0 }
 0x144   : > { %v652_v4 = vmul.f32 %v4477_v62, %v4627_v39 }
 0x145   : > { %v795_v53 = vmul.f32 %v4490_v14, %v4663_v49  ;;  %v4669_v62 = vpop.permute.xlu0 %391 }
 0x146   : > { %v4617_v61 = vpop.permute.xlu2 %938  ;;  %7456 = vst [vmem:[#allocation61_spill] sm:$0xff] %v4669_v62 }
 0x147   : > { %7451 = vst [vmem:[#allocation56_spill] sm:$0xff] %v4617_v61  ;;  %v4619_v34 = vpop.permute.xlu1 %863  ;;  %v573_v61 = vmul.f32 %v4405_v38, %v4613_v8  ;;  %v909_v38 = vrot.slane %v4579_v63, 7 }
 0x148   : > { %7452 = vst [vmem:[#allocation57_spill] sm:$0xff] %v4619_v34  ;;  %v510_v34 = vadd.f32 %v494_v60, %v413_v40  ;;  %v323_v60 = vld [vmem:[%s7281_s1 + $0x10] sm:$0x1]  ;;  %v4665_v40 = vperm.slane %v834_v36, 0 }
 0x14a   : > { %v589_v0 = vadd.f32 %v573_v61, %v510_v34  ;;  %v874_v36 = vmul.f32 %v4543_v55, %v4665_v40 }
 0x14c   : > { %v668_v34 = vadd.f32 %v652_v4, %v589_v0  ;;  %v363_v0 = vsel %vm362_vm0, %v4363_v23, %v4372_v26  ;;  %v492_v23 = vmul.f32 %v4366_v24, %v4611_v9 }
 0x14e   : > { %v4647_v13 = vpop.permute.xlu2 %981  ;;  %v732_v42 = vadd.f32 %v716_v3, %v668_v34 }
 0x14f   : > { %7454 = vst [vmem:[#allocation59_spill] sm:$0xff] %v4647_v13  ;;  %v4649_v11 = vpop.permute.xlu1 %904  ;;  %v986_v10 = vsel %vm985_vm6, %v4647_v13, %v4565_v52  ;;  %v4674_v52 = vld [vmem:[%s7281_s1 + $0x8] sm:$0xff] }
 0x150   : > { %7455 = vst [vmem:[#allocation60_spill] sm:$0xff] %v4649_v11  ;;  %v907_v61 = vsel %vm906_vm7, %v4535_v59, %v4649_v11  ;;  %v988_v63 = vmul.f32 %v986_v10, %v323_v60  ;;  %v811_v3 = vadd.f32 %v795_v53, %v732_v42  ;;  %v366_v60 = vmul.f32 %v363_v0, %v4674_v52 }
 0x151   : > { %v913_v27 = vmul.f32 %v909_v38, %v907_v61  ;;  %7457 = vst [vmem:[#allocation62_spill] sm:$0xff] %v4674_v52  ;;  %v446_v10 = vsel %vm445_vm1, %v4358_v21, %v4381_v30  ;;  %v451_v61 = vrot.slane %v4674_v52, 1  ;;  %v411_v21 = vmul.f32 %v4370_v25, %v4609_v43 }
 0x152   : > { %v4682_v16 = vperm.slane %v988_v63, 0  ;;  %v890_v63 = vadd.f32 %v874_v36, %v811_v3  ;;  %v571_v30 = vmul.f32 %v4436_v48, %v4613_v8  ;;  %v498_v53 = vmul.f32 %v4375_v28, %v4611_v9  ;;  %v4712_v36 = vpop.permute.xlu0 %1068 }
 0x153   : > { %v4684_v4 = vperm.slane %v913_v27, 0  ;;  %v417_v27 = vmul.f32 %v4669_v62, %v4609_v43  ;;  %v4710_v55 = vperm.slane %v366_v60, 0  ;;  %v455_v62 = vmul.f32 %v451_v61, %v446_v10 }
 0x154   : > { %v1028_v42 = vmul.f32 %v4601_v54, %v4682_v16  ;;  %v508_v3 = vadd.f32 %v492_v23, %v411_v21  ;;  %v577_v11 = vmul.f32 %v4414_v41, %v4613_v8  ;;  %v4723_v60 = vmul.f32 %v4379_v29, %v4609_v43 }
 0x155   : > { %7460 = vst [vmem:[#allocation65_spill] sm:$0xff] %v4710_v55  ;;  %v514_v54 = vadd.f32 %v498_v53, %v417_v27  ;;  %v4725_v10 = vperm.slane %v455_v62, 0  ;;  %v421_v61 = vmul.f32 %v4354_v20, %v4609_v43  ;;  %v414_v23 = vmul.f32 %v4343_v17, %v4710_v55 }
 0x156   : > { %v4686_v38 = vpop.permute.xlu2 %997  ;;  %v587_v14 = vadd.f32 %v571_v30, %v508_v3  ;;  %v4739_v21 = vmul.f32 %v4361_v22, %v4609_v43  ;;  %v4743_v62 = vmul.f32 %v4361_v22, %v4710_v55  ;;  %v4747_v17 = vmul.f32 %v4348_v18, %v4609_v43 }
 0x157   : > { %7458 = vst [vmem:[#allocation63_spill] sm:$0xff] %v4686_v38  ;;  %v4696_v26 = vpop.permute.xlu1 %926  ;;  %v530_v30 = vrot.slane %v4674_v52, 2  ;;  %v793_v22 = vmul.f32 %v4502_v19, %v4663_v49  ;;  %v583_v20 = vmul.f32 %v4425_v45, %v4613_v8 }
 0x158   : > { %7459 = vst [vmem:[#allocation64_spill] sm:$0xff] %v4696_v26  ;;  %v953_v34 = vmul.f32 %v4696_v26, %v4684_v4  ;;  %v650_v26 = vmul.f32 %v4441_v50, %v4627_v39 }
 0x159   : > { %7462 = vst [vmem:[#allocation67_spill] sm:$0xff] %v4725_v10 }
 0x15a   : > { %v969_v0 = vadd.f32 %v953_v34, %v890_v63  ;;  %v714_v63 = vmul.f32 %v4462_v57, %v4268_v6  ;;  %v593_v34 = vadd.f32 %v577_v11, %v514_v54  ;;  %v656_v54 = vmul.f32 %v4485_v2, %v4627_v39 }
 0x15b   : > { %v502_v11 = vmul.f32 %v4384_v31, %v4611_v9 }
 0x15c   : > { %v1044_v13 = vadd.f32 %v1028_v42, %v969_v0  ;;  %v872_v0 = vmul.f32 %v4569_v51, %v4665_v40  ;;  %v672_v3 = vadd.f32 %v656_v54, %v593_v34  ;;  %v4795_v34 = vmul.f32 %v4389_v32, %v4710_v55 }
 0x15d   : > { %v4803_v54 = vadd.f32 %v502_v11, %v421_v61  ;;  %v726_v51 = vmul.f32 %v4520_v44, %v4268_v6  ;;  %v1026_v61 = vmul.f32 %v4686_v38, %v4682_v16 }
 0x15e   : > { %v1100_v48 = vadd.f32 %v4712_v36, %v1044_v13  ;;  %v4719_v59 = vpop.permute.xlu2 %1009  ;;  %v666_v13 = vadd.f32 %v650_v26, %v587_v14  ;;  %v4752_v14 = vmul.f32 %v4348_v18, %v4710_v55  ;;  %v504_v18 = vmul.f32 %v4401_v37, %v4611_v9 }
 0x15f   : > { %7461 = vst [vmem:[#allocation66_spill] sm:$0xff] %v4719_v59  ;;  %v4731_v27 = vpop.permute.xlu1 %934  ;;  %v412_v26 = vmul.f32 %v4370_v25, %v4710_v55  ;;  %v609_v25 = vrot.slane %v4674_v52, 3 }
 0x160   : > { %7463 = vst [vmem:[#allocation68_spill] sm:$0xff] %v4731_v27  ;;  %v4735_v42 = vmax.f32 %v1100_v48, 0.0  ;;  %v527_v48 = vsel %vm526_vm2, %v4429_v46, %v4396_v35  ;;  %v493_v35 = vmul.f32 %v4366_v24, %v4725_v10  ;;  %v4774_v46 = vmul.f32 %v4384_v31, %v4725_v10 }
 0x161   : > { %7465 = vst [vmem:[#allocation70_spill] sm:$0xff] %v4752_v14  ;;  %v730_v53 = vadd.f32 %v714_v63, %v666_v13  ;;  %v534_v29 = vmul.f32 %v530_v30, %v527_v48  ;;  %v606_v24 = vsel %vm605_vm3, %v4432_v47, %v4467_v58  ;;  %v720_v63 = vmul.f32 %v4512_v12, %v4268_v6 }
 0x162   : > { %7464 = vst [vmem:[#allocation69_spill] sm:$0xff] %v4735_v42  ;;  %1132 = vrot.lane.b32.xlu0 %v4735_v42, %s4172_s23  ;;  %v423_v42 = vmul.f32 %v4389_v32, %v4609_v43  ;;  %v951_v43 = vmul.f32 %v4547_v1, %v4684_v4  ;;  %v495_v30 = vmul.f32 %v4391_v33, %v4725_v10 }
 0x163   : > { %7466 = vst [vmem:[#allocation71_spill] sm:$0xff] %v4774_v46  ;;  %v809_v31 = vadd.f32 %v793_v22, %v730_v53  ;;  %v662_v47 = vmul.f32 %v4494_v15, %v4627_v39  ;;  %v4805_v22 = vadd.f32 %v493_v35, %v412_v26  ;;  %v736_v46 = vadd.f32 %v720_v63, %v672_v3  ;;  %v7467_v35 = vld [vmem:[#allocation9_spill] sm:$0xff]  ;;  %v7468_v3 = vld [vmem:[#allocation30_spill] sm:$0xff] }
 0x164   : > { %v520_v48 = vadd.f32 %v504_v18, %v423_v42  ;;  %v4807_v14 = vperm.slane %v534_v29, 0  ;;  %v613_v32 = vmul.f32 %v609_v25, %v606_v24  ;;  %v799_v33 = vmul.f32 %v4510_v56, %v4663_v49  ;;  %v7469_v25 = vld [vmem:[#allocation27_spill] sm:$0xff] }
 0x165   : > { %v888_v53 = vadd.f32 %v872_v0, %v809_v31  ;;  %v4815_v42 = vmul.f32 %v4375_v28, %v4725_v10  ;;  %v511_v18 = vadd.f32 %v495_v30, %v414_v23  ;;  %v752_v29 = vrot.slane %v4674_v52, 5  ;;  %v7470_v28 = vld [vmem:[#allocation38_spill] sm:$0xff]  ;;  %v7472_v30 = vld [vmem:[#allocation31_spill] sm:$0xff] }
 0x166   : > { %v4789_v13 = vpop.permute.xlu2 %1017  ;;  %v599_v1 = vadd.f32 %v583_v20, %v520_v48  ;;  %v831_v20 = vrot.slane %v4674_v52, 6  ;;  %v490_v0 = vmul.f32 %v7467_v35, %v4611_v9  ;;  %v750_v24 = vsel %vm748_vm4, %v7469_v25, %v7468_v3  ;;  %v7473_v3 = vld [vmem:[#allocation44_spill] sm:$0xff] }
 0x167   : > { %v4801_v58 = vpop.permute.xlu1 %946  ;;  %v967_v11 = vadd.f32 %v951_v43, %v888_v53  ;;  %v829_v31 = vsel %vm827_vm5, %v7470_v28, %v4563_v5  ;;  %v815_v63 = vadd.f32 %v799_v33, %v736_v46  ;;  %v4831_v23 = vperm.slane %v613_v32, 0  ;;  %v7474_v32 = vld [vmem:[#allocation25_spill] sm:$0xff] }
 0x168   : > { %v678_v26 = vadd.f32 %v662_v47, %v599_v1  ;;  %v7471_v1 = vld [vmem:[#allocation10_spill] sm:$0xff]  ;;  %v805_v48 = vmul.f32 %v7472_v30, %v4663_v49  ;;  %v491_v53 = vmul.f32 %v7467_v35, %v4725_v10  ;;  %v878_v25 = vmul.f32 %v7473_v3, %v4665_v40  ;;  %v7476_v35 = vld [vmem:[#allocation47_spill] sm:$0xff] }
 0x169   : > { %v574_v43 = vmul.f32 %v7471_v1, %v4807_v14  ;;  %v957_v38 = vmul.f32 %v4731_v27, %v4684_v4  ;;  %v1042_v5 = vadd.f32 %v1026_v61, %v967_v11  ;;  %v505_v46 = vmul.f32 %v4401_v37, %v4725_v10  ;;  %v7477_v11 = vld [vmem:[#allocation6_spill] sm:$0xff]  ;;  %v7478_v37 = vld [vmem:[#allocation33_spill] sm:$0xff] }
 0x16a   : > { %v742_v47 = vadd.f32 %v726_v51, %v678_v26  ;;  %v653_v33 = vmul.f32 %v7474_v32, %v4831_v23  ;;  %v756_v28 = vmul.f32 %v752_v29, %v750_v24  ;;  %v835_v1 = vmul.f32 %v831_v20, %v829_v31  ;;  %v7479_v32 = vld [vmem:[#allocation40_spill] sm:$0xff] }
 0x16b   : > { %v910_v51 = vrot.slane %v4674_v52, 7  ;;  %v894_v26 = vadd.f32 %v878_v25, %v815_v63  ;;  %v884_v3 = vmul.f32 %v7476_v35, %v4665_v40  ;;  %v590_v61 = vadd.f32 %v574_v43, %v511_v18  ;;  %v7480_v29 = vld [vmem:[#allocation60_spill] sm:$0xff] }
 0x16c   : > { %v717_v10 = vmul.f32 %v7478_v37, %v7477_v11  ;;  %v821_v57 = vadd.f32 %v805_v48, %v742_v47  ;;  %v908_v20 = vsel %vm906_vm7, %v7480_v29, %v7479_v32  ;;  %v1032_v24 = vmul.f32 %v4719_v59, %v4682_v16  ;;  %v7482_v48 = vld [vmem:[#allocation11_spill] sm:$0xff] }
 0x16d   : > { %v973_v31 = vadd.f32 %v957_v38, %v894_v26  ;;  %v963_v63 = vmul.f32 %v4801_v58, %v4684_v4  ;;  %v506_v18 = vadd.f32 %v490_v0, %v4739_v21  ;;  %v507_v43 = vadd.f32 %v491_v53, %v4743_v62  ;;  %v7484_v21 = vld [vmem:[#allocation12_spill] sm:$0xff]  ;;  %v7485_v62 = vld [vmem:[#allocation29_spill] sm:$0xff]  ;;  %v7488_v26 = vld [vmem:[#allocation58_spill] sm:$0xff] }
 0x16e   : > { %v496_v47 = vmul.f32 %v7482_v48, %v4611_v9  ;;  %v669_v37 = vadd.f32 %v653_v33, %v590_v61  ;;  %v4873_v32 = vperm.slane %v835_v1, 0  ;;  %v914_v29 = vmul.f32 %v910_v51, %v908_v20  ;;  %v324_v33 = vld [vmem:[%s7281_s1 + $0x18] sm:$0x1] }
 0x16f   : > { %v4847_v19 = vpop.permute.xlu2 %1063  ;;  %v900_v52 = vadd.f32 %v884_v3, %v821_v57  ;;  %v569_v0 = vmul.f32 %v7484_v21, %v4613_v8  ;;  %v7487_v1 = vld [vmem:[#allocation48_spill] sm:$0xff]  ;;  %v1048_v61 = vadd.f32 %v1032_v24, %v973_v31  ;;  %v521_v20 = vadd.f32 %v505_v46, %v4795_v34 }
 0x170   : > { %7475 = vst [vmem:[#allocation9_spill] sm:$0xff] %v4847_v19  ;;  %v1098_v56 = vadd.f32 %v4847_v19, %v1042_v5  ;;  %v4853_v27 = vpop.permute.xlu1 %993  ;;  %v4871_v5 = vperm.slane %v756_v28, 0  ;;  %v7486_v28 = vld [vmem:[#allocation59_spill] sm:$0xff]  ;;  %v733_v3 = vadd.f32 %v717_v10, %v669_v37  ;;  %v4901_v10 = vperm.slane %v914_v29, 0  ;;  %v7492_v31 = vld [vmem:[#allocation20_spill] sm:$0xff] }
 0x171   : > { %v987_v57 = vsel %vm985_vm6, %v7487_v1, %v7486_v28  ;;  %v979_v51 = vadd.f32 %v963_v63, %v900_v52  ;;  %v7491_v52 = vld [vmem:[#allocation41_spill] sm:$0xff]  ;;  %v581_v37 = vmul.f32 %v7492_v31, %v4613_v8 }
 0x172   : > { %v4865_v25 = vmax.f32 %v1098_v56, 0.0  ;;  %v7483_v56 = vld [vmem:[#allocation13_spill] sm:$0xff]  ;;  %v796_v53 = vmul.f32 %v7485_v62, %v4871_v5  ;;  %v584_v62 = vmul.f32 %v4425_v45, %v4807_v14  ;;  %v989_v28 = vmul.f32 %v987_v57, %v324_v33  ;;  %v7493_v33 = vld [vmem:[#allocation64_spill] sm:$0xff] }
 0x173   : > { %v500_v38 = vmul.f32 %v7483_v56, %v4611_v9  ;;  %v1038_v9 = vmul.f32 %v7488_v26, %v4682_v16  ;;  %v7489_v56 = vld [vmem:[#allocation16_spill] sm:$0xff]  ;;  %v875_v63 = vmul.f32 %v7491_v52, %v4873_v32  ;;  %v512_v45 = vadd.f32 %v496_v47, %v4747_v17  ;;  %v7496_v17 = vld [vmem:[#allocation14_spill] sm:$0xff]  ;;  %v4922_v47 = vpop.permute.xlu0 %1093 }
 0x174   : > { %7481 = vst [vmem:[#allocation30_spill] sm:$0xff] %v4865_v25  ;;  %1130 = vrot.lane.b32.xlu2 %v4865_v25, %s4172_s23  ;;  %v570_v25 = vmul.f32 %v7484_v21, %v4807_v14  ;;  %v648_v19 = vmul.f32 %v7489_v56, %v4627_v39  ;;  %v585_v21 = vadd.f32 %v569_v0, %v506_v18  ;;  %v7498_v18 = vld [vmem:[#allocation19_spill] sm:$0xff] }
 0x175   : > { %v516_v46 = vadd.f32 %v500_v38, %v4723_v60  ;;  %v812_v1 = vadd.f32 %v796_v53, %v733_v3  ;;  %v954_v29 = vmul.f32 %v7493_v33, %v4901_v10  ;;  %v1054_v57 = vadd.f32 %v1038_v9, %v979_v51  ;;  %7497 = vst [vmem:[#allocation10_spill] sm:$0xff] %v4922_v47  ;;  %v7500_v51 = vld [vmem:[#allocation17_spill] sm:$0xff] }
 0x176   : > { %v600_v52 = vadd.f32 %v584_v62, %v521_v20  ;;  %v4916_v48 = vadd.f32 %v570_v25, %v507_v43  ;;  %v579_v60 = vmul.f32 %v7496_v17, %v4613_v8  ;;  %v664_v38 = vadd.f32 %v648_v19, %v585_v21  ;;  %v7499_v25 = vld [vmem:[#allocation15_spill] sm:$0xff]  ;;  %v7501_v62 = vld [vmem:[#allocation61_spill] sm:$0xff] }
 0x177   : > { %v4899_v59 = vpop.permute.xlu2 %1078  ;;  %v660_v0 = vmul.f32 %v7498_v18, %v4627_v39  ;;  %v4926_v53 = vperm.slane %v989_v28, 0  ;;  %v891_v3 = vadd.f32 %v875_v63, %v812_v1  ;;  %v572_v43 = vmul.f32 %v7499_v25, %v4807_v14  ;;  %v7503_v63 = vld [vmem:[#allocation55_spill] sm:$0xff]  ;;  %v7505_v18 = vld [vmem:[#allocation24_spill] sm:$0xff] }
 0x178   : > { %7490 = vst [vmem:[#allocation27_spill] sm:$0xff] %v4899_v59  ;;  %v1104_v24 = vadd.f32 %v4899_v59, %v1048_v61  ;;  %v4906_v34 = vpop.permute.xlu1 %1005  ;;  %v7495_v61 = vld [vmem:[#allocation23_spill] sm:$0xff]  ;;  %v575_v9 = vmul.f32 %v7500_v51, %v4613_v8  ;;  %v597_v20 = vadd.f32 %v581_v37, %v4803_v54  ;;  %v418_v19 = vmul.f32 %v7501_v62, %v4710_v55  ;;  %v7507_v55 = vld [vmem:[#allocation37_spill] sm:$0xff] }
 0x179   : > { %v712_v59 = vmul.f32 %v7495_v61, %v4268_v6  ;;  %v970_v28 = vadd.f32 %v954_v29, %v891_v3  ;;  %v1029_v1 = vmul.f32 %v7503_v63, %v4926_v53  ;;  %v1110_v33 = vadd.f32 %v4922_v47, %v1054_v57  ;;  %v7506_v63 = vld [vmem:[#allocation34_spill] sm:$0xff] }
 0x17a   : > { %v4914_v7 = vmax.f32 %v1104_v24, 0.0  ;;  %v7502_v24 = vld [vmem:[#allocation39_spill] sm:$0xff]  ;;  %v595_v17 = vadd.f32 %v579_v60, %v516_v46  ;;  %v663_v8 = vmul.f32 %v4494_v15, %v4831_v23  ;;  %v578_v54 = vmul.f32 %v4414_v41, %v4807_v14 }
 0x17b   : > { %v791_v21 = vmul.f32 %v7502_v24, %v4663_v49  ;;  %v728_v37 = vadd.f32 %v712_v59, %v664_v38  ;;  %v676_v62 = vadd.f32 %v660_v0, %v597_v20  ;;  %v724_v29 = vmul.f32 %v7505_v18, %v4268_v6  ;;  %v7508_v0 = vld [vmem:[#allocation49_spill] sm:$0xff] }
 0x17c   : > { %7494 = vst [vmem:[#allocation38_spill] sm:$0xff] %v4914_v7  ;;  %1136 = vrot.lane.b32.xlu2 %v4914_v7, %s4172_s23  ;;  %v7504_v7 = vld [vmem:[#allocation18_spill] sm:$0xff]  ;;  %v870_v57 = vmul.f32 %v7506_v63, %v4665_v40  ;;  %v591_v31 = vadd.f32 %v575_v9, %v512_v45  ;;  %v803_v46 = vmul.f32 %v7507_v55, %v4663_v49  ;;  %v4959_v38 = vmax.f32 %v1110_v33, 0.0  ;;  %v7510_v63 = vld [vmem:[#allocation57_spill] sm:$0xff] }
 0x17d   : > { %v654_v25 = vmul.f32 %v7504_v7, %v4627_v39  ;;  %v727_v15 = vmul.f32 %v4520_v44, %v7477_v11  ;;  %v515_v60 = vadd.f32 %v4815_v42, %v418_v19  ;;  %v807_v41 = vadd.f32 %v791_v21, %v728_v37  ;;  %v7509_v45 = vld [vmem:[#allocation26_spill] sm:$0xff] }
 0x17e   : > { %v1045_v59 = vadd.f32 %v1029_v1, %v970_v28  ;;  %v949_v20 = vmul.f32 %v7508_v0, %v4684_v4  ;;  %v588_v18 = vadd.f32 %v572_v43, %v4805_v22  ;;  %v718_v9 = vmul.f32 %v7509_v45, %v4268_v6  ;;  %v7512_v33 = vld [vmem:[#allocation46_spill] sm:$0xff] }
 0x17f   : > { %v670_v7 = vadd.f32 %v654_v25, %v591_v31  ;;  %v679_v47 = vadd.f32 %v663_v8, %v600_v52  ;;  %v740_v55 = vadd.f32 %v724_v29, %v676_v62  ;;  %v882_v44 = vmul.f32 %v7510_v63, %v4665_v40  ;;  %v7511_v31 = vld [vmem:[#allocation42_spill] sm:$0xff]  ;;  %v7513_v29 = vld [vmem:[#allocation21_spill] sm:$0xff] }
 0x180   : > { %v4950_v3 = vpop.permute.xlu1 %1013  ;;  %v1024_v42 = vmul.f32 %v4853_v27, %v4682_v16  ;;  %v886_v19 = vadd.f32 %v870_v57, %v807_v41  ;;  %v806_v21 = vmul.f32 %v7472_v30, %v4871_v5  ;;  %v797_v43 = vmul.f32 %v7511_v31, %v4663_v49 }
 0x181   : > { %v743_v22 = vadd.f32 %v727_v15, %v679_v47  ;;  %v594_v28 = vadd.f32 %v578_v54, %v515_v60  ;;  %v819_v52 = vadd.f32 %v803_v46, %v740_v55  ;;  %v1101_v1 = vadd.f32 %v4712_v36, %v1045_v59  ;;  %v7514_v47 = vld [vmem:[#allocation54_spill] sm:$0xff] }
 0x182   : > { %v961_v25 = vmul.f32 %v7512_v33, %v4684_v4  ;;  %v965_v8 = vadd.f32 %v949_v20, %v886_v19  ;;  %v734_v37 = vadd.f32 %v718_v9, %v670_v7  ;;  %v657_v62 = vmul.f32 %v4485_v2, %v4831_v23  ;;  %v7515_v2 = vld [vmem:[#allocation53_spill] sm:$0xff] }
 0x183   : > { %v658_v57 = vmul.f32 %v7513_v29, %v4627_v39  ;;  %v885_v30 = vmul.f32 %v7476_v35, %v4873_v32  ;;  %v876_v54 = vmul.f32 %v7514_v47, %v4665_v40  ;;  %v898_v55 = vadd.f32 %v882_v44, %v819_v52  ;;  %v7516_v44 = vld [vmem:[#allocation28_spill] sm:$0xff] }
 0x184   : > { %1142 = vrot.lane.b32.xlu2 %v4959_v38, %s4172_s23  ;;  %v1036_v36 = vmul.f32 %v4789_v13, %v4682_v16  ;;  %v1040_v46 = vadd.f32 %v1024_v42, %v965_v8  ;;  %v822_v15 = vadd.f32 %v806_v21, %v743_v22  ;;  %v813_v60 = vadd.f32 %v797_v43, %v734_v37  ;;  %v5004_v43 = vpop.permute.xlu2 %1088 }
 0x185   : > { %v673_v7 = vadd.f32 %v657_v62, %v594_v28  ;;  %v955_v59 = vmul.f32 %v7515_v2, %v4684_v4  ;;  %v4993_v39 = vmax.f32 %v1101_v1, 0.0  ;;  %v964_v35 = vmul.f32 %v4801_v58, %v4901_v10 }
 0x186   : > { %v977_v20 = vadd.f32 %v961_v25, %v898_v55  ;;  %v722_v19 = vmul.f32 %v7516_v44, %v4268_v6  ;;  %v651_v42 = vmul.f32 %v4441_v50, %v4831_v23  ;;  %v721_v21 = vmul.f32 %v4512_v12, %v7477_v11  ;;  %v7517_v25 = vld [vmem:[#allocation45_spill] sm:$0xff]  ;;  %v7518_v55 = vld [vmem:[#allocation22_spill] sm:$0xff] }
 0x187   : > { %v901_v22 = vadd.f32 %v885_v30, %v822_v15  ;;  %v892_v28 = vadd.f32 %v876_v54, %v813_v60  ;;  %v1030_v52 = vmul.f32 %v4906_v34, %v4682_v16  ;;  %v649_v6 = vmul.f32 %v7489_v56, %v4831_v23  ;;  %v7521_v15 = vld [vmem:[#allocation11_spill] sm:$0xff] }
 0x188   : > { %v1052_v58 = vadd.f32 %v1036_v36, %v977_v20  ;;  %v674_v50 = vadd.f32 %v658_v57, %v595_v17  ;;  %v801_v12 = vmul.f32 %v7517_v25, %v4663_v49  ;;  %v737_v8 = vadd.f32 %v721_v21, %v673_v7  ;;  %v7519_v17 = vld [vmem:[#allocation35_spill] sm:$0xff] }
 0x189   : > { %v4989_v41 = vpop.permute.xlu1 %1058  ;;  %v980_v37 = vadd.f32 %v964_v35, %v901_v22  ;;  %v1039_v62 = vmul.f32 %v7488_v26, %v4926_v53  ;;  %v971_v54 = vadd.f32 %v955_v59, %v892_v28  ;;  %v715_v36 = vmul.f32 %v7518_v55, %v7477_v11  ;;  %v7520_v49 = vld [vmem:[#allocation67_spill] sm:$0xff]  ;;  %v7522_v35 = vld [vmem:[#allocation36_spill] sm:$0xff] }
 0x18a   : > { %v1096_v9 = vadd.f32 %v4989_v41, %v1040_v46  ;;  %v1108_v30 = vadd.f32 %v5004_v43, %v1052_v58  ;;  %v738_v46 = vadd.f32 %v722_v19, %v674_v50  ;;  %v667_v56 = vadd.f32 %v651_v42, %v588_v18 }
 0x18b   : > { %v800_v57 = vmul.f32 %v7519_v17, %v4871_v5  ;;  %v497_v60 = vmul.f32 %v7521_v15, %v7520_v49  ;;  %v713_v26 = vmul.f32 %v7495_v61, %v7477_v11  ;;  %v1046_v7 = vadd.f32 %v1030_v52, %v971_v54  ;;  %v7524_v61 = vld [vmem:[#allocation56_spill] sm:$0xff] }
 0x18c   : > { %v5008_v1 = vmax.f32 %v1096_v9, 0.0  ;;  %1148 = vrot.lane.b32.xlu2 %v4993_v39, %s4172_s23  ;;  %v880_v20 = vmul.f32 %v7522_v35, %v4665_v40  ;;  %v665_v59 = vadd.f32 %v649_v6, %v4916_v48  ;;  %v7523_v9 = vld [vmem:[#allocation32_spill] sm:$0xff]  ;;  %v817_v19 = vadd.f32 %v801_v12, %v738_v46  ;;  %v7525_v48 = vld [vmem:[#allocation50_spill] sm:$0xff] }
 0x18d   : > { %v794_v21 = vmul.f32 %v7523_v9, %v4871_v5  ;;  %v816_v18 = vadd.f32 %v800_v57, %v737_v8  ;;  %v1055_v22 = vadd.f32 %v1039_v62, %v980_v37  ;;  %v5036_v28 = vmax.f32 %v1108_v30, 0.0  ;;  %v7526_v12 = vld [vmem:[#allocation44_spill] sm:$0xff]  ;;  %v7528_v46 = vld [vmem:[#allocation34_spill] sm:$0xff] }
 0x18e   : > { %1128 = vrot.lane.b32.xlu1 %v5008_v1, %s4172_s23  ;;  %v959_v52 = vmul.f32 %v7524_v61, %v4684_v4  ;;  %v731_v50 = vadd.f32 %v715_v36, %v667_v56  ;;  %v792_v40 = vmul.f32 %v7502_v24, %v4871_v5  ;;  %v873_v6 = vmul.f32 %v7525_v48, %v4873_v32  ;;  %v7527_v54 = vld [vmem:[#allocation68_spill] sm:$0xff]  ;;  %v7529_v57 = vld [vmem:[#allocation10_spill] sm:$0xff] }
 0x18f   : > { %v879_v8 = vmul.f32 %v7526_v12, %v4873_v32  ;;  %v958_v37 = vmul.f32 %v7527_v54, %v4901_v10  ;;  %v1034_v62 = vmul.f32 %v4950_v3, %v4682_v16  ;;  %v896_v4 = vadd.f32 %v880_v20, %v817_v19  ;;  %v7532_v19 = vld [vmem:[#allocation18_spill] sm:$0xff] }
 0x190   : > { %v576_v24 = vmul.f32 %v7500_v51, %v4807_v14  ;;  %v729_v55 = vadd.f32 %v713_v26, %v665_v59  ;;  %v810_v36 = vadd.f32 %v794_v21, %v731_v50  ;;  %v871_v56 = vmul.f32 %v7528_v46, %v4873_v32  ;;  %v7533_v21 = vld [vmem:[#allocation66_spill] sm:$0xff] }
 0x191   : > { %v5034_v42 = vpop.permute.xlu1 %1073  ;;  %v895_v17 = vadd.f32 %v879_v8, %v816_v18  ;;  %v1111_v15 = vadd.f32 %v7529_v57, %v1055_v22  ;;  %v975_v9 = vadd.f32 %v959_v52, %v896_v4  ;;  %v655_v51 = vmul.f32 %v7532_v19, %v4831_v23  ;;  %v7534_v52 = vld [vmem:[#allocation63_spill] sm:$0xff] }
 0x192   : > { %v1102_v58 = vadd.f32 %v5034_v42, %v1046_v7  ;;  %v7530_v7 = vld [vmem:[#allocation43_spill] sm:$0xff]  ;;  %v808_v26 = vadd.f32 %v792_v40, %v729_v55  ;;  %v889_v59 = vadd.f32 %v873_v6, %v810_v36  ;;  %v1033_v50 = vmul.f32 %v7533_v21, %v4926_v53  ;;  %v7537_v36 = vld [vmem:[#allocation20_spill] sm:$0xff] }
 0x193   : > { %v952_v16 = vmul.f32 %v7530_v7, %v4901_v10  ;;  %v974_v18 = vadd.f32 %v958_v37, %v895_v17  ;;  %v950_v22 = vmul.f32 %v7508_v0, %v4901_v10  ;;  %v1050_v48 = vadd.f32 %v1034_v62, %v975_v9  ;;  %v7535_v0 = vld [vmem:[#allocation65_spill] sm:$0xff]  ;;  %v7536_v62 = vld [vmem:[#allocation7_spill] sm:$0xff] }
 0x194   : > { %v5051_v30 = vmax.f32 %v1102_v58, 0.0  ;;  %1222 = vrot.lane.b32.xlu2 %v5036_v28, %s4173_s7  ;;  %v7531_v58 = vld [vmem:[#allocation70_spill] sm:$0xff]  ;;  %v719_v8 = vmul.f32 %v7509_v45, %v7477_v11  ;;  %v887_v54 = vadd.f32 %v871_v56, %v808_v26  ;;  %v5077_v40 = vmax.f32 %v1111_v15, 0.0 }
 0x195   : > { %v513_v20 = vadd.f32 %v497_v60, %v7531_v58  ;;  %v1027_v60 = vmul.f32 %v7534_v52, %v4926_v53  ;;  %v968_v6 = vadd.f32 %v952_v16, %v889_v59  ;;  %v1025_v37 = vmul.f32 %v4853_v27, %v4926_v53  ;;  %v7538_v27 = vld [vmem:[#allocation71_spill] sm:$0xff] }
 0x196   : > { %1134 = vrot.lane.b32.xlu1 %v5051_v30, %s4172_s23  ;;  %v582_v45 = vmul.f32 %v7537_v36, %v4807_v14  ;;  %v798_v56 = vmul.f32 %v7511_v31, %v4871_v5  ;;  %v1049_v17 = vadd.f32 %v1033_v50, %v974_v18  ;;  %v966_v57 = vadd.f32 %v950_v22, %v887_v54  ;;  %v7539_v16 = vld [vmem:[#allocation19_spill] sm:$0xff]  ;;  %v7541_v50 = vld [vmem:[#allocation9_spill] sm:$0xff] }
 0x197   : > { %v592_v12 = vadd.f32 %v576_v24, %v513_v20  ;;  %v422_v24 = vmul.f32 %v7536_v62, %v7535_v0  ;;  %v661_v9 = vmul.f32 %v7539_v16, %v4831_v23  ;;  %v877_v20 = vmul.f32 %v7514_v47, %v4873_v32  ;;  %v7542_v47 = vld [vmem:[#allocation24_spill] sm:$0xff] }
 0x198   : > { %v1043_v19 = vadd.f32 %v1027_v60, %v968_v6  ;;  %v1041_v31 = vadd.f32 %v1025_v37, %v966_v57  ;;  %v1031_v54 = vmul.f32 %v4906_v34, %v4926_v53  ;;  %v7543_v6 = vld [vmem:[#allocation37_spill] sm:$0xff]  ;;  %v7545_v16 = vld [vmem:[#allocation8_spill] sm:$0xff] }
 0x199   : > { %v5075_v4 = vpop.permute.xlu1 %1083  ;;  %v671_v46 = vadd.f32 %v655_v51, %v592_v12  ;;  %v519_v7 = vadd.f32 %v7538_v27, %v422_v24  ;;  %v7540_v51 = vld [vmem:[#allocation27_spill] sm:$0xff]  ;;  %v725_v12 = vmul.f32 %v7542_v47, %v7477_v11  ;;  %v804_v37 = vmul.f32 %v7543_v6, %v4871_v5  ;;  %v7544_v57 = vld [vmem:[#allocation13_spill] sm:$0xff] }
 0x19a   : > { %v1106_v55 = vadd.f32 %v5075_v4, %v1050_v48  ;;  %v1105_v26 = vadd.f32 %v7540_v51, %v1049_v17  ;;  %v1099_v18 = vadd.f32 %v7541_v50, %v1043_v19  ;;  %v1097_v22 = vadd.f32 %v4989_v41, %v1041_v31 }
 0x19b   : > { %v735_v58 = vadd.f32 %v719_v8, %v671_v46  ;;  %v598_v59 = vadd.f32 %v582_v45, %v519_v7  ;;  %v956_v48 = vmul.f32 %v7515_v2, %v4901_v10  ;;  %v883_v24 = vmul.f32 %v7510_v63, %v4873_v32 }
 0x19c   : > { %v5088_v15 = vmax.f32 %v1106_v55, 0.0  ;;  %1240 = vrot.lane.b32.xlu2 %v5077_v40, %s4173_s7  ;;  %v5108_v60 = vmax.f32 %v1105_v26, 0.0  ;;  %v5114_v55 = vmax.f32 %v1099_v18, 0.0  ;;  %v5116_v62 = vmax.f32 %v1097_v22, 0.0 }
 0x19d   : > { %v814_v21 = vadd.f32 %v798_v56, %v735_v58  ;;  %v677_v8 = vadd.f32 %v661_v9, %v598_v59  ;;  %v962_v45 = vmul.f32 %v7512_v33, %v4901_v10  ;;  %v1037_v17 = vmul.f32 %v4789_v13, %v4926_v53  ;;  %v7546_v33 = vld [vmem:[#allocation14_spill] sm:$0xff] }
 0x19e   : > { %1138 = vrot.lane.b32.xlu0 %v5088_v15, %s4172_s23  ;;  %1140 = vrot.lane.b32.xlu1 %v5036_v28, %s4172_s23  ;;  %v501_v63 = vmul.f32 %v7544_v57, %v7520_v49  ;;  %v420_v9 = vmul.f32 %v7545_v16, %v7535_v0  ;;  %v580_v58 = vmul.f32 %v7546_v33, %v4807_v14 }
 0x19f   : > { %v893_v52 = vadd.f32 %v877_v20, %v814_v21  ;;  %v741_v2 = vadd.f32 %v725_v12, %v677_v8  ;;  %v659_v49 = vmul.f32 %v7513_v29, %v4831_v23  ;;  %v723_v0 = vmul.f32 %v7516_v44, %v7477_v11 }
 0x1a0   : > { %v517_v13 = vadd.f32 %v501_v63, %v420_v9  ;;  %v802_v14 = vmul.f32 %v7517_v25, %v4871_v5  ;;  %v881_v59 = vmul.f32 %v7522_v35, %v4873_v32  ;;  %v960_v11 = vmul.f32 %v7524_v61, %v4901_v10  ;;  %v7547_v32 = vld [vmem:[#allocation38_spill] sm:$0xff]  ;;  %v7548_v10 = vld [vmem:[#allocation69_spill] sm:$0xff] }
 0x1a1   : > { %v972_v41 = vadd.f32 %v956_v48, %v893_v52  ;;  %v820_v34 = vadd.f32 %v804_v37, %v741_v2  ;;  %v1035_v5 = vmul.f32 %v4950_v3, %v4926_v53  ;;  %v7549_v3 = vld [vmem:[#allocation30_spill] sm:$0xff] }
 0x1a2   : > { %v596_v19 = vadd.f32 %v580_v58, %v517_v13 }
 0x1a3   : > { %v1047_v36 = vadd.f32 %v1031_v54, %v972_v41  ;;  %v899_v56 = vadd.f32 %v883_v24, %v820_v34 }
 0x1a4   : > { %1234 = vrot.lane.b32.xlu2 %v5108_v60, %s4173_s7  ;;  %v675_v51 = vadd.f32 %v659_v49, %v596_v19 }
 0x1a5   : > { %v1103_v46 = vadd.f32 %v5034_v42, %v1047_v36  ;;  %v978_v27 = vadd.f32 %v962_v45, %v899_v56 }
 0x1a6   : > { %1144 = vrot.lane.b32.xlu0 %v5116_v62, %s4172_s23  ;;  %1146 = vrot.lane.b32.xlu1 %v5114_v55, %s4172_s23  ;;  %v739_v31 = vadd.f32 %v723_v0, %v675_v51 }
 0x1a7   : > { %v5133_v7 = vmax.f32 %v1103_v46, 0.0  ;;  %v1053_v42 = vadd.f32 %v1037_v17, %v978_v27  ;;  %v7550_v46 = vld [vmem:[#allocation52_spill] sm:$0xff]  ;;  %v7552_v17 = vld [vmem:[#allocation62_spill] sm:$0xff] }
 0x1a8   : > { %v818_v23 = vadd.f32 %v802_v14, %v739_v31  ;;  %v5290_v56 = vperm.slane %v7550_v46, 1  ;;  %v5293_v57 = vperm.slane %v7552_v17, 1 }
 0x1a9   : > { %v1109_v20 = vadd.f32 %v5004_v43, %v1053_v42 }
 0x1aa   : > { %v897_v29 = vadd.f32 %v881_v59, %v818_v23  ;;  %7551 = vst [vmem:[#allocation31_spill] sm:$0xff] %v5290_v56 }
 0x1ab   : > { %v5152_v26 = vmax.f32 %v1109_v20, 0.0  ;;  %7553 = vst [vmem:[#allocation25_spill] sm:$0xff] %v5293_v57 }
 0x1ac   : > { %1216 = vrot.lane.b32.xlu2 %v5051_v30, %s4173_s7  ;;  %v976_v44 = vadd.f32 %v960_v11, %v897_v29 }
 0x1ae   : > { %1150 = vrot.lane.b32.xlu0 %v5133_v7, %s4172_s23  ;;  %1152 = vrot.lane.b32.xlu1 %v5108_v60, %s4172_s23  ;;  %v1051_v43 = vadd.f32 %v1035_v5, %v976_v44 }
 0x1b0   : > { %v1107_v25 = vadd.f32 %v5075_v4, %v1051_v43 }
 0x1b2   : > { %v5173_v35 = vmax.f32 %v1107_v25, 0.0 }
 0x1b4   : > { %1210 = vrot.lane.b32.xlu2 %v5008_v1, %s4173_s7 }
 0x1b6   : > { %1224 = vrot.lane.b32.xlu0 %v4959_v38, %s4173_s7  ;;  %1238 = vrot.lane.b32.xlu1 %v5152_v26, %s4173_s7 }
 0x1bc   : > { %1228 = vrot.lane.b32.xlu2 %v5114_v55, %s4173_s7 }
 0x1be   : > { %1218 = vrot.lane.b32.xlu0 %v7547_v32, %s4173_s7  ;;  %1220 = vrot.lane.b32.xlu1 %v5088_v15, %s4173_s7 }
 0x1c4   : > { %1158 = vrot.lane.b32.xlu2 %v5077_v40, %s4172_s23 }
 0x1c6   : > { %1236 = vrot.lane.b32.xlu0 %v5173_v35, %s4173_s7  ;;  %1214 = vrot.lane.b32.xlu1 %v7548_v10, %s4173_s7 }
 0x1cc   : > { %1478 = vrot.lane.b32.xlu2 %v7548_v10, %s4175_s17 }
 0x1ce   : > { %1230 = vrot.lane.b32.xlu0 %v4993_v39, %s4173_s7  ;;  %1232 = vrot.lane.b32.xlu1 %v5133_v7, %s4173_s7  ;;  %v5187_v53 = vpop.permute.xlu2 %1130 }
 0x1d4   : > { %1502 = vrot.lane.b32.xlu2 %v5152_v26, %s4175_s17  ;;  %v5241_v12 = vpop.permute.xlu0 %1132 }
 0x1d6   : > { %1212 = vrot.lane.b32.xlu0 %v7549_v3, %s4173_s7  ;;  %1226 = vrot.lane.b32.xlu1 %v5116_v62, %s4173_s7  ;;  %v5195_v61 = vpop.permute.xlu2 %1136 }
 0x1dc   : > { %1484 = vrot.lane.b32.xlu2 %v5088_v15, %s4175_s17 }
 0x1de   : > { %1154 = vrot.lane.b32.xlu0 %v5173_v35, %s4172_s23  ;;  %1156 = vrot.lane.b32.xlu1 %v5152_v26, %s4172_s23  ;;  %v5203_v4 = vpop.permute.xlu2 %1142 }
 0x1e4   : > { %1480 = vrot.lane.b32.xlu2 %v5051_v30, %s4175_s17 }
 0x1e6   : > { %1474 = vrot.lane.b32.xlu0 %v5008_v1, %s4175_s17  ;;  %1476 = vrot.lane.b32.xlu1 %v7549_v3, %s4175_s17  ;;  %v5211_v21 = vpop.permute.xlu2 %1148 }
 0x1ec   : > { %1490 = vrot.lane.b32.xlu2 %v5116_v62, %s4175_s17 }
 0x1ee   : > { %1486 = vrot.lane.b32.xlu0 %v5036_v28, %s4175_s17  ;;  %1488 = vrot.lane.b32.xlu1 %v4959_v38, %s4175_s17  ;;  %v1223_v50 = vpop.permute.xlu2 %1222 }
 0x1f4   : > { %1665 = vrot.lane.b32.xlu2 %v7549_v3, %s4176_s18 }
 0x1f6   : > { %1504 = vrot.lane.b32.xlu0 %v5077_v40, %s4175_s17  ;;  %1482 = vrot.lane.b32.xlu1 %v7547_v32, %s4175_s17  ;;  %v1241_v18 = vpop.permute.xlu2 %1240 }
 0x1fc   : > { %1671 = vrot.lane.b32.xlu2 %v7547_v32, %s4176_s18 }
 0x1fe   : > { %1498 = vrot.lane.b32.xlu0 %v5108_v60, %s4175_s17  ;;  %1500 = vrot.lane.b32.xlu1 %v5173_v35, %s4175_s17  ;;  %v1235_v22 = vpop.permute.xlu2 %1234 }
 0x200   : > { %v5231_v48 = vpop.permute.xlu1 %1128 }
 0x204   : > { %1691 = vrot.lane.b32.xlu2 %v5152_v26, %s4176_s18 }
 0x206   : > { %1494 = vrot.lane.b32.xlu0 %v4993_v39, %s4175_s17  ;;  %1496 = vrot.lane.b32.xlu1 %v5133_v7, %s4175_s17  ;;  %v5239_v47 = vpop.permute.xlu2 %1216 }
 0x208   : > { %v5243_v8 = vpop.permute.xlu1 %1134 }
 0x20c   : > { %1687 = vrot.lane.b32.xlu2 %v5108_v60, %s4176_s18 }
 0x20e   : > { %1492 = vrot.lane.b32.xlu0 %v5114_v55, %s4175_s17  ;;  %1663 = vrot.lane.b32.xlu1 %v5008_v1, %s4176_s18  ;;  %v5251_v52 = vpop.permute.xlu2 %1210 }
 0x210   : > { %v5253_v54 = vpop.permute.xlu0 %1138  ;;  %v5255_v6 = vpop.permute.xlu1 %1140 }
 0x214   : > { %1685 = vrot.lane.b32.xlu2 %v5133_v7, %s4176_s18 }
 0x216   : > { %1667 = vrot.lane.b32.xlu0 %v7548_v10, %s4176_s18  ;;  %1669 = vrot.lane.b32.xlu1 %v5051_v30, %s4176_s18  ;;  %v5263_v37 = vpop.permute.xlu2 %1228 }
 0x218   : > { %v5265_v41 = vpop.permute.xlu0 %1144  ;;  %v5267_v2 = vpop.permute.xlu1 %1146 }
 0x21c   : > { %1975 = vrot.lane.b32.xlu2 %v5008_v1, %s4179_s19 }
 0x21e   : > { %1675 = vrot.lane.b32.xlu0 %v5036_v28, %s4176_s18  ;;  %1677 = vrot.lane.b32.xlu1 %v4959_v38, %s4176_s18  ;;  %v5275_v24 = vpop.permute.xlu2 %1158 }
 0x220   : > { %v5277_v36 = vpop.permute.xlu0 %1150  ;;  %v5279_v34 = vpop.permute.xlu1 %1152 }
 0x224   : > { %1981 = vrot.lane.b32.xlu2 %v5051_v30, %s4179_s19 }
 0x226   : > { %1693 = vrot.lane.b32.xlu0 %v5077_v40, %s4176_s18  ;;  %1673 = vrot.lane.b32.xlu1 %v5088_v15, %s4176_s18  ;;  %v5287_v45 = vpop.permute.xlu2 %1478 }
 0x228   : > { %v1225_v63 = vpop.permute.xlu0 %1224  ;;  %v1239_v27 = vpop.permute.xlu1 %1238 }
 0x229   : > { %v1256_v9 = vsel %vm445_vm1, %v1239_v27, %v1223_v50  ;;  %v1257_v33 = vsel %vm445_vm1, %v1241_v18, %v1225_v63  ;;  %v1248_v58 = vsel %vm445_vm1, %v1223_v50, %v1239_v27  ;;  %v1249_v42 = vsel %vm445_vm1, %v1225_v63, %v1241_v18 }
 0x22a   : > { %v1272_v13 = vmul.f32 %v5290_v56, %v1256_v9  ;;  %v1274_v49 = vmul.f32 %v5290_v56, %v1257_v33  ;;  %v1273_v20 = vmul.f32 %v5293_v57, %v1248_v58  ;;  %v1275_v19 = vmul.f32 %v5293_v57, %v1249_v42 }
 0x22c   : > { %1987 = vrot.lane.b32.xlu2 %v5036_v28, %s4179_s19  ;;  %v1282_v0 = vpack.c.bf16 %v1274_v49, %v1272_v13  ;;  %v1283_v51 = vpack.c.bf16 %v1275_v19, %v1273_v20 }
 0x22e   : > { %1689 = vrot.lane.b32.xlu0 %v5173_v35, %s4176_s18  ;;  %1683 = vrot.lane.b32.xlu1 %v4993_v39, %s4176_s18  ;;  %v5313_v14 = vpop.permute.xlu2 %1502 }
 0x22f   : > { %1330 = vmatpush.bf16.msra.mxu0 %v1282_v0  ;;  %1359 = vmatpush.bf16.msra.mxu1 %v1283_v51 }
 0x230   : > { %v1219_v31 = vpop.permute.xlu0 %1218  ;;  %v1221_v59 = vpop.permute.xlu1 %1220 }
 0x231   : > { %v1246_v11 = vsel %vm445_vm1, %v1219_v31, %v1235_v22  ;;  %v1254_v5 = vsel %vm445_vm1, %v1235_v22, %v1219_v31 }
 0x232   : > { %v1268_v50 = vmul.f32 %v5290_v56, %v1254_v5  ;;  %v1269_v46 = vmul.f32 %v5293_v57, %v1246_v11 }
 0x234   : > { %1993 = vrot.lane.b32.xlu2 %v5114_v55, %s4179_s19 }
 0x236   : > { %1679 = vrot.lane.b32.xlu0 %v5116_v62, %s4176_s18  ;;  %1681 = vrot.lane.b32.xlu1 %v5114_v55, %s4176_s18  ;;  %v5321_v23 = vpop.permute.xlu2 %1484 }
 0x238   : > { %v1237_v29 = vpop.permute.xlu0 %1236  ;;  %v1215_v44 = vpop.permute.xlu1 %1214 }
 0x239   : > { %v1247_v43 = vsel %vm445_vm1, %v1221_v59, %v1237_v29  ;;  %v1255_v25 = vsel %vm445_vm1, %v1237_v29, %v1221_v59 }
 0x23a   : > { %v1270_v18 = vmul.f32 %v5290_v56, %v1255_v25  ;;  %v1271_v17 = vmul.f32 %v5293_v57, %v1247_v43 }
 0x23c   : > { %2005 = vrot.lane.b32.xlu2 %v5077_v40, %s4179_s19  ;;  %v1280_v22 = vpack.c.bf16 %v1270_v18, %v1268_v50  ;;  %v1281_v63 = vpack.c.bf16 %v1271_v17, %v1269_v46 }
 0x23e   : > { %1977 = vrot.lane.b32.xlu0 %v7549_v3, %s4179_s19  ;;  %1979 = vrot.lane.b32.xlu1 %v7548_v10, %s4179_s19  ;;  %v5341_v27 = vpop.permute.xlu2 %1480 }
 0x23f   : > { %1331 = vmatpush.bf16.msra.mxu0 %v1280_v22  ;;  %1360 = vmatpush.bf16.msra.mxu1 %v1281_v63  ;;  %v1175_v63 = vsel %vm362_vm0, %v5275_v24, %v5203_v4 }
 0x240   : > { %v1231_v9 = vpop.permute.xlu0 %1230  ;;  %v1233_v33 = vpop.permute.xlu1 %1232 }
 0x241   : > { %v1244_v58 = vsel %vm445_vm1, %v1215_v44, %v1231_v9  ;;  %v1252_v42 = vsel %vm445_vm1, %v1231_v9, %v1215_v44  ;;  %v1245_v13 = vsel %vm445_vm1, %v5239_v47, %v1233_v33  ;;  %v1253_v49 = vsel %vm445_vm1, %v1233_v33, %v5239_v47  ;;  %v4020_v9 = vld [vmem:[#allocation3 + $0x20] sm:$0xff] }
 0x242   : > { %v1264_v20 = vmul.f32 %v5290_v56, %v1252_v42  ;;  %v1266_v19 = vmul.f32 %v5290_v56, %v1253_v49  ;;  %v1265_v0 = vmul.f32 %v5293_v57, %v1244_v58  ;;  %v1267_v51 = vmul.f32 %v5293_v57, %v1245_v13  ;;  %v5396_v33 = vld [vmem:[%s7281_s1] sm:$0xff]  ;;  %v5408_v13 = vld [vmem:[%s7281_s1 + $0x8] sm:$0xff] }
 0x243   : > { %v5399_v58 = vperm.slane %v5396_v33, 0  ;;  %v1167_v42 = vsel %vm362_vm0, %v5203_v4, %v5275_v24  ;;  %v5411_v49 = vperm.slane %v5408_v13, 0 }
 0x244   : > { %1997 = vrot.lane.b32.xlu2 %v5133_v7, %s4179_s19  ;;  %v1278_v31 = vpack.c.bf16 %v1266_v19, %v1264_v20  ;;  %v1279_v59 = vpack.c.bf16 %v1267_v51, %v1265_v0 }
 0x245   : > { %7555 = vst [vmem:[#allocation47_spill] sm:$0xff] %v5399_v58  ;;  %v1192_v0 = vmul.f32 %v5399_v58, %v1175_v63 }
 0x246   : > { %1983 = vrot.lane.b32.xlu0 %v7547_v32, %s4179_s19  ;;  %1985 = vrot.lane.b32.xlu1 %v5088_v15, %s4179_s19  ;;  %v5363_v47 = vpop.permute.xlu2 %1490  ;;  %7556 = vst [vmem:[#allocation6_spill] sm:$0xff] %v5411_v49 }
 0x247   : > { %1332 = vmatpush.bf16.msra.mxu0 %v1278_v31  ;;  %1361 = vmatpush.bf16.msra.mxu1 %v1279_v59  ;;  %v1193_v31 = vmul.f32 %v5411_v49, %v1167_v42 }
 0x248   : > { %v1213_v11 = vpop.permute.xlu0 %1212  ;;  %v1227_v5 = vpop.permute.xlu1 %1226 }
 0x249   : > { %v1243_v29 = vsel %vm445_vm1, %v1213_v11, %v5263_v37  ;;  %v1251_v44 = vsel %vm445_vm1, %v5263_v37, %v1213_v11  ;;  %v1242_v43 = vsel %vm445_vm1, %v5251_v52, %v1227_v5  ;;  %v1250_v25 = vsel %vm445_vm1, %v1227_v5, %v5251_v52 }
 0x24a   : > { %v1260_v50 = vmul.f32 %v5290_v56, %v1250_v25  ;;  %v1262_v18 = vmul.f32 %v5290_v56, %v1251_v44  ;;  %v1261_v46 = vmul.f32 %v5293_v57, %v1242_v43  ;;  %v1263_v17 = vmul.f32 %v5293_v57, %v1243_v29  ;;  %v4051_v56 = vld [vmem:[#allocation3 + $0x118] sm:$0xff] }
 0x24b   : > { %v1164_v29 = vsel %vm362_vm0, %v5195_v61, %v5279_v34 }
 0x24c   : > { %2192 = vrot.lane.b32.xlu2 %v5152_v26, %s4186_s22  ;;  %v1276_v37 = vpack.c.bf16 %v1262_v18, %v1260_v50  ;;  %v1277_v22 = vpack.c.bf16 %v1263_v17, %v1261_v46  ;;  %v1163_v50 = vsel %vm362_vm0, %v5243_v8, %v5277_v36  ;;  %v1171_v18 = vsel %vm362_vm0, %v5277_v36, %v5243_v8 }
 0x24d   : > { %v1187_v46 = vmul.f32 %v5411_v49, %v1164_v29  ;;  %v1162_v17 = vsel %vm362_vm0, %v5241_v12, %v5211_v21  ;;  %v1170_v8 = vsel %vm362_vm0, %v5211_v21, %v5241_v12  ;;  %v1168_v36 = vsel %vm362_vm0, %v5265_v41, %v5231_v48 }
 0x24e   : > { %1989 = vrot.lane.b32.xlu0 %v4959_v38, %s4179_s19  ;;  %1991 = vrot.lane.b32.xlu1 %v5116_v62, %s4179_s19  ;;  %v5391_v52 = vpop.permute.xlu2 %1665  ;;  %v1185_v21 = vmul.f32 %v5411_v49, %v1163_v50  ;;  %v1160_v12 = vsel %vm362_vm0, %v5231_v48, %v5265_v41 }
 0x24f   : > { %1333 = vmatpush.bf16.msra.mxu0 %v1276_v37  ;;  %1362 = vmatpush.bf16.msra.mxu1 %v1277_v22  ;;  %v1169_v37 = vsel %vm362_vm0, %v5267_v2, %v5187_v53  ;;  %v1179_v41 = vmul.f32 %v5411_v49, %v1160_v12  ;;  %v4022_v12 = vld [vmem:[#allocation3 + $0x30] sm:$0xff] }
 0x250   : > { %v1155_v20 = vpop.permute.xlu0 %1154  ;;  %v1157_v19 = vpop.permute.xlu1 %1156 }
 0x251   : > { %v1165_v51 = vsel %vm362_vm0, %v5253_v54, %v1155_v20  ;;  %v1174_v4 = vsel %vm362_vm0, %v1157_v19, %v5255_v6  ;;  %v1166_v24 = vsel %vm362_vm0, %v5255_v6, %v1157_v19  ;;  %v1173_v59 = vsel %vm362_vm0, %v1155_v20, %v5253_v54 }
 0x252   : > { %3788 = vmatmul.msk.bf16.vlgmr.msra.gmra.mxu0 %vm1313_vm8, %v4020_v9  ;;  %3792 = vmatmul.msk.bf16.vlgmr.msra.gmra.mxu1 %vm1313_vm8, %v4020_v9  ;;  %v1190_v11 = vmul.f32 %v5399_v58, %v1174_v4  ;;  %v1191_v5 = vmul.f32 %v5411_v49, %v1166_v24  ;;  %v1172_v6 = vsel %vm362_vm0, %v5279_v34, %v5195_v61 }
 0x253   : > { %v1188_v43 = vmul.f32 %v5399_v58, %v1173_v59  ;;  %v1189_v25 = vmul.f32 %v5411_v49, %v1165_v51  ;;  %v1186_v34 = vmul.f32 %v5399_v58, %v1172_v6  ;;  %v1184_v20 = vmul.f32 %v5399_v58, %v1171_v18 }
 0x254   : > { %2174 = vrot.lane.b32.xlu2 %v5088_v15, %s4186_s22  ;;  %v1200_v54 = vpack.c.bf16 %v1192_v0, %v1190_v11  ;;  %v1201_v44 = vpack.c.bf16 %v1193_v31, %v1191_v5  ;;  %v1161_v19 = vsel %vm362_vm0, %v5187_v53, %v5267_v2  ;;  %v1182_v0 = vmul.f32 %v5399_v58, %v1170_v8  ;;  %v4021_v2 = vld [vmem:[#allocation3 + $0x28] sm:$0xff] }
 0x255   : > { %v1198_v9 = vpack.c.bf16 %v1188_v43, %v1186_v34  ;;  %v1199_v42 = vpack.c.bf16 %v1189_v25, %v1187_v46  ;;  %v1183_v51 = vmul.f32 %v5411_v49, %v1162_v17  ;;  %v1178_v4 = vmul.f32 %v5399_v58, %v1168_v36 }
 0x256   : > { %1995 = vrot.lane.b32.xlu0 %v4993_v39, %s4179_s19  ;;  %2003 = vrot.lane.b32.xlu1 %v5152_v26, %s4179_s19  ;;  %v5455_v61 = vpop.permute.xlu2 %1671  ;;  %v1180_v24 = vmul.f32 %v5399_v58, %v1169_v37  ;;  %v1196_v31 = vpack.c.bf16 %v1184_v20, %v1182_v0  ;;  %v1181_v59 = vmul.f32 %v5411_v49, %v1161_v19  ;;  %v5522_v34 = vperm.slane %v5396_v33, 2 }
 0x257   : > { %1420 = vmatpush.bf16.msra.mxu2 %v1200_v54  ;;  %1449 = vmatpush.bf16.msra.mxu3 %v1201_v44  ;;  %v1197_v48 = vpack.c.bf16 %v1185_v21, %v1183_v51  ;;  %v4016_v54 = vld [vmem:[#allocation3] sm:$0xff]  ;;  %v5525_v46 = vperm.slane %v5408_v13, 2 }
 0x258   : > { %v5475_v22 = vpop.permute.xlu0 %1474  ;;  %v5477_v63 = vpop.permute.xlu1 %1476  ;;  %v1194_v29 = vpack.c.bf16 %v1180_v24, %v1178_v4  ;;  %v1195_v6 = vpack.c.bf16 %v1181_v59, %v1179_v41  ;;  %7557 = vst [vmem:[#allocation33_spill] sm:$0xff] %v5522_v34 }
 0x259   : > { %7558 = vst [vmem:[#allocation40_spill] sm:$0xff] %v5525_v46 }
 0x25b   : > { %1421 = vmatpush.bf16.msra.mxu2 %v1198_v9  ;;  %1450 = vmatpush.bf16.msra.mxu3 %v1199_v42 }
 0x25c   : > { %2168 = vrot.lane.b32.xlu2 %v7548_v10, %s4186_s22 }
 0x25e   : > { %1999 = vrot.lane.b32.xlu0 %v5108_v60, %s4179_s19  ;;  %2001 = vrot.lane.b32.xlu1 %v5173_v35, %s4179_s19  ;;  %v5501_v53 = vpop.permute.xlu2 %1691 }
 0x25f   : > { %1422 = vmatpush.bf16.msra.mxu2 %v1196_v31  ;;  %1451 = vmatpush.bf16.msra.mxu3 %v1197_v48 }
 0x260   : > { %v1487_v11 = vpop.permute.xlu0 %1486  ;;  %v1489_v5 = vpop.permute.xlu1 %1488 }
 0x261   : > { %v1512_v43 = vsel %vm526_vm2, %v1487_v11, %v5313_v14  ;;  %v1520_v25 = vsel %vm526_vm2, %v5313_v14, %v1487_v11 }
 0x262   : > { %3789 = vmatmul.msk.bf16.gmra.mxu0 %vm1313_vm8, %v4021_v2  ;;  %3793 = vmatmul.msk.bf16.gmra.mxu1 %vm1313_vm8, %v4021_v2  ;;  %v1536_v14 = vmul.f32 %v5522_v34, %v1520_v25  ;;  %v1537_v37 = vmul.f32 %v5525_v46, %v1512_v43 }
 0x263   : > { %1423 = vmatpush.bf16.msra.mxu2 %v1194_v29  ;;  %1452 = vmatpush.bf16.msra.mxu3 %v1195_v6 }
 0x264   : > { %2186 = vrot.lane.b32.xlu2 %v5133_v7, %s4186_s22 }
 0x266   : > { %2176 = vrot.lane.b32.xlu0 %v5036_v28, %s4186_s22  ;;  %2178 = vrot.lane.b32.xlu1 %v4959_v38, %s4186_s22  ;;  %v5511_v44 = vpop.permute.xlu2 %1687 }
 0x267   : > { %3812 = vmatmul.msk.bf16.vlgmr.msra.gmra.mxu2 %vm1313_vm8, %v4016_v54  ;;  %3816 = vmatmul.msk.bf16.vlgmr.msra.gmra.mxu3 %vm1313_vm8, %v4016_v54 }
 0x268   : > { %v1505_v50 = vpop.permute.xlu0 %1504  ;;  %v1483_v18 = vpop.permute.xlu1 %1482 }
 0x269   : > { %v1513_v17 = vsel %vm526_vm2, %v1489_v5, %v1505_v50  ;;  %v1521_v8 = vsel %vm526_vm2, %v1505_v50, %v1489_v5  ;;  %v4017_v5 = vld [vmem:[#allocation3 + $0x8] sm:$0xff] }
 0x26a   : > { %v1538_v36 = vmul.f32 %v5522_v34, %v1521_v8  ;;  %v1539_v9 = vmul.f32 %v5525_v46, %v1513_v17 }
 0x26c   : > { %2180 = vrot.lane.b32.xlu2 %v5116_v62, %s4186_s22  ;;  %v1546_v42 = vpack.c.bf16 %v1538_v36, %v1536_v14  ;;  %v1547_v20 = vpack.c.bf16 %v1539_v9, %v1537_v37  ;;  %v1514_v9 = vsel %vm526_vm2, %v5363_v47, %v5475_v22 }
 0x26e   : > { %2194 = vrot.lane.b32.xlu0 %v5077_v40, %s4186_s22  ;;  %2172 = vrot.lane.b32.xlu1 %v7547_v32, %s4186_s22  ;;  %v5541_v21 = vpop.permute.xlu2 %1685 }
 0x26f   : > { %1593 = vmatpush.bf16.msrb.mxu0 %v1546_v42  ;;  %1622 = vmatpush.bf16.msrb.mxu1 %v1547_v20  ;;  %v4023_v42 = vld [vmem:[#allocation3 + $0x38] sm:$0xff]  ;;  %v1506_v20 = vsel %vm526_vm2, %v5475_v22, %v5363_v47 }
 0x270   : > { %v1499_v19 = vpop.permute.xlu0 %1498  ;;  %v1501_v0 = vpop.permute.xlu1 %1500  ;;  %v1525_v22 = vmul.f32 %v5525_v46, %v1506_v20  ;;  %v5670_v20 = vperm.slane %v5408_v13, 3 }
 0x271   : > { %v1510_v51 = vsel %vm526_vm2, %v1483_v18, %v1499_v19  ;;  %v1518_v4 = vsel %vm526_vm2, %v1499_v19, %v1483_v18  ;;  %v1511_v24 = vsel %vm526_vm2, %v5321_v23, %v1501_v0  ;;  %v1519_v31 = vsel %vm526_vm2, %v1501_v0, %v5321_v23 }
 0x272   : > { %3790 = vmatmul.msk.bf16.gmra.mxu0 %vm1313_vm8, %v4022_v12  ;;  %3794 = vmatmul.msk.bf16.gmra.mxu1 %vm1313_vm8, %v4022_v12  ;;  %v1532_v48 = vmul.f32 %v5522_v34, %v1518_v4  ;;  %v1534_v41 = vmul.f32 %v5522_v34, %v1519_v31  ;;  %v1533_v59 = vmul.f32 %v5525_v46, %v1510_v51 }
 0x273   : > { %v1535_v2 = vmul.f32 %v5525_v46, %v1511_v24  ;;  %v1524_v4 = vmul.f32 %v5522_v34, %v1514_v9  ;;  %7560 = vst [vmem:[#allocation12_spill] sm:$0xff] %v5670_v20 }
 0x274   : > { %2367 = vrot.lane.b32.xlu2 %v4959_v38, %s4182_s20  ;;  %v1544_v11 = vpack.c.bf16 %v1534_v41, %v1532_v48  ;;  %v4018_v41 = vld [vmem:[#allocation3 + $0x10] sm:$0xff] }
 0x275   : > { %v1545_v29 = vpack.c.bf16 %v1535_v2, %v1533_v59  ;;  %v1859_v2 = vpack.c.bf16 %v5077_v40, %v5152_v26 }
 0x276   : > { %2188 = vrot.lane.b32.xlu0 %v5108_v60, %s4186_s22  ;;  %2190 = vrot.lane.b32.xlu1 %v5173_v35, %s4186_s22  ;;  %v5565_v23 = vpop.permute.xlu2 %1975 }
 0x277   : > { %1594 = vmatpush.bf16.msrb.mxu0 %v1544_v11  ;;  %1623 = vmatpush.bf16.msrb.mxu1 %v1545_v29  ;;  %v1856_v29 = vpack.c.bf16 %v5088_v15, %v7547_v32 }
 0x278   : > { %3813 = vmatmul.msk.bf16.gmra.mxu2 %vm1313_vm8, %v4017_v5  ;;  %v1495_v6 = vpop.permute.xlu0 %1494  ;;  %v1497_v54 = vpop.permute.xlu1 %1496  ;;  %3817 = vmatmul.msk.bf16.gmra.mxu3 %vm1313_vm8, %v4017_v5 }
 0x279   : > { %v1508_v43 = vsel %vm526_vm2, %v5287_v45, %v1495_v6  ;;  %v1516_v25 = vsel %vm526_vm2, %v1495_v6, %v5287_v45  ;;  %v1509_v50 = vsel %vm526_vm2, %v5341_v27, %v1497_v54  ;;  %v1517_v18 = vsel %vm526_vm2, %v1497_v54, %v5341_v27 }
 0x27a   : > { %v1528_v17 = vmul.f32 %v5522_v34, %v1516_v25  ;;  %v1530_v8 = vmul.f32 %v5522_v34, %v1517_v18  ;;  %v1529_v14 = vmul.f32 %v5525_v46, %v1508_v43  ;;  %v1531_v36 = vmul.f32 %v5525_v46, %v1509_v50  ;;  %v4024_v43 = vld [vmem:[#allocation3 + $0x40] sm:$0xff] }
 0x27b   : > { %v1857_v6 = vpack.c.bf16 %v5173_v35, %v5108_v60  ;;  %v1854_v54 = vpack.c.bf16 %v5051_v30, %v7548_v10  ;;  %v1855_v25 = vpack.c.bf16 %v5133_v7, %v4993_v39 }
 0x27c   : > { %2361 = vrot.lane.b32.xlu2 %v7547_v32, %s4182_s20  ;;  %v1542_v45 = vpack.c.bf16 %v1530_v8, %v1528_v17  ;;  %v1543_v37 = vpack.c.bf16 %v1531_v36, %v1529_v14  ;;  %v1852_v8 = vpack.c.bf16 %v7549_v3, %v5008_v1  ;;  %v1853_v14 = vpack.c.bf16 %v5114_v55, %v5116_v62  ;;  %v4019_v36 = vld [vmem:[#allocation3 + $0x18] sm:$0xff] }
 0x27e   : > { %2170 = vrot.lane.b32.xlu0 %v5051_v30, %s4186_s22  ;;  %2184 = vrot.lane.b32.xlu1 %v4993_v39, %s4186_s22  ;;  %v5595_v27 = vpop.permute.xlu2 %1981 }
 0x27f   : > { %1595 = vmatpush.bf16.msrb.mxu0 %v1542_v45  ;;  %1624 = vmatpush.bf16.msrb.mxu1 %v1543_v37 }
 0x280   : > { %v1493_v12 = vpop.permute.xlu0 %1492  ;;  %v5601_v19 = vpop.permute.xlu1 %1663 }
 0x281   : > { %v1507_v0 = vsel %vm526_vm2, %v5477_v63, %v1493_v12  ;;  %v1515_v51 = vsel %vm526_vm2, %v1493_v12, %v5477_v63  ;;  %v1858_v63 = vpack.c.bf16 %v4959_v38, %v5036_v28 }
 0x282   : > { %3791 = vmatmul.msk.bf16.gmra.mxu0 %vm1313_vm8, %v4023_v42  ;;  %3795 = vmatmul.msk.bf16.gmra.mxu1 %vm1313_vm8, %v4023_v42  ;;  %v1526_v47 = vmul.f32 %v5522_v34, %v1515_v51  ;;  %v1527_v24 = vmul.f32 %v5525_v46, %v1507_v0  ;;  %v5667_v42 = vperm.slane %v5396_v33, 3 }
 0x284   : > { %2379 = vrot.lane.b32.xlu2 %v5173_v35, %s4182_s20  ;;  %v1540_v31 = vpack.c.bf16 %v1526_v47, %v1524_v4  ;;  %v1541_v48 = vpack.c.bf16 %v1527_v24, %v1525_v22  ;;  %7559 = vst [vmem:[#allocation60_spill] sm:$0xff] %v5667_v42 }
 0x286   : > { %2164 = vrot.lane.b32.xlu0 %v5008_v1, %s4186_s22  ;;  %2166 = vrot.lane.b32.xlu1 %v7549_v3, %s4186_s22  ;;  %v5623_v59 = vpop.permute.xlu2 %1987 }
 0x287   : > { %1596 = vmatpush.bf16.msrb.mxu0 %v1540_v31  ;;  %1625 = vmatpush.bf16.msrb.mxu1 %v1541_v48  ;;  %v1707_v48 = vsel %vm605_vm3, %v5511_v44, %v5455_v61 }
 0x288   : > { %3814 = vmatmul.msk.bf16.gmra.mxu2 %vm1313_vm8, %v4018_v41  ;;  %v1668_v11 = vpop.permute.xlu0 %1667  ;;  %v5628_v5 = vpop.permute.xlu1 %1669  ;;  %3818 = vmatmul.msk.bf16.gmra.mxu3 %vm1313_vm8, %v4018_v41  ;;  %v4025_v41 = vld [vmem:[#allocation3 + $0x48] sm:$0xff] }
 0x28b   : > { %1905 = vmatpush.bf16.msra.mxu0 %v1858_v63  ;;  %1934 = vmatpush.bf16.msra.mxu1 %v1859_v2  ;;  %v1699_v63 = vsel %vm605_vm3, %v5455_v61, %v5511_v44 }
 0x28c   : > { %2373 = vrot.lane.b32.xlu2 %v4993_v39, %s4182_s20  ;;  %v1722_v44 = vmul.f32 %v5670_v20, %v1699_v63 }
 0x28e   : > { %2182 = vrot.lane.b32.xlu0 %v5114_v55, %s4186_s22  ;;  %2365 = vrot.lane.b32.xlu1 %v5036_v28, %s4182_s20  ;;  %v5645_v17 = vpop.permute.xlu2 %1993 }
 0x28f   : > { %1906 = vmatpush.bf16.msra.mxu0 %v1856_v29  ;;  %1935 = vmatpush.bf16.msra.mxu1 %v1857_v6  ;;  %v1721_v6 = vmul.f32 %v5667_v42, %v1707_v48 }
 0x290   : > { %v1676_v50 = vpop.permute.xlu0 %1675  ;;  %v1678_v18 = vpop.permute.xlu1 %1677 }
 0x291   : > { %v1701_v45 = vsel %vm605_vm3, %v1676_v50, %v5501_v53  ;;  %v1709_v37 = vsel %vm605_vm3, %v5501_v53, %v1676_v50 }
 0x292   : > { %3836 = vmatmul.msk.bf16.vlgmr.msrb.gmra.mxu0 %vm1313_vm8, %v4024_v43  ;;  %3840 = vmatmul.msk.bf16.vlgmr.msrb.gmra.mxu1 %vm1313_vm8, %v4024_v43  ;;  %v1725_v53 = vmul.f32 %v5667_v42, %v1709_v37  ;;  %v1726_v4 = vmul.f32 %v5670_v20, %v1701_v45 }
 0x293   : > { %1907 = vmatpush.bf16.msra.mxu0 %v1854_v54  ;;  %1936 = vmatpush.bf16.msra.mxu1 %v1855_v25 }
 0x294   : > { %2556 = vrot.lane.b32.xlu2 %v4959_v38, %s4184_s21 }
 0x296   : > { %2381 = vrot.lane.b32.xlu0 %v5152_v26, %s4182_s20  ;;  %2383 = vrot.lane.b32.xlu1 %v5077_v40, %s4182_s20  ;;  %v5681_v22 = vpop.permute.xlu2 %2005 }
 0x297   : > { %1908 = vmatpush.bf16.msra.mxu0 %v1852_v8  ;;  %1937 = vmatpush.bf16.msra.mxu1 %v1853_v14  ;;  %v1698_v8 = vsel %vm605_vm3, %v5628_v5, %v5541_v21 }
 0x298   : > { %3815 = vmatmul.msk.bf16.gmra.mxu2 %vm1313_vm8, %v4019_v36  ;;  %v1694_v9 = vpop.permute.xlu0 %1693  ;;  %v1674_v38 = vpop.permute.xlu1 %1673  ;;  %3819 = vmatmul.msk.bf16.gmra.mxu3 %vm1313_vm8, %v4019_v36 }
 0x299   : > { %v1702_v12 = vsel %vm605_vm3, %v1678_v18, %v1694_v9  ;;  %v1710_v0 = vsel %vm605_vm3, %v1694_v9, %v1678_v18 }
 0x29a   : > { %v1727_v51 = vmul.f32 %v5667_v42, %v1710_v0  ;;  %v1728_v47 = vmul.f32 %v5670_v20, %v1702_v12 }
 0x29c   : > { %2353 = vrot.lane.b32.xlu2 %v5008_v1, %s4182_s20  ;;  %v1735_v24 = vpack.c.bf16 %v1727_v51, %v1725_v53  ;;  %v1736_v31 = vpack.c.bf16 %v1728_v47, %v1726_v4 }
 0x29e   : > { %2363 = vrot.lane.b32.xlu0 %v5088_v15, %s4182_s20  ;;  %2377 = vrot.lane.b32.xlu1 %v5108_v60, %s4182_s20  ;;  %v5723_v9 = vpop.permute.xlu2 %1997 }
 0x29f   : > { %1782 = vmatpush.bf16.msrb.mxu2 %v1735_v24  ;;  %1811 = vmatpush.bf16.msrb.mxu3 %v1736_v31 }
 0x2a0   : > { %v1690_v2 = vpop.permute.xlu0 %1689  ;;  %v1684_v29 = vpop.permute.xlu1 %1683 }
 0x2a1   : > { %v1700_v54 = vsel %vm605_vm3, %v1674_v38, %v1690_v2  ;;  %v1708_v43 = vsel %vm605_vm3, %v1690_v2, %v1674_v38  ;;  %v1697_v25 = vsel %vm605_vm3, %v1668_v11, %v1684_v29  ;;  %v1705_v50 = vsel %vm605_vm3, %v1684_v29, %v1668_v11 }
 0x2a2   : > { %3837 = vmatmul.msk.bf16.gmra.mxu0 %vm1313_vm8, %v4025_v41  ;;  %3841 = vmatmul.msk.bf16.gmra.mxu1 %vm1313_vm8, %v4025_v41  ;;  %v1723_v61 = vmul.f32 %v5667_v42, %v1708_v43  ;;  %v1724_v18 = vmul.f32 %v5670_v20, %v1700_v54  ;;  %v1706_v11 = vsel %vm605_vm3, %v5541_v21, %v5628_v5 }
 0x2a3   : > { %v1717_v45 = vmul.f32 %v5667_v42, %v1705_v50  ;;  %v1718_v37 = vmul.f32 %v5670_v20, %v1697_v25  ;;  %v1719_v38 = vmul.f32 %v5667_v42, %v1706_v11  ;;  %v1720_v21 = vmul.f32 %v5670_v20, %v1698_v8  ;;  %v4029_v50 = vld [vmem:[#allocation3 + $0x68] sm:$0xff] }
 0x2a4   : > { %2371 = vrot.lane.b32.xlu2 %v5114_v55, %s4182_s20  ;;  %v1733_v14 = vpack.c.bf16 %v1723_v61, %v1721_v6  ;;  %v1734_v36 = vpack.c.bf16 %v1724_v18, %v1722_v44  ;;  %v4028_v6 = vld [vmem:[#allocation3 + $0x60] sm:$0xff]  ;;  %v5794_v18 = vperm.slane %v5396_v33, 5  ;;  %v5797_v8 = vperm.slane %v5408_v13, 5 }
 0x2a5   : > { %v1731_v0 = vpack.c.bf16 %v1719_v38, %v1717_v45  ;;  %v1732_v53 = vpack.c.bf16 %v1720_v21, %v1718_v37 }
 0x2a6   : > { %2357 = vrot.lane.b32.xlu0 %v7548_v10, %s4182_s20  ;;  %2359 = vrot.lane.b32.xlu1 %v5051_v30, %s4182_s20  ;;  %v5753_v29 = vpop.permute.xlu2 %2192  ;;  %7561 = vst [vmem:[#allocation29_spill] sm:$0xff] %v5794_v18 }
 0x2a7   : > { %1783 = vmatpush.bf16.msrb.mxu2 %v1733_v14  ;;  %1812 = vmatpush.bf16.msrb.mxu3 %v1734_v36  ;;  %7562 = vst [vmem:[#allocation59_spill] sm:$0xff] %v5797_v8 }
 0x2a8   : > { %v1680_v5 = vpop.permute.xlu0 %1679  ;;  %v1682_v12 = vpop.permute.xlu1 %1681 }
 0x2a9   : > { %v1695_v51 = vsel %vm605_vm3, %v5601_v19, %v1680_v5  ;;  %v1703_v4 = vsel %vm605_vm3, %v1680_v5, %v5601_v19  ;;  %v1696_v47 = vsel %vm605_vm3, %v5391_v52, %v1682_v12  ;;  %v1704_v24 = vsel %vm605_vm3, %v1682_v12, %v5391_v52  ;;  %v4026_v52 = vld [vmem:[#allocation3 + $0x50] sm:$0xff] }
 0x2aa   : > { %v1713_v31 = vmul.f32 %v5667_v42, %v1703_v4  ;;  %v1715_v48 = vmul.f32 %v5667_v42, %v1704_v24  ;;  %v1714_v41 = vmul.f32 %v5670_v20, %v1695_v51  ;;  %v1716_v63 = vmul.f32 %v5670_v20, %v1696_v47 }
 0x2ab   : > { %1784 = vmatpush.bf16.msrb.mxu2 %v1731_v0  ;;  %1813 = vmatpush.bf16.msrb.mxu3 %v1732_v53  ;;  %v4030_v53 = vld [vmem:[#allocation3 + $0x70] sm:$0xff] }
 0x2ac   : > { %2566 = vrot.lane.b32.xlu2 %v5108_v60, %s4184_s21  ;;  %v1729_v19 = vpack.c.bf16 %v1715_v48, %v1713_v31  ;;  %v1730_v2 = vpack.c.bf16 %v1716_v63, %v1714_v41  ;;  %v346_v41 = vld [vmem:[%s7285_s5 + $0x28] sm:$0xff] }
 0x2ae   : > { %2375 = vrot.lane.b32.xlu0 %v5133_v7, %s4182_s20  ;;  %2554 = vrot.lane.b32.xlu1 %v5036_v28, %s4184_s21  ;;  %v5767_v25 = vpop.permute.xlu2 %2174 }
 0x2af   : > { %1785 = vmatpush.bf16.msrb.mxu2 %v1729_v19  ;;  %1814 = vmatpush.bf16.msrb.mxu3 %v1730_v2 }
 0x2b0   : > { %v5755_v54 = vpop.permute.xlu0 %1977  ;;  %v1980_v43 = vpop.permute.xlu1 %1979 }
 0x2b2   : > { %3838 = vmatmul.msk.bf16.gmra.mxu0 %vm1313_vm8, %v4026_v52  ;;  %3842 = vmatmul.msk.bf16.gmra.mxu1 %vm1313_vm8, %v4026_v52 }
 0x2b3   : > { %3860 = vmatmul.msk.bf16.vlgmr.msrb.gmra.mxu2 %vm1313_vm8, %v4028_v6  ;;  %3864 = vmatmul.msk.bf16.vlgmr.msrb.gmra.mxu3 %vm1313_vm8, %v4028_v6  ;;  %v2010_v6 = vsel %vm748_vm4, %v5595_v27, %v5723_v9 }
 0x2b4   : > { %2548 = vrot.lane.b32.xlu2 %v5051_v30, %s4184_s21  ;;  %v4027_v30 = vld [vmem:[#allocation3 + $0x58] sm:$0xff] }
 0x2b6   : > { %2570 = vrot.lane.b32.xlu0 %v5152_v26, %s4184_s21  ;;  %2572 = vrot.lane.b32.xlu1 %v5077_v40, %s4184_s21  ;;  %v5778_v40 = vpop.permute.xlu2 %2168 }
 0x2b8   : > { %v1984_v28 = vpop.permute.xlu0 %1983  ;;  %v1986_v60 = vpop.permute.xlu1 %1985 }
 0x2bc   : > { %2542 = vrot.lane.b32.xlu2 %v5008_v1, %s4184_s21 }
 0x2be   : > { %2355 = vrot.lane.b32.xlu0 %v7549_v3, %s4182_s20  ;;  %2369 = vrot.lane.b32.xlu1 %v5116_v62, %s4182_s20  ;;  %v5812_v5 = vpop.permute.xlu2 %2186 }
 0x2c0   : > { %v1990_v61 = vpop.permute.xlu0 %1989  ;;  %v1992_v26 = vpop.permute.xlu1 %1991 }
 0x2c1   : > { %v2014_v1 = vsel %vm748_vm4, %v1990_v61, %v5681_v22  ;;  %v2022_v44 = vsel %vm748_vm4, %v5681_v22, %v1990_v61  ;;  %v343_v22 = vld [vmem:[%s7285_s5 + $0x10] sm:$0xff]  ;;  %v2007_v61 = vsel %vm748_vm4, %v5565_v23, %v1992_v26 }
 0x2c2   : > { %3839 = vmatmul.msk.bf16.gmra.mxu0 %vm1313_vm8, %v4027_v30  ;;  %3843 = vmatmul.msk.bf16.gmra.mxu1 %vm1313_vm8, %v4027_v30  ;;  %v2039_v14 = vmul.f32 %v5794_v18, %v2014_v1  ;;  %v2040_v36 = vmul.f32 %v5797_v8, %v2022_v44  ;;  %v2015_v1 = vsel %vm748_vm4, %v1992_v26, %v5565_v23 }
 0x2c3   : > { %3861 = vmatmul.msk.bf16.gmra.mxu2 %vm1313_vm8, %v4029_v50  ;;  %3865 = vmatmul.msk.bf16.gmra.mxu3 %vm1313_vm8, %v4029_v50  ;;  %v2008_v23 = vsel %vm748_vm4, %v5755_v54, %v5645_v17 }
 0x2c4   : > { %2560 = vrot.lane.b32.xlu2 %v5114_v55, %s4184_s21 }
 0x2c6   : > { %2550 = vrot.lane.b32.xlu0 %v7547_v32, %s4184_s21  ;;  %2552 = vrot.lane.b32.xlu1 %v5088_v15, %s4184_s21 }
 0x2c8   : > { %v1996_v55 = vpop.permute.xlu0 %1995  ;;  %v2004_v11 = vpop.permute.xlu1 %2003 }
 0x2c9   : > { %v2013_v15 = vsel %vm748_vm4, %v5623_v59, %v2004_v11  ;;  %v2021_v32 = vsel %vm748_vm4, %v2004_v11, %v5623_v59  ;;  %v4032_v59 = vld [vmem:[#allocation3 + $0x80] sm:$0xff]  ;;  %v2009_v51 = vsel %vm748_vm4, %v1980_v43, %v1996_v55  ;;  %v2017_v4 = vsel %vm748_vm4, %v1996_v55, %v1980_v43 }
 0x2ca   : > { %v2037_v45 = vmul.f32 %v5794_v18, %v2013_v15  ;;  %v2038_v37 = vmul.f32 %v5797_v8, %v2021_v32  ;;  %v2018_v43 = vsel %vm748_vm4, %v5723_v9, %v5595_v27  ;;  %v2029_v30 = vmul.f32 %v5794_v18, %v2009_v51 }
 0x2cb   : > { %v2030_v50 = vmul.f32 %v5797_v8, %v2017_v4  ;;  %v2031_v27 = vmul.f32 %v5794_v18, %v2010_v6  ;;  %v2032_v9 = vmul.f32 %v5797_v8, %v2018_v43  ;;  %v2025_v11 = vmul.f32 %v5794_v18, %v2007_v61 }
 0x2cc   : > { %v2047_v38 = vpack.c.bf16 %v2039_v14, %v2037_v45  ;;  %v2048_v21 = vpack.c.bf16 %v2040_v36, %v2038_v37  ;;  %2743 = vperm.xlu2 %4118, %v343_v22   ;;  %v2026_v15 = vmul.f32 %v5797_v8, %v2015_v1  ;;  %v5881_v14 = vpop.permute.xlu2 %2180  ;;  %v2027_v36 = vmul.f32 %v5794_v18, %v2008_v23 }
 0x2cd   : > { %v2043_v32 = vpack.c.bf16 %v2031_v27, %v2029_v30  ;;  %v2044_v22 = vpack.c.bf16 %v2032_v9, %v2030_v50 }
 0x2ce   : > { %2568 = vrot.lane.b32.xlu0 %v5173_v35, %s4184_s21  ;;  %2546 = vrot.lane.b32.xlu1 %v7548_v10, %s4184_s21  ;;  %v2041_v37 = vpack.c.bf16 %v2027_v36, %v2025_v11 }
 0x2cf   : > { %v5818_v12 = vpop.f32.mrf.mxu0  ;;  %v5820_v0 = vpop.f32.mrf.mxu1  ;;  %2094 = vmatpush.bf16.msra.mxu2 %v2047_v38  ;;  %2123 = vmatpush.bf16.msra.mxu3 %v2048_v21  ;;  %v4033_v21 = vld [vmem:[#allocation3 + $0x88] sm:$0xff] }
 0x2d0   : > { %v2000_v47 = vpop.permute.xlu0 %1999  ;;  %v2002_v24 = vpop.permute.xlu1 %2001 }
 0x2d1   : > { %v2011_v35 = vsel %vm748_vm4, %v1984_v28, %v2000_v47  ;;  %v2019_v10 = vsel %vm748_vm4, %v2000_v47, %v1984_v28  ;;  %v2012_v31 = vsel %vm748_vm4, %v1986_v60, %v2002_v24  ;;  %v2020_v48 = vsel %vm748_vm4, %v2002_v24, %v1986_v60  ;;  %v4031_v47 = vld [vmem:[#allocation3 + $0x78] sm:$0xff] }
 0x2d2   : > { %v2033_v63 = vmul.f32 %v5794_v18, %v2011_v35  ;;  %v2034_v19 = vmul.f32 %v5797_v8, %v2019_v10  ;;  %v2035_v2 = vmul.f32 %v5794_v18, %v2012_v31  ;;  %v2036_v52 = vmul.f32 %v5797_v8, %v2020_v48  ;;  %3884 = vmatmul.msk.bf16.vlgmr.msra.gmra.mxu0 %vm1313_vm8, %v4032_v59 }
 0x2d3   : > { %3862 = vmatmul.msk.bf16.gmra.mxu2 %vm1313_vm8, %v4030_v53  ;;  %3888 = vmatmul.msk.bf16.vlgmr.msra.gmra.mxu1 %vm1313_vm8, %v4032_v59 }
 0x2d4   : > { %3866 = vmatmul.msk.bf16.gmra.mxu3 %vm1313_vm8, %v4030_v53  ;;  %2758 = vperm.xlu2 %4118, %v346_v41   ;;  %v2045_v28 = vpack.c.bf16 %v2035_v2, %v2033_v63  ;;  %v2046_v60 = vpack.c.bf16 %v2036_v52, %v2034_v19  ;;  %v341_v41 = vld [vmem:[%s7285_s5] sm:$0xff]  ;;  %v342_v63 = vld [vmem:[%s7285_s5 + $0x8] sm:$0xff]  ;;  %v5922_v19 = vpop.permute.xlu2 %2367 }
 0x2d6   : > { %2562 = vrot.lane.b32.xlu0 %v4993_v39, %s4184_s21  ;;  %2564 = vrot.lane.b32.xlu1 %v5133_v7, %s4184_s21  ;;  %v2016_v39 = vsel %vm748_vm4, %v5645_v17, %v5755_v54  ;;  %v5886_v17 = vperm.slane %v5396_v33, 6  ;;  %v5889_v54 = vperm.slane %v5408_v13, 6 }
 0x2d7   : > { %v5867_v44 = vpop.f32.mrf.mxu0  ;;  %v5869_v55 = vpop.f32.mrf.mxu1  ;;  %2095 = vmatpush.bf16.msra.mxu2 %v2045_v28  ;;  %2124 = vmatpush.bf16.msra.mxu3 %v2046_v60  ;;  %v2028_v45 = vmul.f32 %v5797_v8, %v2016_v39 }
 0x2d8   : > { %v2177_v7 = vpop.permute.xlu0 %2176  ;;  %v2179_v26 = vpop.permute.xlu1 %2178  ;;  %7563 = vst [vmem:[#allocation48_spill] sm:$0xff] %v5886_v17 }
 0x2d9   : > { %v2042_v38 = vpack.c.bf16 %v2028_v45, %v2026_v15  ;;  %7564 = vst [vmem:[#allocation58_spill] sm:$0xff] %v5889_v54  ;;  %v2202_v59 = vsel %vm827_vm5, %v2177_v7, %v5753_v29  ;;  %v2210_v53 = vsel %vm827_vm5, %v5753_v29, %v2177_v7  ;;  %v344_v15 = vld [vmem:[%s7285_s5 + $0x18] sm:$0xff] }
 0x2da   : > { %v2226_v10 = vmul.f32 %v5886_v17, %v2202_v59  ;;  %v2227_v31 = vmul.f32 %v5889_v54, %v2210_v53 }
 0x2db   : > { %2096 = vmatpush.bf16.msra.mxu2 %v2043_v32  ;;  %2125 = vmatpush.bf16.msra.mxu3 %v2044_v22 }
 0x2dc   : > { %v5955_v45 = vpop.permute.xlu2 %2361 }
 0x2de   : > { %2544 = vrot.lane.b32.xlu0 %v7549_v3, %s4184_s21  ;;  %2558 = vrot.lane.b32.xlu1 %v5116_v62, %s4184_s21 }
 0x2df   : > { %v5901_v51 = vpop.f32.mrf.mxu0  ;;  %v5903_v4 = vpop.f32.mrf.mxu1  ;;  %2097 = vmatpush.bf16.msra.mxu2 %v2041_v37  ;;  %2126 = vmatpush.bf16.msra.mxu3 %v2042_v38  ;;  %v4034_v37 = vld [vmem:[#allocation3 + $0x90] sm:$0xff] }
 0x2e0   : > { %v2195_v3 = vpop.permute.xlu0 %2194  ;;  %v2173_v24 = vpop.permute.xlu1 %2172 }
 0x2e1   : > { %v2203_v62 = vsel %vm827_vm5, %v2179_v26, %v2195_v3  ;;  %v2211_v35 = vsel %vm827_vm5, %v2195_v3, %v2179_v26 }
 0x2e2   : > { %v2228_v29 = vmul.f32 %v5886_v17, %v2203_v62  ;;  %v2229_v48 = vmul.f32 %v5889_v54, %v2211_v35  ;;  %3885 = vmatmul.msk.bf16.gmra.mxu0 %vm1313_vm8, %v4033_v21 }
 0x2e3   : > { %3863 = vmatmul.msk.bf16.gmra.mxu2 %vm1313_vm8, %v4031_v47  ;;  %3889 = vmatmul.msk.bf16.gmra.mxu1 %vm1313_vm8, %v4033_v21  ;;  %v4036_v21 = vld [vmem:[#allocation3 + $0xa0] sm:$0xff] }
 0x2e4   : > { %v2236_v2 = vpack.c.bf16 %v2228_v29, %v2226_v10  ;;  %v2237_v52 = vpack.c.bf16 %v2229_v48, %v2227_v31  ;;  %3867 = vmatmul.msk.bf16.gmra.mxu3 %vm1313_vm8, %v4031_v47  ;;  %v348_v48 = vld [vmem:[%s7285_s5 + $0x38] sm:$0xff] }
 0x2e6   : > { %2733 = vperm.xlu0 %4116, %v341_v41   ;;  %2738 = vperm.xlu1 %4117, %v342_v63  }
 0x2e7   : > { %v5925_v6 = vpop.f32.mrf.mxu0  ;;  %v5927_v43 = vpop.f32.mrf.mxu1  ;;  %2283 = vmatpush.bf16.msrb.mxu0 %v2236_v2  ;;  %2312 = vmatpush.bf16.msrb.mxu1 %v2237_v52 }
 0x2e8   : > { %v2189_v28 = vpop.permute.xlu0 %2188  ;;  %v2191_v60 = vpop.permute.xlu1 %2190 }
 0x2e9   : > { %v2200_v30 = vsel %vm827_vm5, %v2173_v24, %v2189_v28  ;;  %v2208_v50 = vsel %vm827_vm5, %v2189_v28, %v2173_v24  ;;  %v2201_v61 = vsel %vm827_vm5, %v5767_v25, %v2191_v60  ;;  %v2209_v1 = vsel %vm827_vm5, %v2191_v60, %v5767_v25  ;;  %v345_v25 = vld [vmem:[%s7285_s5 + $0x20] sm:$0xff] }
 0x2ea   : > { %v2222_v27 = vmul.f32 %v5886_v17, %v2200_v30  ;;  %v2223_v9 = vmul.f32 %v5889_v54, %v2208_v50  ;;  %v2224_v23 = vmul.f32 %v5886_v17, %v2201_v61  ;;  %v2225_v39 = vmul.f32 %v5889_v54, %v2209_v1  ;;  %v1425_v7 = vpop.f32.mrf.mxu2  ;;  %v1454_v26 = vpop.f32.mrf.mxu3 }
 0x2eb   : > { %v5944_v11 = vadd.f32 %v1425_v7, %v5818_v12  ;;  %v5953_v32 = vadd.f32 %v1454_v26, %v5820_v0  ;;  %v5995_v30 = vpop.permute.xlu2 %2379 }
 0x2ec   : > { %v2234_v22 = vpack.c.bf16 %v2224_v23, %v2222_v27  ;;  %v2235_v36 = vpack.c.bf16 %v2225_v39, %v2223_v9  ;;  %v4035_v9 = vld [vmem:[#allocation3 + $0x98] sm:$0xff] }
 0x2ee   : > { %2748 = vperm.xlu0 %4116, %v344_v15   ;;  %2753 = vperm.xlu1 %4117, %v345_v25   ;;  %v4037_v15 = vld [vmem:[#allocation3 + $0xa8] sm:$0xff] }
 0x2ef   : > { %v5957_v12 = vpop.f32.mrf.mxu0  ;;  %v5959_v38 = vpop.f32.mrf.mxu1  ;;  %2284 = vmatpush.bf16.msrb.mxu0 %v2234_v22  ;;  %2313 = vmatpush.bf16.msrb.mxu1 %v2235_v36 }
 0x2f0   : > { %v2171_v59 = vpop.permute.xlu0 %2170  ;;  %v2185_v53 = vpop.permute.xlu1 %2184 }
 0x2f1   : > { %v2199_v0 = vsel %vm827_vm5, %v2171_v59, %v5812_v5  ;;  %v2207_v47 = vsel %vm827_vm5, %v5812_v5, %v2171_v59  ;;  %v2198_v3 = vsel %vm827_vm5, %v5778_v40, %v2185_v53  ;;  %v2206_v24 = vsel %vm827_vm5, %v2185_v53, %v5778_v40  ;;  %v347_v40 = vld [vmem:[%s7285_s5 + $0x30] sm:$0xff] }
 0x2f2   : > { %v2220_v62 = vmul.f32 %v5886_v17, %v2199_v0  ;;  %v2221_v35 = vmul.f32 %v5889_v54, %v2207_v47  ;;  %v2218_v10 = vmul.f32 %v5886_v17, %v2198_v3  ;;  %v2219_v31 = vmul.f32 %v5889_v54, %v2206_v24  ;;  %3886 = vmatmul.msk.bf16.gmra.mxu0 %vm1313_vm8, %v4034_v37  ;;  %v5978_v29 = vpop.f32.mrf.mxu2  ;;  %v5980_v5 = vpop.f32.mrf.mxu3 }
 0x2f3   : > { %3890 = vmatmul.msk.bf16.gmra.mxu1 %vm1313_vm8, %v4034_v37  ;;  %3908 = vmatmul.msk.bf16.vlgmr.msra.gmra.mxu2 %vm1313_vm8, %v4036_v21  ;;  %v6028_v0 = vpop.permute.xlu2 %2373  ;;  %v6032_v24 = vperm.slane %v5396_v33, 7 }
 0x2f4   : > { %3912 = vmatmul.msk.bf16.vlgmr.msra.gmra.mxu3 %vm1313_vm8, %v4036_v21  ;;  %v2232_v41 = vpack.c.bf16 %v2220_v62, %v2218_v10  ;;  %v2233_v63 = vpack.c.bf16 %v2221_v35, %v2219_v31  ;;  %v6035_v62 = vperm.slane %v5408_v13, 7 }
 0x2f5   : > { %7565 = vst [vmem:[#allocation16_spill] sm:$0xff] %v6032_v24 }
 0x2f6   : > { %2763 = vperm.xlu0 %4116, %v347_v40   ;;  %2768 = vperm.xlu1 %4117, %v348_v48   ;;  %7566 = vst [vmem:[#allocation41_spill] sm:$0xff] %v6035_v62 }
 0x2f7   : > { %v5991_v2 = vpop.f32.mrf.mxu0  ;;  %v5993_v52 = vpop.f32.mrf.mxu1  ;;  %2285 = vmatpush.bf16.msrb.mxu0 %v2232_v41  ;;  %2314 = vmatpush.bf16.msrb.mxu1 %v2233_v63 }
 0x2f8   : > { %v2165_v28 = vpop.permute.xlu0 %2164  ;;  %v2167_v60 = vpop.permute.xlu1 %2166 }
 0x2f9   : > { %v2196_v23 = vsel %vm827_vm5, %v2165_v28, %v5881_v14  ;;  %v2204_v39 = vsel %vm827_vm5, %v5881_v14, %v2165_v28 }
 0x2fa   : > { %v2214_v36 = vmul.f32 %v5886_v17, %v2196_v23  ;;  %v2215_v37 = vmul.f32 %v5889_v54, %v2204_v39 }
 0x2fb   : > { %v1430_v50 = vpop.f32.mrf.mxu2  ;;  %v1459_v61 = vpop.f32.mrf.mxu3 }
 0x2fc   : > { %v5998_v1 = vadd.f32 %v1430_v50, %v5901_v51  ;;  %v6001_v27 = vadd.f32 %v1459_v61, %v5903_v4 }
 0x2ff   : > { %v6009_v7 = vpop.f32.mrf.mxu0  ;;  %v6011_v26 = vpop.f32.mrf.mxu1 }
 0x300   : > { %v2183_v25 = vpop.permute.xlu0 %2182  ;;  %v2366_v51 = vpop.permute.xlu1 %2365 }
 0x301   : > { %v2197_v4 = vsel %vm827_vm5, %v2167_v60, %v2183_v25  ;;  %v2205_v22 = vsel %vm827_vm5, %v2183_v25, %v2167_v60 }
 0x302   : > { %v2216_v21 = vmul.f32 %v5886_v17, %v2197_v4  ;;  %v2217_v14 = vmul.f32 %v5889_v54, %v2205_v22  ;;  %3887 = vmatmul.msk.bf16.gmra.mxu0 %vm1313_vm8, %v4035_v9 }
 0x303   : > { %3891 = vmatmul.msk.bf16.gmra.mxu1 %vm1313_vm8, %v4035_v9  ;;  %3909 = vmatmul.msk.bf16.gmra.mxu2 %vm1313_vm8, %v4037_v15  ;;  %v6024_v59 = vpop.f32.mrf.mxu2  ;;  %v6026_v53 = vpop.f32.mrf.mxu3 }
 0x304   : > { %3913 = vmatmul.msk.bf16.gmra.mxu3 %vm1313_vm8, %v4037_v15  ;;  %v2230_v47 = vpack.c.bf16 %v2216_v21, %v2214_v36  ;;  %v2231_v3 = vpack.c.bf16 %v2217_v14, %v2215_v37  ;;  %v4038_v36 = vld [vmem:[#allocation3 + $0xb0] sm:$0xff] }
 0x306   : > { %2286 = vmatpush.bf16.msrb.mxu0 %v2230_v47  ;;  %2315 = vmatpush.bf16.msrb.mxu1 %v2231_v3 }
 0x307   : > { %v6037_v35 = vpop.f32.mrf.mxu0  ;;  %v6039_v10 = vpop.f32.mrf.mxu1 }
 0x308   : > { %v2382_v31 = vpop.permute.xlu0 %2381  ;;  %v2384_v40 = vpop.permute.xlu1 %2383 }
 0x309   : > { %v2391_v48 = vsel %vm906_vm7, %v2366_v51, %v2382_v31  ;;  %v2399_v41 = vsel %vm906_vm7, %v2382_v31, %v2366_v51  ;;  %v2392_v33 = vsel %vm906_vm7, %v5922_v19, %v2384_v40  ;;  %v2400_v13 = vsel %vm906_vm7, %v2384_v40, %v5922_v19  ;;  %v6061_v51 = vpop.permute.xlu2 %2556  ;;  %v4040_v19 = vld [vmem:[#allocation3 + $0xc0] sm:$0xff] }
 0x30a   : > { %v2415_v63 = vmul.f32 %v6032_v24, %v2391_v48  ;;  %v2416_v28 = vmul.f32 %v6035_v62, %v2399_v41  ;;  %v2417_v60 = vmul.f32 %v6032_v24, %v2392_v33  ;;  %v2418_v50 = vmul.f32 %v6035_v62, %v2400_v13 }
 0x30b   : > { %v1435_v61 = vpop.f32.mrf.mxu2  ;;  %v1464_v15 = vpop.f32.mrf.mxu3 }
 0x30c   : > { %v2425_v9 = vpack.c.bf16 %v2417_v60, %v2415_v63  ;;  %v2426_v23 = vpack.c.bf16 %v2418_v50, %v2416_v28  ;;  %v6056_v39 = vadd.f32 %v1435_v61, %v5957_v12  ;;  %v6059_v25 = vadd.f32 %v1464_v15, %v5959_v38 }
 0x30e   : > { %2472 = vmatpush.bf16.msrb.mxu2 %v2425_v9  ;;  %2501 = vmatpush.bf16.msrb.mxu3 %v2426_v23 }
 0x30f   : > { %v1598_v4 = vpop.f32.mrf.mxu0  ;;  %v1627_v22 = vpop.f32.mrf.mxu1 }
 0x310   : > { %v6064_v37 = vadd.f32 %v1598_v4, %v5944_v11  ;;  %v6067_v21 = vadd.f32 %v1627_v22, %v5953_v32  ;;  %v2364_v12 = vpop.permute.xlu0 %2363  ;;  %v2378_v14 = vpop.permute.xlu1 %2377 }
 0x311   : > { %v2390_v38 = vsel %vm906_vm7, %v2364_v12, %v5995_v30  ;;  %v2398_v47 = vsel %vm906_vm7, %v5995_v30, %v2364_v12  ;;  %v2389_v3 = vsel %vm906_vm7, %v5955_v45, %v2378_v14  ;;  %v2397_v11 = vsel %vm906_vm7, %v2378_v14, %v5955_v45  ;;  %v2354_v50 = vpop.permute.xlu2 %2353  ;;  %v4039_v14 = vld [vmem:[#allocation3 + $0xb8] sm:$0xff] }
 0x312   : > { %v2413_v32 = vmul.f32 %v6032_v24, %v2390_v38  ;;  %v2414_v31 = vmul.f32 %v6035_v62, %v2398_v47  ;;  %v2411_v40 = vmul.f32 %v6032_v24, %v2389_v3  ;;  %v2412_v48 = vmul.f32 %v6035_v62, %v2397_v11  ;;  %3932 = vmatmul.msk.bf16.vlgmr.msrb.gmra.mxu0 %vm1313_vm8, %v4040_v19 }
 0x313   : > { %3910 = vmatmul.msk.bf16.gmra.mxu2 %vm1313_vm8, %v4038_v36  ;;  %3936 = vmatmul.msk.bf16.vlgmr.msrb.gmra.mxu1 %vm1313_vm8, %v4040_v19  ;;  %v6088_v30 = vpop.f32.mrf.mxu2  ;;  %v6091_v33 = vpop.f32.mrf.mxu3  ;;  %v4041_v19 = vld [vmem:[#allocation3 + $0xc8] sm:$0xff] }
 0x314   : > { %3914 = vmatmul.msk.bf16.gmra.mxu3 %vm1313_vm8, %v4038_v36  ;;  %v2423_v41 = vpack.c.bf16 %v2413_v32, %v2411_v40  ;;  %v2424_v45 = vpack.c.bf16 %v2414_v31, %v2412_v48 }
 0x316   : > { %2473 = vmatpush.bf16.msrb.mxu2 %v2423_v41  ;;  %2502 = vmatpush.bf16.msrb.mxu3 %v2424_v45  ;;  %v6130_v41 = vld [vmem:[%s7281_s1 + $0x10] ss:$0 sm:$0xff]  ;;  %v6135_v45 = vld [vmem:[%s7281_s1 + $0x18] ss:$0 sm:$0xff] }
 0x317   : > { %v6093_v13 = vpop.f32.mrf.mxu0  ;;  %v6095_v63 = vpop.f32.mrf.mxu1 }
 0x318   : > { %v2358_v28 = vpop.permute.xlu0 %2357  ;;  %v2360_v60 = vpop.permute.xlu1 %2359 }
 0x319   : > { %v2387_v4 = vsel %vm906_vm7, %v2358_v28, %v6028_v0  ;;  %v2395_v22 = vsel %vm906_vm7, %v6028_v0, %v2358_v28 }
 0x31a   : > { %v2407_v32 = vmul.f32 %v6032_v24, %v2387_v4  ;;  %v2408_v0 = vmul.f32 %v6035_v62, %v2395_v22 }
 0x31b   : > { %v1440_v61 = vpop.f32.mrf.mxu2  ;;  %v1469_v23 = vpop.f32.mrf.mxu3 }
 0x31c   : > { %v6098_v9 = vadd.f32 %v1440_v61, %v6009_v7  ;;  %v6101_v15 = vadd.f32 %v1469_v23, %v6011_v26 }
 0x31f   : > { %v1603_v36 = vpop.f32.mrf.mxu0  ;;  %v1632_v12 = vpop.f32.mrf.mxu1 }
 0x320   : > { %v6110_v38 = vadd.f32 %v1603_v36, %v5998_v1  ;;  %v6113_v7 = vadd.f32 %v1632_v12, %v6001_v27  ;;  %v2376_v26 = vpop.permute.xlu0 %2375  ;;  %v2555_v47 = vpop.permute.xlu1 %2554 }
 0x321   : > { %v2388_v3 = vsel %vm906_vm7, %v2360_v60, %v2376_v26  ;;  %v2396_v11 = vsel %vm906_vm7, %v2376_v26, %v2360_v60  ;;  %v2372_v27 = vpop.permute.xlu2 %2371 }
 0x322   : > { %v2409_v31 = vmul.f32 %v6032_v24, %v2388_v3  ;;  %v2410_v1 = vmul.f32 %v6035_v62, %v2396_v11  ;;  %3933 = vmatmul.msk.bf16.gmra.mxu0 %vm1313_vm8, %v4041_v19 }
 0x323   : > { %3911 = vmatmul.msk.bf16.gmra.mxu2 %vm1313_vm8, %v4039_v14  ;;  %3937 = vmatmul.msk.bf16.gmra.mxu1 %vm1313_vm8, %v4041_v19 }
 0x324   : > { %3915 = vmatmul.msk.bf16.gmra.mxu3 %vm1313_vm8, %v4039_v14  ;;  %v2421_v40 = vpack.c.bf16 %v2409_v31, %v2407_v32  ;;  %v2422_v48 = vpack.c.bf16 %v2410_v1, %v2408_v0  ;;  %v6157_v31 = vpop.f32.mrf.mxu3  ;;  %v4042_v1 = vld [vmem:[#allocation3 + $0xd0] sm:$0xff] }
 0x326   : > { %2474 = vmatpush.bf16.msrb.mxu2 %v2421_v40  ;;  %2503 = vmatpush.bf16.msrb.mxu3 %v2422_v48 }
 0x327   : > { %v6137_v28 = vpop.f32.mrf.mxu0  ;;  %v6139_v60 = vpop.f32.mrf.mxu1 }
 0x328   : > { %v2571_v61 = vpop.permute.xlu0 %2570  ;;  %v2573_v23 = vpop.permute.xlu1 %2572 }
 0x329   : > { %v2580_v19 = vsel %vm985_vm6, %v2555_v47, %v2571_v61  ;;  %v2588_v4 = vsel %vm985_vm6, %v2571_v61, %v2555_v47  ;;  %v2581_v22 = vsel %vm985_vm6, %v6061_v51, %v2573_v23  ;;  %v2589_v36 = vsel %vm985_vm6, %v2573_v23, %v6061_v51  ;;  %v2567_v0 = vpop.permute.xlu2 %2566  ;;  %v6155_v47 = vpop.f32.mrf.mxu2 }
 0x32a   : > { %v2604_v12 = vmul.f32 %v6130_v41, %v2580_v19  ;;  %v2605_v14 = vmul.f32 %v6135_v45, %v2588_v4  ;;  %v2606_v26 = vmul.f32 %v6130_v41, %v2581_v22  ;;  %v2607_v3 = vmul.f32 %v6135_v45, %v2589_v36 }
 0x32c   : > { %v2614_v11 = vpack.c.bf16 %v2606_v26, %v2604_v12  ;;  %v2615_v32 = vpack.c.bf16 %v2607_v3, %v2605_v14 }
 0x32e   : > { %2661 = vmatpush.bf16.msra.mxu0 %v2614_v11  ;;  %2690 = vmatpush.bf16.msra.mxu1 %v2615_v32  ;;  %v4044_v11 = vld [vmem:[#allocation3 + $0xe0] sm:$0xff] }
 0x32f   : > { %v1608_v40 = vpop.f32.mrf.mxu0  ;;  %v1637_v51 = vpop.f32.mrf.mxu1 }
 0x330   : > { %v6160_v48 = vadd.f32 %v1608_v40, %v6056_v39  ;;  %v6163_v61 = vadd.f32 %v1637_v51, %v6059_v25  ;;  %v2356_v23 = vpop.permute.xlu0 %2355  ;;  %v2370_v19 = vpop.permute.xlu1 %2369 }
 0x331   : > { %v2386_v4 = vsel %vm906_vm7, %v2356_v23, %v2372_v27  ;;  %v2394_v22 = vsel %vm906_vm7, %v2372_v27, %v2356_v23  ;;  %v2385_v36 = vsel %vm906_vm7, %v2354_v50, %v2370_v19  ;;  %v2393_v12 = vsel %vm906_vm7, %v2370_v19, %v2354_v50 }
 0x332   : > { %v2405_v39 = vmul.f32 %v6032_v24, %v2386_v4  ;;  %v2406_v14 = vmul.f32 %v6035_v62, %v2394_v22  ;;  %v2403_v25 = vmul.f32 %v6032_v24, %v2385_v36  ;;  %v2404_v26 = vmul.f32 %v6035_v62, %v2393_v12  ;;  %3934 = vmatmul.msk.bf16.gmra.mxu0 %vm1313_vm8, %v4042_v1  ;;  %v4045_v24 = vld [vmem:[#allocation3 + $0xe8] sm:$0xff] }
 0x333   : > { %3938 = vmatmul.msk.bf16.gmra.mxu1 %vm1313_vm8, %v4042_v1  ;;  %v2549_v1 = vpop.permute.xlu2 %2548 }
 0x334   : > { %v2419_v3 = vpack.c.bf16 %v2405_v39, %v2403_v25  ;;  %v2420_v27 = vpack.c.bf16 %v2406_v14, %v2404_v26  ;;  %v4043_v39 = vld [vmem:[#allocation3 + $0xd8] sm:$0xff] }
 0x336   : > { %v1787_v32 = vpop.f32.mrf.mxu2  ;;  %v1816_v40 = vpop.f32.mrf.mxu3  ;;  %2475 = vmatpush.bf16.msrb.mxu2 %v2419_v3  ;;  %2504 = vmatpush.bf16.msrb.mxu3 %v2420_v27 }
 0x337   : > { %v1836_v50 = vadd.f32 %v1787_v32, %v6064_v37  ;;  %v1837_v51 = vadd.f32 %v1816_v40, %v6067_v21  ;;  %v6181_v23 = vpop.f32.mrf.mxu0  ;;  %v6183_v19 = vpop.f32.mrf.mxu1 }
 0x338   : > { %v2551_v4 = vpop.permute.xlu0 %2550  ;;  %v2553_v22 = vpop.permute.xlu1 %2552 }
 0x339   : > { %3956 = vmatmul.msk.bf16.vlgmr.msrb.gmra.mxu2 %vm1313_vm8, %v4044_v11  ;;  %3960 = vmatmul.msk.bf16.vlgmr.msrb.gmra.mxu3 %vm1313_vm8, %v4044_v11  ;;  %v2578_v37 = vsel %vm985_vm6, %v2551_v4, %v2567_v0  ;;  %v2586_v21 = vsel %vm985_vm6, %v2567_v0, %v2551_v4 }
 0x33a   : > { %v2600_v62 = vmul.f32 %v6130_v41, %v2578_v37  ;;  %v2601_v0 = vmul.f32 %v6135_v45, %v2586_v21 }
 0x33e   : > { %v6187_v36 = vpop.f32.mrf.mxu2  ;;  %v6189_v12 = vpop.f32.mrf.mxu3 }
 0x33f   : > { %v1613_v14 = vpop.f32.mrf.mxu0  ;;  %v1642_v26 = vpop.f32.mrf.mxu1 }
 0x340   : > { %v6196_v25 = vadd.f32 %v1613_v14, %v6098_v9  ;;  %v2569_v3 = vpop.permute.xlu0 %2568  ;;  %v6199_v27 = vadd.f32 %v1642_v26, %v6101_v15  ;;  %v2547_v40 = vpop.permute.xlu1 %2546 }
 0x341   : > { %v2579_v11 = vsel %vm985_vm6, %v2553_v22, %v2569_v3  ;;  %v2587_v32 = vsel %vm985_vm6, %v2569_v3, %v2553_v22  ;;  %v2543_v15 = vpop.permute.xlu2 %2542 }
 0x342   : > { %v2602_v4 = vmul.f32 %v6130_v41, %v2579_v11  ;;  %v2603_v9 = vmul.f32 %v6135_v45, %v2587_v32  ;;  %3935 = vmatmul.msk.bf16.gmra.mxu0 %vm1313_vm8, %v4043_v39 }
 0x343   : > { %3939 = vmatmul.msk.bf16.gmra.mxu1 %vm1313_vm8, %v4043_v39 }
 0x344   : > { %v2612_v14 = vpack.c.bf16 %v2602_v4, %v2600_v62  ;;  %v2613_v26 = vpack.c.bf16 %v2603_v9, %v2601_v0 }
 0x346   : > { %v1792_v54 = vpop.f32.mrf.mxu2  ;;  %2662 = vmatpush.bf16.msra.mxu0 %v2612_v14  ;;  %2691 = vmatpush.bf16.msra.mxu1 %v2613_v26  ;;  %v1821_v37 = vpop.f32.mrf.mxu3 }
 0x347   : > { %v1840_v22 = vadd.f32 %v1792_v54, %v6110_v38  ;;  %v6212_v3 = vpop.f32.mrf.mxu0  ;;  %v1841_v21 = vadd.f32 %v1821_v37, %v6113_v7  ;;  %v6215_v11 = vpop.f32.mrf.mxu1 }
 0x348   : > { %v2563_v32 = vpop.permute.xlu0 %2562  ;;  %v2565_v0 = vpop.permute.xlu1 %2564 }
 0x349   : > { %v2576_v39 = vsel %vm985_vm6, %v2547_v40, %v2563_v32  ;;  %v2584_v62 = vsel %vm985_vm6, %v2563_v32, %v2547_v40  ;;  %3957 = vmatmul.msk.bf16.gmra.mxu2 %vm1313_vm8, %v4045_v24  ;;  %3961 = vmatmul.msk.bf16.gmra.mxu3 %vm1313_vm8, %v4045_v24  ;;  %v2577_v7 = vsel %vm985_vm6, %v2549_v1, %v2565_v0  ;;  %v2561_v37 = vpop.permute.xlu2 %2560 }
 0x34a   : > { %v2596_v54 = vmul.f32 %v6130_v41, %v2576_v39  ;;  %v2597_v38 = vmul.f32 %v6135_v45, %v2584_v62  ;;  %v2585_v4 = vsel %vm985_vm6, %v2565_v0, %v2549_v1  ;;  %v2598_v9 = vmul.f32 %v6130_v41, %v2577_v7 }
 0x34b   : > { %v2599_v14 = vmul.f32 %v6135_v45, %v2585_v4 }
 0x34c   : > { %v2610_v40 = vpack.c.bf16 %v2598_v9, %v2596_v54 }
 0x34d   : > { %v2611_v26 = vpack.c.bf16 %v2599_v14, %v2597_v38 }
 0x34e   : > { %v6231_v32 = vpop.f32.mrf.mxu2  ;;  %v6233_v24 = vpop.f32.mrf.mxu3  ;;  %2663 = vmatpush.bf16.msra.mxu0 %v2610_v40  ;;  %v4046_v40 = vld [vmem:[#allocation3 + $0xf0] sm:$0xff] }
 0x34f   : > { %v1910_v39 = vpop.f32.mrf.mxu0  ;;  %2692 = vmatpush.bf16.msra.mxu1 %v2611_v26 }
 0x350   : > { %v6235_v62 = vadd.f32 %v1910_v39, %v1836_v50  ;;  %v1939_v17 = vpop.f32.mrf.mxu1  ;;  %v2545_v8 = vpop.permute.xlu0 %2544 }
 0x351   : > { %v6237_v18 = vadd.f32 %v1939_v17, %v1837_v51  ;;  %v2575_v1 = vsel %vm985_vm6, %v2545_v8, %v2561_v37  ;;  %v2583_v0 = vsel %vm985_vm6, %v2561_v37, %v2545_v8  ;;  %v2559_v54 = vpop.permute.xlu1 %2558  ;;  %v4048_v8 = vld [vmem:[#allocation3 + $0x100] sm:$0xff] }
 0x352   : > { %v2594_v38 = vmul.f32 %v6130_v41, %v2575_v1  ;;  %v2595_v7 = vmul.f32 %v6135_v45, %v2583_v0  ;;  %v2574_v4 = vsel %vm985_vm6, %v2543_v15, %v2559_v54  ;;  %v2582_v50 = vsel %vm985_vm6, %v2559_v54, %v2543_v15 }
 0x353   : > { %v2592_v17 = vmul.f32 %v6130_v41, %v2574_v4  ;;  %v2593_v51 = vmul.f32 %v6135_v45, %v2582_v50  ;;  %v4049_v4 = vld [vmem:[#allocation3 + $0x108] sm:$0xff] }
 0x355   : > { %v2608_v9 = vpack.c.bf16 %v2594_v38, %v2592_v17  ;;  %v2609_v14 = vpack.c.bf16 %v2595_v7, %v2593_v51  ;;  %v4047_v7 = vld [vmem:[#allocation3 + $0xf8] sm:$0xff] }
 0x356   : > { %v1797_v26 = vpop.f32.mrf.mxu2 }
 0x357   : > { %v1844_v37 = vadd.f32 %v1797_v26, %v6160_v48  ;;  %v1826_v39 = vpop.f32.mrf.mxu3  ;;  %v6252_v1 = vpop.f32.mrf.mxu0  ;;  %2664 = vmatpush.bf16.msra.mxu0 %v2608_v9  ;;  %2693 = vmatpush.bf16.msra.mxu1 %v2609_v14 }
 0x358   : > { %v1845_v0 = vadd.f32 %v1826_v39, %v6163_v61  ;;  %v6255_v20 = vpop.f32.mrf.mxu1 }
 0x359   : > { %3958 = vmatmul.msk.bf16.gmra.mxu2 %vm1313_vm8, %v4046_v40  ;;  %3962 = vmatmul.msk.bf16.gmra.mxu3 %vm1313_vm8, %v4046_v40 }
 0x35a   : > { %3980 = vmatmul.msk.bf16.vlgmr.msra.gmra.mxu0 %vm1313_vm8, %v4048_v8  ;;  %3984 = vmatmul.msk.bf16.vlgmr.msra.gmra.mxu1 %vm1313_vm8, %v4048_v8 }
 0x35e   : > { %v6261_v41 = vpop.f32.mrf.mxu2 }
 0x35f   : > { %v6263_v45 = vpop.f32.mrf.mxu3  ;;  %v1915_v48 = vpop.f32.mrf.mxu0 }
 0x360   : > { %v1963_v15 = vadd.f32 %v1915_v48, %v1840_v22  ;;  %v1944_v54 = vpop.f32.mrf.mxu1  ;;  %v4050_v48 = vld [vmem:[#allocation3 + $0x110] sm:$0xff] }
 0x361   : > { %v1964_v38 = vadd.f32 %v1944_v54, %v1841_v21 }
 0x366   : > { %v1802_v61 = vpop.f32.mrf.mxu2 }
 0x367   : > { %v1848_v50 = vadd.f32 %v1802_v61, %v6196_v25  ;;  %v1831_v17 = vpop.f32.mrf.mxu3  ;;  %v6266_v51 = vpop.f32.mrf.mxu0 }
 0x368   : > { %v1849_v9 = vadd.f32 %v1831_v17, %v6199_v27  ;;  %v6269_v14 = vpop.f32.mrf.mxu1 }
 0x369   : > { %3959 = vmatmul.msk.bf16.gmra.mxu2 %vm1313_vm8, %v4047_v7  ;;  %3963 = vmatmul.msk.bf16.gmra.mxu3 %vm1313_vm8, %v4047_v7 }
 0x36a   : > { %3981 = vmatmul.msk.bf16.gmra.mxu0 %vm1313_vm8, %v4049_v4  ;;  %3985 = vmatmul.msk.bf16.gmra.mxu1 %vm1313_vm8, %v4049_v4 }
 0x36e   : > { %v1804_v22 = vpop.f32.mrf.mxu2 }
 0x36f   : > { %v1833_v21 = vpop.f32.mrf.mxu3  ;;  %v1920_v40 = vpop.f32.mrf.mxu0 }
 0x370   : > { %v1967_v26 = vadd.f32 %v1920_v40, %v1844_v37  ;;  %v1949_v25 = vpop.f32.mrf.mxu1 }
 0x371   : > { %v1968_v8 = vadd.f32 %v1949_v25, %v1845_v0  ;;  %v1443_v0 = vadd.f32 %v6155_v47, %v6037_v35  ;;  %v1472_v25 = vadd.f32 %v6157_v31, %v6039_v10 }
 0x373   : > { %v1661_v46 = vadd.f32 %v6212_v3, %v1443_v0  ;;  %v1662_v34 = vadd.f32 %v6215_v11, %v1472_v25  ;;  %v1438_v11 = vadd.f32 %v6088_v30, %v5991_v2 }
 0x375   : > { %v1851_v49 = vadd.f32 %v1833_v21, %v1662_v34 }
 0x376   : > { %v6275_v39 = vpop.f32.mrf.mxu2 }
 0x377   : > { %v6277_v27 = vpop.f32.mrf.mxu3  ;;  %v1922_v54 = vpop.f32.mrf.mxu0 }
 0x378   : > { %v1951_v61 = vpop.f32.mrf.mxu1 }
 0x37a   : > { %3982 = vmatmul.msk.bf16.gmra.mxu0 %vm1313_vm8, %v4050_v48  ;;  %3986 = vmatmul.msk.bf16.gmra.mxu1 %vm1313_vm8, %v4050_v48  ;;  %v1850_v48 = vadd.f32 %v1804_v22, %v1661_v46  ;;  %v1457_v46 = vadd.f32 %v5980_v5, %v5869_v55  ;;  %v1467_v55 = vadd.f32 %v6091_v33, %v5993_v52 }
 0x37b   : > { %v1462_v52 = vadd.f32 %v6026_v53, %v5927_v43 }
 0x37c   : > { %v1650_v34 = vadd.f32 %v6095_v63, %v1457_v46  ;;  %v1657_v63 = vadd.f32 %v6181_v23, %v1438_v11 }
 0x37e   : > { %v6281_v7 = vpop.f32.mrf.mxu2  ;;  %v1839_v31 = vadd.f32 %v6189_v12, %v1650_v34  ;;  %v1846_v12 = vadd.f32 %v6261_v41, %v1657_v63 }
 0x37f   : > { %7567 = vst [vmem:[#allocation64_spill] sm:$0xff] %v6281_v7  ;;  %v2130_v4 = vpop.f32.mrf.mxu3  ;;  %v1925_v17 = vpop.f32.mrf.mxu0 }
 0x380   : > { %v6283_v42 = vadd.f32 %v1925_v17, %v1848_v50  ;;  %v1954_v37 = vpop.f32.mrf.mxu1  ;;  %v1969_v30 = vadd.f32 %v1922_v54, %v1846_v12 }
 0x381   : > { %v6285_v40 = vadd.f32 %v1954_v37, %v1849_v9 }
 0x386   : > { %v2104_v57 = vpop.f32.mrf.mxu2 }
 0x387   : > { %v2152_v58 = vadd.f32 %v2104_v57, %v1963_v15  ;;  %v2133_v50 = vpop.f32.mrf.mxu3  ;;  %v1927_v17 = vpop.f32.mrf.mxu0 }
 0x388   : > { %v2153_v16 = vadd.f32 %v2133_v50, %v1964_v38  ;;  %v6293_v9 = vadd.f32 %v1927_v17, %v1850_v48  ;;  %v1956_v37 = vpop.f32.mrf.mxu1 }
 0x389   : > { %v6295_v7 = vadd.f32 %v1956_v37, %v1851_v49  ;;  %v1962_v49 = vadd.f32 %v6255_v20, %v1839_v31  ;;  %v1658_v20 = vadd.f32 %v6183_v19, %v1467_v55 }
 0x38a   : > { %3983 = vmatmul.msk.bf16.gmra.mxu0 %vm1313_vm8, %v4051_v56  ;;  %3987 = vmatmul.msk.bf16.gmra.mxu1 %vm1313_vm8, %v4051_v56 }
 0x38b   : > { %v2151_v56 = vadd.f32 %v2130_v4, %v1962_v49  ;;  %v1847_v2 = vadd.f32 %v6263_v45, %v1658_v20  ;;  %v1654_v45 = vadd.f32 %v6139_v60, %v1462_v52 }
 0x38d   : > { %v1970_v4 = vadd.f32 %v1951_v61, %v1847_v2  ;;  %v1428_v2 = vadd.f32 %v5978_v29, %v5867_v44 }
 0x38e   : > { %v2106_v35 = vpop.f32.mrf.mxu2 }
 0x38f   : > { %v2135_v10 = vpop.f32.mrf.mxu3  ;;  %v6301_v47 = vpop.f32.mrf.mxu0 }
 0x390   : > { %v6303_v57 = vpop.f32.mrf.mxu1 }
 0x396   : > { %v2109_v3 = vpop.f32.mrf.mxu2 }
 0x397   : > { %v2156_v15 = vadd.f32 %v2109_v3, %v1967_v26  ;;  %v2138_v38 = vpop.f32.mrf.mxu3  ;;  %v6310_v22 = vpop.f32.mrf.mxu0  ;;  %v1433_v26 = vadd.f32 %v6024_v59, %v5925_v6  ;;  %v1843_v59 = vadd.f32 %v6233_v24, %v1654_v45 }
 0x398   : > { %v2157_v5 = vadd.f32 %v2138_v38, %v1968_v8  ;;  %v2319_v21 = vpop.f32.mrf.mxu1  ;;  %v2734_v45 = vpop.permute.xlu0 %2733 }
 0x399   : > { %v6315_v0 = vadd.f32 %v2319_v21, %v2151_v56  ;;  %v1653_v48 = vadd.f32 %v6137_v28, %v1433_v26  ;;  %v1966_v43 = vadd.f32 %v6269_v14, %v1843_v59  ;;  %v2149_v26 = vadd.f32 %v6277_v27, %v6237_v18  ;;  %v7568_v18 = vld [vmem:[#allocation64_spill] sm:$0xff] }
 0x39b   : > { %v1842_v6 = vadd.f32 %v6231_v32, %v1653_v48  ;;  %v2155_v37 = vadd.f32 %v2135_v10, %v1966_v43  ;;  %v2338_v52 = vadd.f32 %v6303_v57, %v2149_v26 }
 0x39d   : > { %v1965_v61 = vadd.f32 %v6266_v51, %v1842_v6 }
 0x39e   : > { %v2111_v25 = vpop.f32.mrf.mxu2 }
 0x39f   : > { %v2158_v33 = vadd.f32 %v2111_v25, %v1969_v30  ;;  %v2140_v8 = vpop.f32.mrf.mxu3  ;;  %v2293_v23 = vpop.f32.mrf.mxu0  ;;  %v2154_v53 = vadd.f32 %v2106_v35, %v1965_v61  ;;  %v2148_v30 = vadd.f32 %v6275_v39, %v6235_v62 }
 0x3a0   : > { %v2159_v50 = vadd.f32 %v2140_v8, %v1970_v4  ;;  %v6325_v19 = vadd.f32 %v2293_v23, %v2152_v58  ;;  %v2322_v41 = vpop.f32.mrf.mxu1  ;;  %v1649_v4 = vadd.f32 %v6093_v13, %v1428_v2 }
 0x3a1   : > { %v6328_v54 = vadd.f32 %v2322_v41, %v2153_v16  ;;  %v2337_v25 = vadd.f32 %v6301_v47, %v2148_v30 }
 0x3a6   : > { %v2114_v17 = vpop.f32.mrf.mxu2 }
 0x3a7   : > { %v2160_v28 = vadd.f32 %v2114_v17, %v6283_v42  ;;  %v2143_v58 = vpop.f32.mrf.mxu3  ;;  %v2295_v46 = vpop.f32.mrf.mxu0 }
 0x3a8   : > { %v2161_v34 = vadd.f32 %v2143_v58, %v6285_v40  ;;  %v6336_v60 = vadd.f32 %v2295_v46, %v2154_v53  ;;  %v2324_v16 = vpop.f32.mrf.mxu1  ;;  %v2739_v53 = vpop.permute.xlu1 %2738 }
 0x3a9   : > { %v6338_v31 = vadd.f32 %v2324_v16, %v2155_v37 }
 0x3ae   : > { %v6348_v3 = vpop.f32.mrf.mxu2 }
 0x3af   : > { %v2298_v32 = vpop.f32.mrf.mxu0  ;;  %v6350_v40 = vpop.f32.mrf.mxu3 }
 0x3b0   : > { %v6340_v24 = vadd.f32 %v2298_v32, %v2156_v15  ;;  %v2327_v51 = vpop.f32.mrf.mxu1 }
 0x3b1   : > { %v6342_v49 = vadd.f32 %v2327_v51, %v2157_v5 }
 0x3b7   : > { %v2300_v14 = vpop.f32.mrf.mxu0 }
 0x3b8   : > { %v6344_v35 = vadd.f32 %v2300_v14, %v2158_v33  ;;  %v2329_v10 = vpop.f32.mrf.mxu1  ;;  %v1838_v33 = vadd.f32 %v6187_v36, %v1649_v4 }
 0x3b9   : > { %v6346_v42 = vadd.f32 %v2329_v10, %v2159_v50 }
 0x3ba   : > { %v1961_v44 = vadd.f32 %v6252_v1, %v1838_v33 }
 0x3bc   : > { %v2477_v15 = vpop.f32.mrf.mxu2  ;;  %v2506_v21 = vpop.f32.mrf.mxu3  ;;  %v2150_v27 = vadd.f32 %v7568_v18, %v1961_v44 }
 0x3bd   : > { %v2526_v8 = vadd.f32 %v2477_v15, %v2337_v25  ;;  %v2527_v23 = vadd.f32 %v2506_v21, %v2338_v52  ;;  %v2744_v21 = vpop.permute.xlu2 %2743  ;;  %v2749_v25 = vpop.permute.xlu0 %2748 }
 0x3be   : > { %v2339_v47 = vadd.f32 %v6310_v22, %v2150_v27 }
 0x3bf   : > { %v2303_v11 = vpop.f32.mrf.mxu0 }
 0x3c0   : > { %v6352_v56 = vadd.f32 %v2303_v11, %v2160_v28  ;;  %v2332_v38 = vpop.f32.mrf.mxu1 }
 0x3c1   : > { %v6354_v55 = vadd.f32 %v2332_v38, %v2161_v34 }
 0x3c4   : > { %v2479_v5 = vpop.f32.mrf.mxu2  ;;  %v2508_v63 = vpop.f32.mrf.mxu3 }
 0x3c5   : > { %v2528_v59 = vadd.f32 %v2479_v5, %v2339_v47  ;;  %v2529_v22 = vadd.f32 %v2508_v63, %v6315_v0 }
 0x3c7   : > { %v6356_v20 = vpop.f32.mrf.mxu0 }
 0x3c8   : > { %v6358_v12 = vpop.f32.mrf.mxu1 }
 0x3cc   : > { %v2482_v29 = vpop.f32.mrf.mxu2  ;;  %v2511_v41 = vpop.f32.mrf.mxu3 }
 0x3cd   : > { %v2530_v0 = vadd.f32 %v2482_v29, %v6325_v19  ;;  %v2531_v51 = vadd.f32 %v2511_v41, %v6328_v54 }
 0x3d4   : > { %v2484_v17 = vpop.f32.mrf.mxu2  ;;  %v2513_v37 = vpop.f32.mrf.mxu3 }
 0x3d5   : > { %v2532_v2 = vadd.f32 %v2484_v17, %v6336_v60  ;;  %v2163_v17 = vadd.f32 %v6350_v40, %v6295_v7 }
 0x3d7   : > { %v2666_v48 = vpop.f32.mrf.mxu0  ;;  %v2695_v50 = vpop.f32.mrf.mxu1 }
 0x3d8   : > { %v2715_v62 = vadd.f32 %v2666_v48, %v2526_v8  ;;  %v2716_v39 = vadd.f32 %v2695_v50, %v2527_v23  ;;  %v2533_v48 = vadd.f32 %v2513_v37, %v6338_v31 }
 0x3da   : > { %v2771_v13 = vadd.f32 %v2734_v45, %v2715_v62  ;;  %v2772_v6 = vadd.f32 %v2734_v45, %v2716_v39  ;;  %v2754_v62 = vpop.permute.xlu1 %2753 }
 0x3dc   : > { %v6373_v57 = vmax.f32 %v2771_v13, 0.0  ;;  %v6375_v36 = vmax.f32 %v2772_v6, 0.0  ;;  %v2487_v14 = vpop.f32.mrf.mxu2  ;;  %v2516_v10 = vpop.f32.mrf.mxu3 }
 0x3dd   : > { %v2534_v50 = vadd.f32 %v2487_v14, %v6340_v24  ;;  %v2535_v13 = vadd.f32 %v2516_v10, %v6342_v49  ;;  %v2162_v49 = vadd.f32 %v6348_v3, %v6293_v9  ;;  %v2764_v14 = vpop.permute.xlu0 %2763 }
 0x3de   : > { %2819 = vrot.lane.b32.xlu1 %v6375_v36, %s4172_s23  ;;  %2876 = vrot.lane.b32.xlu0 %v6373_v57, %s4173_s7 }
 0x3df   : > { %2803 = vrot.lane.b32.xlu2 %v6373_v57, %s4172_s23  ;;  %v2668_v1 = vpop.f32.mrf.mxu0  ;;  %v2697_v61 = vpop.f32.mrf.mxu1 }
 0x3e0   : > { %v2717_v43 = vadd.f32 %v2668_v1, %v2528_v59  ;;  %v2718_v46 = vadd.f32 %v2697_v61, %v2529_v22 }
 0x3e2   : > { %v2773_v28 = vadd.f32 %v2739_v53, %v2717_v43  ;;  %v2774_v32 = vadd.f32 %v2739_v53, %v2718_v46  ;;  %v2351_v46 = vadd.f32 %v6356_v20, %v2162_v49 }
 0x3e4   : > { %v6384_v58 = vmax.f32 %v2773_v28, 0.0  ;;  %v6394_v11 = vmax.f32 %v2774_v32, 0.0  ;;  %v2489_v52 = vpop.f32.mrf.mxu2  ;;  %v2518_v33 = vpop.f32.mrf.mxu3 }
 0x3e5   : > { %v2536_v53 = vadd.f32 %v2489_v52, %v6344_v35  ;;  %v2537_v22 = vadd.f32 %v2518_v33, %v6346_v42  ;;  %v2759_v42 = vpop.permute.xlu2 %2758 }
 0x3e6   : > { %3008 = vrot.lane.b32.xlu1 %v6373_v57, %s4175_s17  ;;  %2805 = vrot.lane.b32.xlu0 %v6384_v58, %s4172_s23 }
 0x3e7   : > { %2892 = vrot.lane.b32.xlu2 %v6375_v36, %s4173_s7  ;;  %v2671_v34 = vpop.f32.mrf.mxu0  ;;  %v2700_v16 = vpop.f32.mrf.mxu1 }
 0x3e8   : > { %v2719_v38 = vadd.f32 %v2671_v34, %v2530_v0  ;;  %v2720_v15 = vadd.f32 %v2700_v16, %v2531_v51  ;;  %v2352_v51 = vadd.f32 %v6358_v12, %v2163_v17 }
 0x3ea   : > { %v2775_v63 = vadd.f32 %v2744_v21, %v2719_v38  ;;  %v2776_v54 = vadd.f32 %v2744_v21, %v2720_v15 }
 0x3ec   : > { %v6403_v30 = vmax.f32 %v2775_v63, 0.0  ;;  %v6405_v26 = vmax.f32 %v2776_v54, 0.0  ;;  %v2492_v27 = vpop.f32.mrf.mxu2  ;;  %v2521_v24 = vpop.f32.mrf.mxu3 }
 0x3ed   : > { %v2538_v37 = vadd.f32 %v2492_v27, %v6352_v56  ;;  %v2539_v28 = vadd.f32 %v2521_v24, %v6354_v55 }
 0x3ee   : > { %2878 = vrot.lane.b32.xlu1 %v6384_v58, %s4173_s7  ;;  %2894 = vrot.lane.b32.xlu0 %v6394_v11, %s4173_s7  ;;  %7569 = vst [vmem:[#allocation23_spill] sm:$0xff] %v6405_v26 }
 0x3ef   : > { %2821 = vrot.lane.b32.xlu2 %v6394_v11, %s4172_s23  ;;  %v2673_v5 = vpop.f32.mrf.mxu0  ;;  %v2702_v19 = vpop.f32.mrf.mxu1 }
 0x3f0   : > { %v2721_v4 = vadd.f32 %v2673_v5, %v2532_v2  ;;  %v2722_v29 = vadd.f32 %v2702_v19, %v2533_v48  ;;  %v2769_v5 = vpop.permute.xlu1 %2768 }
 0x3f2   : > { %v2777_v60 = vadd.f32 %v2749_v25, %v2721_v4  ;;  %v2778_v18 = vadd.f32 %v2749_v25, %v2722_v29 }
 0x3f4   : > { %v6415_v44 = vmax.f32 %v2777_v60, 0.0  ;;  %v6424_v6 = vmax.f32 %v2778_v18, 0.0  ;;  %v2494_v34 = vpop.f32.mrf.mxu2  ;;  %v2523_v16 = vpop.f32.mrf.mxu3 }
 0x3f5   : > { %v2540_v10 = vadd.f32 %v2494_v34, %v2351_v46  ;;  %v2541_v7 = vadd.f32 %v2523_v16, %v2352_v51  ;;  %v7574_v34 = vld [vmem:[#allocation6_spill] sm:$0xff] }
 0x3f6   : > { %2823 = vrot.lane.b32.xlu0 %v6405_v26, %s4172_s23  ;;  %2807 = vrot.lane.b32.xlu1 %v6403_v30, %s4172_s23  ;;  %v3221_v29 = vpack.c.bf16 %v6424_v6, %v6405_v26 }
 0x3f7   : > { %3010 = vrot.lane.b32.xlu2 %v6384_v58, %s4175_s17  ;;  %v2676_v8 = vpop.f32.mrf.mxu0  ;;  %v2705_v23 = vpop.f32.mrf.mxu1 }
 0x3f8   : > { %v2723_v41 = vadd.f32 %v2676_v8, %v2534_v50  ;;  %v2724_v59 = vadd.f32 %v2705_v23, %v2535_v13  ;;  %v3220_v50 = vpack.c.bf16 %v6415_v44, %v6403_v30 }
 0x3fa   : > { %v2779_v31 = vadd.f32 %v2754_v62, %v2723_v41  ;;  %v2780_v43 = vadd.f32 %v2754_v62, %v2724_v59  ;;  %v3218_v41 = vpack.c.bf16 %v6384_v58, %v6373_v57  ;;  %v3219_v62 = vpack.c.bf16 %v6394_v11, %v6375_v36 }
 0x3fc   : > { %v6426_v47 = vmax.f32 %v2779_v31, 0.0  ;;  %v6444_v9 = vmax.f32 %v2780_v43, 0.0 }
 0x3fe   : > { %2896 = vrot.lane.b32.xlu1 %v6405_v26, %s4173_s7  ;;  %2882 = vrot.lane.b32.xlu0 %v6415_v44, %s4173_s7 }
 0x3ff   : > { %2880 = vrot.lane.b32.xlu2 %v6403_v30, %s4173_s7  ;;  %v2678_v39 = vpop.f32.mrf.mxu0  ;;  %v2707_v45 = vpop.f32.mrf.mxu1 }
 0x400   : > { %v2725_v32 = vadd.f32 %v2678_v39, %v2536_v53  ;;  %v2726_v0 = vadd.f32 %v2707_v45, %v2537_v22 }
 0x402   : > { %v2781_v40 = vadd.f32 %v2759_v42, %v2725_v32  ;;  %v2782_v56 = vadd.f32 %v2759_v42, %v2726_v0 }
 0x404   : > { %v6452_v54 = vmax.f32 %v2781_v40, 0.0  ;;  %v6454_v2 = vmax.f32 %v2782_v56, 0.0  ;;  %v7575_v40 = vld [vmem:[#allocation31_spill] sm:$0xff] }
 0x406   : > { %2825 = vrot.lane.b32.xlu1 %v6424_v6, %s4172_s23  ;;  %2811 = vrot.lane.b32.xlu0 %v6426_v47, %s4172_s23  ;;  %v3222_v60 = vpack.c.bf16 %v6452_v54, %v6426_v47  ;;  %v3223_v48 = vpack.c.bf16 %v6454_v2, %v6444_v9 }
 0x407   : > { %2809 = vrot.lane.b32.xlu2 %v6415_v44, %s4172_s23  ;;  %v2681_v1 = vpop.f32.mrf.mxu0  ;;  %v2710_v61 = vpop.f32.mrf.mxu1 }
 0x408   : > { %v2727_v35 = vadd.f32 %v2681_v1, %v2538_v37  ;;  %v2728_v3 = vadd.f32 %v2710_v61, %v2539_v28  ;;  %v7573_v28 = vld [vmem:[#allocation47_spill] sm:$0xff] }
 0x40a   : > { %v2783_v12 = vadd.f32 %v2764_v14, %v2727_v35  ;;  %v2784_v38 = vadd.f32 %v2764_v14, %v2728_v3 }
 0x40c   : > { %v6456_v4 = vmax.f32 %v2783_v12, 0.0  ;;  %v6458_v25 = vmax.f32 %v2784_v38, 0.0 }
 0x40e   : > { %2884 = vrot.lane.b32.xlu1 %v6426_v47, %s4173_s7  ;;  %2900 = vrot.lane.b32.xlu0 %v6444_v9, %s4173_s7 }
 0x40f   : > { %2898 = vrot.lane.b32.xlu2 %v6424_v6, %s4173_s7  ;;  %v2683_v55 = vpop.f32.mrf.mxu0  ;;  %v2712_v20 = vpop.f32.mrf.mxu1 }
 0x410   : > { %v2729_v15 = vadd.f32 %v2683_v55, %v2540_v10  ;;  %v2730_v21 = vadd.f32 %v2712_v20, %v2541_v7  ;;  %v7576_v55 = vld [vmem:[#allocation25_spill] sm:$0xff] }
 0x412   : > { %v2785_v19 = vadd.f32 %v2769_v5, %v2729_v15  ;;  %v2786_v63 = vadd.f32 %v2769_v5, %v2730_v21 }
 0x414   : > { %v6460_v52 = vmax.f32 %v2785_v19, 0.0  ;;  %v6462_v33 = vmax.f32 %v2786_v63, 0.0 }
 0x416   : > { %2829 = vrot.lane.b32.xlu0 %v6454_v2, %s4172_s23  ;;  %2813 = vrot.lane.b32.xlu1 %v6452_v54, %s4172_s23  ;;  %v3224_v8 = vpack.c.bf16 %v6460_v52, %v6456_v4  ;;  %v3225_v23 = vpack.c.bf16 %v6462_v33, %v6458_v25 }
 0x417   : > { %2827 = vrot.lane.b32.xlu2 %v6444_v9, %s4172_s23 }
 0x418   : > { %3235 = vmatpush.bf16.msrb.mxu0 %v3224_v8  ;;  %3248 = vmatpush.bf16.msrb.mxu1 %v3225_v23 }
 0x41c   : > { %3236 = vmatpush.bf16.msrb.mxu0 %v3222_v60  ;;  %3249 = vmatpush.bf16.msrb.mxu1 %v3223_v48 }
 0x41e   : > { %2902 = vrot.lane.b32.xlu1 %v6454_v2, %s4173_s7  ;;  %2888 = vrot.lane.b32.xlu0 %v6456_v4, %s4173_s7 }
 0x41f   : > { %2886 = vrot.lane.b32.xlu2 %v6452_v54, %s4173_s7 }
 0x420   : > { %3237 = vmatpush.bf16.msrb.mxu0 %v3220_v50  ;;  %3250 = vmatpush.bf16.msrb.mxu1 %v3221_v29 }
 0x424   : > { %3238 = vmatpush.bf16.msrb.mxu0 %v3218_v41  ;;  %3251 = vmatpush.bf16.msrb.mxu1 %v3219_v62 }
 0x426   : > { %2831 = vrot.lane.b32.xlu1 %v6458_v25, %s4172_s23  ;;  %2817 = vrot.lane.b32.xlu0 %v6460_v52, %s4172_s23 }
 0x427   : > { %2815 = vrot.lane.b32.xlu2 %v6456_v4, %s4172_s23 }
 0x42e   : > { %2890 = vrot.lane.b32.xlu1 %v6460_v52, %s4173_s7  ;;  %2906 = vrot.lane.b32.xlu0 %v6462_v33, %s4173_s7 }
 0x42f   : > { %2904 = vrot.lane.b32.xlu2 %v6458_v25, %s4173_s7 }
 0x436   : > { %3014 = vrot.lane.b32.xlu1 %v6415_v44, %s4175_s17  ;;  %3012 = vrot.lane.b32.xlu0 %v6403_v30, %s4175_s17 }
 0x437   : > { %2833 = vrot.lane.b32.xlu2 %v6462_v33, %s4172_s23 }
 0x439   : > { %v2804_v39 = vpop.permute.xlu2 %2803 }
 0x43e   : > { %3020 = vrot.lane.b32.xlu1 %v6456_v4, %s4175_s17  ;;  %3018 = vrot.lane.b32.xlu0 %v6452_v54, %s4175_s17 }
 0x43f   : > { %3016 = vrot.lane.b32.xlu2 %v6426_v47, %s4175_s17 }
 0x441   : > { %v2893_v45 = vpop.permute.xlu2 %2892 }
 0x446   : > { %3026 = vrot.lane.b32.xlu1 %v6394_v11, %s4175_s17  ;;  %3024 = vrot.lane.b32.xlu0 %v6375_v36, %s4175_s17 }
 0x447   : > { %3022 = vrot.lane.b32.xlu2 %v6460_v52, %s4175_s17 }
 0x449   : > { %v2822_v18 = vpop.permute.xlu2 %2821 }
 0x44e   : > { %3032 = vrot.lane.b32.xlu1 %v6444_v9, %s4175_s17  ;;  %3030 = vrot.lane.b32.xlu0 %v6424_v6, %s4175_s17 }
 0x44f   : > { %3028 = vrot.lane.b32.xlu2 %v6405_v26, %s4175_s17 }
 0x450   : > { %v2820_v31 = vpop.permute.xlu1 %2819  ;;  %v2877_v27 = vpop.permute.xlu0 %2876 }
 0x451   : > { %v2835_v13 = vsel %vm362_vm0, %v2804_v39, %v2820_v31  ;;  %v2843_v59 = vsel %vm362_vm0, %v2820_v31, %v2804_v39  ;;  %v2908_v1 = vsel %vm445_vm1, %v2877_v27, %v2893_v45  ;;  %v2916_v61 = vsel %vm445_vm1, %v2893_v45, %v2877_v27  ;;  %v6536_v43 = vpop.permute.xlu2 %3010 }
 0x452   : > { %7571 = vst [vmem:[#allocation15_spill] sm:$0xff] %v6536_v43  ;;  %v6553_v46 = vmul.f32 %v2843_v59, %v7573_v28  ;;  %v6556_v16 = vmul.f32 %v2835_v13, %v7574_v34  ;;  %v6579_v56 = vmul.f32 %v2916_v61, %v7575_v40  ;;  %v6582_v20 = vmul.f32 %v2908_v1, %v7576_v55 }
 0x456   : > { %3038 = vrot.lane.b32.xlu1 %v6462_v33, %s4175_s17  ;;  %3036 = vrot.lane.b32.xlu0 %v6458_v25, %s4175_s17 }
 0x457   : > { %3034 = vrot.lane.b32.xlu2 %v6454_v2, %s4175_s17 }
 0x458   : > { %v6544_v49 = vpop.permute.xlu1 %3008  ;;  %v2806_v53 = vpop.permute.xlu0 %2805 }
 0x459   : > { %7572 = vst [vmem:[#allocation17_spill] sm:$0xff] %v6544_v49  ;;  %v2836_v22 = vsel %vm362_vm0, %v2806_v53, %v2822_v18  ;;  %v2844_v17 = vsel %vm362_vm0, %v2822_v18, %v2806_v53  ;;  %v6550_v37 = vpop.permute.xlu2 %2880 }
 0x45a   : > { %v6559_v32 = vmul.f32 %v2844_v17, %v7573_v28  ;;  %v6562_v0 = vmul.f32 %v2836_v22, %v7574_v34 }
 0x45e   : > { %3117 = vrot.lane.b32.xlu1 %v6403_v30, %s4176_s18  ;;  %3115 = vrot.lane.b32.xlu0 %v6384_v58, %s4176_s18 }
 0x45f   : > { %3113 = vrot.lane.b32.xlu2 %v6373_v57, %s4176_s18 }
 0x460   : > { %v2879_v3 = vpop.permute.xlu1 %2878  ;;  %v2895_v42 = vpop.permute.xlu0 %2894 }
 0x461   : > { %v2909_v14 = vsel %vm445_vm1, %v2879_v3, %v2895_v42  ;;  %v2917_v10 = vsel %vm445_vm1, %v2895_v42, %v2879_v3  ;;  %v2810_v7 = vpop.permute.xlu2 %2809 }
 0x462   : > { %v6585_v12 = vmul.f32 %v2917_v10, %v7575_v40  ;;  %v6588_v38 = vmul.f32 %v2909_v14, %v7576_v55 }
 0x466   : > { %3125 = vrot.lane.b32.xlu1 %v6456_v4, %s4176_s18  ;;  %3121 = vrot.lane.b32.xlu0 %v6426_v47, %s4176_s18 }
 0x467   : > { %3119 = vrot.lane.b32.xlu2 %v6415_v44, %s4176_s18 }
 0x468   : > { %v2824_v5 = vpop.permute.xlu0 %2823  ;;  %v2808_v19 = vpop.permute.xlu1 %2807 }
 0x469   : > { %v2837_v63 = vsel %vm362_vm0, %v2808_v19, %v2824_v5  ;;  %v2845_v8 = vsel %vm362_vm0, %v2824_v5, %v2808_v19  ;;  %v6604_v23 = vpop.permute.xlu2 %2898 }
 0x46a   : > { %v6631_v18 = vmul.f32 %v2845_v8, %v7573_v28  ;;  %v6634_v31 = vmul.f32 %v2837_v63, %v7574_v34 }
 0x46e   : > { %3143 = vrot.lane.b32.xlu1 %v6462_v33, %s4176_s18  ;;  %3141 = vrot.lane.b32.xlu0 %v6458_v25, %s4176_s18 }
 0x46f   : > { %3127 = vrot.lane.b32.xlu2 %v6460_v52, %s4176_s18 }
 0x470   : > { %v6612_v60 = vpop.permute.xlu1 %2896  ;;  %v6614_v48 = vpop.permute.xlu0 %2882 }
 0x471   : > { %v6616_v50 = vpop.permute.xlu2 %2827 }
 0x476   : > { %3139 = vrot.lane.b32.xlu1 %v6454_v2, %s4176_s18  ;;  %3137 = vrot.lane.b32.xlu0 %v6444_v9, %s4176_s18 }
 0x477   : > { %3123 = vrot.lane.b32.xlu2 %v6452_v54, %s4176_s18 }
 0x478   : > { %v2826_v29 = vpop.permute.xlu1 %2825  ;;  %v6624_v41 = vpop.permute.xlu0 %2811 }
 0x479   : > { %v2838_v62 = vsel %vm362_vm0, %v2810_v7, %v2826_v29  ;;  %v2846_v39 = vsel %vm362_vm0, %v2826_v29, %v2810_v7  ;;  %v2887_v45 = vpop.permute.xlu2 %2886 }
 0x47a   : > { %v6637_v27 = vmul.f32 %v2846_v39, %v7573_v28  ;;  %v6640_v13 = vmul.f32 %v2838_v62, %v7574_v34 }
 0x47e   : > { %3129 = vrot.lane.b32.xlu1 %v6375_v36, %s4176_s18  ;;  %3135 = vrot.lane.b32.xlu0 %v6424_v6, %s4176_s18 }
 0x47f   : > { %3133 = vrot.lane.b32.xlu2 %v6405_v26, %s4176_s18 }
 0x480   : > { %v2885_v61 = vpop.permute.xlu1 %2884  ;;  %v2901_v53 = vpop.permute.xlu0 %2900 }
 0x481   : > { %v6652_v22 = vpop.permute.xlu2 %2815  ;;  %v2920_v43 = vsel %vm445_vm1, %v2901_v53, %v2885_v61 }
 0x486   : > { %3273 = vrot.lane.b32.xlu1 %v6460_v52, %s4179_s19  ;;  %3271 = vrot.lane.b32.xlu0 %v6456_v4, %s4179_s19 }
 0x487   : > { %3131 = vrot.lane.b32.xlu2 %v6394_v11, %s4176_s18 }
 0x488   : > { %v6660_v17 = vpop.permute.xlu0 %2829  ;;  %v6662_v3 = vpop.permute.xlu1 %2813 }
 0x489   : > { %v2905_v42 = vpop.permute.xlu2 %2904 }
 0x48e   : > { %3267 = vrot.lane.b32.xlu1 %v6426_v47, %s4179_s19  ;;  %3289 = vrot.lane.b32.xlu0 %v6462_v33, %s4179_s19 }
 0x48f   : > { %3287 = vrot.lane.b32.xlu2 %v6458_v25, %s4179_s19 }
 0x490   : > { %v2903_v14 = vpop.permute.xlu1 %2902  ;;  %v2889_v10 = vpop.permute.xlu0 %2888 }
 0x491   : > { %v2834_v7 = vpop.permute.xlu2 %2833  ;;  %v2914_v8 = vsel %vm445_vm1, %v2889_v10, %v2905_v42  ;;  %v2922_v29 = vsel %vm445_vm1, %v2905_v42, %v2889_v10  ;;  %v2921_v35 = vsel %vm445_vm1, %v2903_v14, %v2887_v45  ;;  %v2913_v49 = vsel %vm445_vm1, %v2887_v45, %v2903_v14 }
 0x492   : > { %v2936_v21 = vmul.f32 %v2922_v29, %v7575_v40  ;;  %v2937_v42 = vmul.f32 %v2914_v8, %v7576_v55  ;;  %v2919_v45 = vsel %vm445_vm1, %v6604_v23, %v6614_v48 }
 0x496   : > { %3285 = vrot.lane.b32.xlu1 %v6454_v2, %s4179_s19  ;;  %3283 = vrot.lane.b32.xlu0 %v6444_v9, %s4179_s19 }
 0x497   : > { %3269 = vrot.lane.b32.xlu2 %v6452_v54, %s4179_s19 }
 0x498   : > { %v2832_v5 = vpop.permute.xlu1 %2831  ;;  %v2818_v19 = vpop.permute.xlu0 %2817 }
 0x499   : > { %v6676_v63 = vpop.permute.xlu2 %3016 }
 0x49a   : > { %7577 = vst [vmem:[#allocation61_spill] sm:$0xff] %v6676_v63  ;;  %v2912_v63 = vsel %vm445_vm1, %v2885_v61, %v2901_v53 }
 0x49e   : > { %3279 = vrot.lane.b32.xlu1 %v6405_v26, %s4179_s19  ;;  %3265 = vrot.lane.b32.xlu0 %v6415_v44, %s4179_s19 }
 0x49f   : > { %3263 = vrot.lane.b32.xlu2 %v6403_v30, %s4179_s19 }
 0x4a0   : > { %v2891_v62 = vpop.permute.xlu1 %2890  ;;  %v2907_v39 = vpop.permute.xlu0 %2906 }
 0x4a1   : > { %v6690_v51 = vpop.permute.xlu2 %3022  ;;  %v2915_v1 = vsel %vm445_vm1, %v2891_v62, %v2907_v39  ;;  %v2923_v59 = vsel %vm445_vm1, %v2907_v39, %v2891_v62  ;;  %v2934_v62 = vmul.f32 %v2921_v35, %v7575_v40  ;;  %v2910_v35 = vsel %vm445_vm1, %v6550_v37, %v6612_v60 }
 0x4a2   : > { %7578 = vst [vmem:[#allocation39_spill] sm:$0xff] %v6690_v51  ;;  %v2938_v10 = vmul.f32 %v2923_v59, %v7575_v40  ;;  %v2939_v15 = vmul.f32 %v2915_v1, %v7576_v55  ;;  %v2918_v59 = vsel %vm445_vm1, %v6612_v60, %v6550_v37  ;;  %v2935_v1 = vmul.f32 %v2913_v49, %v7576_v55 }
 0x4a3   : > { %v2933_v49 = vmul.f32 %v2912_v63, %v7576_v55  ;;  %v2928_v37 = vmul.f32 %v2918_v59, %v7575_v40  ;;  %v2930_v60 = vmul.f32 %v2919_v45, %v7575_v40  ;;  %v2842_v63 = vsel %vm362_vm0, %v2818_v19, %v2834_v7 }
 0x4a4   : > { %v2946_v26 = vpack.c.bf16 %v2938_v10, %v2936_v21  ;;  %v2947_v51 = vpack.c.bf16 %v2939_v15, %v2937_v42  ;;  %v2911_v15 = vsel %vm445_vm1, %v6614_v48, %v6604_v23  ;;  %v2932_v21 = vmul.f32 %v2920_v43, %v7575_v40 }
 0x4a5   : > { %v2929_v43 = vmul.f32 %v2910_v35, %v7576_v55  ;;  %v2931_v48 = vmul.f32 %v2911_v15, %v7576_v55  ;;  %v2945_v8 = vpack.c.bf16 %v2935_v1, %v2933_v49  ;;  %v2841_v40 = vsel %vm362_vm0, %v6652_v22, %v2832_v5 }
 0x4a6   : > { %3378 = vrot.lane.b32.xlu1 %v6460_v52, %s4186_s22  ;;  %3376 = vrot.lane.b32.xlu0 %v6456_v4, %s4186_s22  ;;  %v2944_v23 = vpack.c.bf16 %v2934_v62, %v2932_v21  ;;  %v2942_v29 = vpack.c.bf16 %v2930_v60, %v2928_v37  ;;  %v2847_v59 = vsel %vm362_vm0, %v6616_v50, %v6624_v41 }
 0x4a7   : > { %3281 = vrot.lane.b32.xlu2 %v6424_v6, %s4179_s19  ;;  %2957 = vmatpush.bf16.msra.mxu2 %v2946_v26  ;;  %v2849_v26 = vsel %vm362_vm0, %v2832_v5, %v6652_v22  ;;  %v2943_v42 = vpack.c.bf16 %v2931_v48, %v2929_v43  ;;  %v2848_v22 = vsel %vm362_vm0, %v6660_v17, %v6662_v3 }
 0x4a8   : > { %2970 = vmatpush.bf16.msra.mxu3 %v2947_v51  ;;  %v6732_v61 = vpop.permute.xlu1 %3014  ;;  %v6734_v53 = vpop.permute.xlu0 %3012  ;;  %v2850_v51 = vsel %vm362_vm0, %v2834_v7, %v2818_v19  ;;  %v2863_v55 = vmul.f32 %v2849_v26, %v7573_v28  ;;  %v2864_v7 = vmul.f32 %v2841_v40, %v7574_v34  ;;  %v2866_v5 = vmul.f32 %v2842_v63, %v7574_v34 }
 0x4a9   : > { %v6738_v14 = vpop.permute.xlu2 %3028  ;;  %v2865_v39 = vmul.f32 %v2850_v51, %v7573_v28  ;;  %v2840_v19 = vsel %vm362_vm0, %v6662_v3, %v6660_v17  ;;  %v2839_v1 = vsel %vm362_vm0, %v6624_v41, %v6616_v50  ;;  %v2861_v35 = vmul.f32 %v2848_v22, %v7573_v28  ;;  %v3988_v50 = vld [vmem:[%s7286_s6 + $0x1] sm:$0x1] }
 0x4aa   : > { %v2862_v21 = vmul.f32 %v2840_v19, %v7574_v34  ;;  %v2874_v17 = vpack.c.bf16 %v2866_v5, %v2864_v7  ;;  %v7579_v3 = vpack.c.bf16 %v6585_v12, %v6579_v56  ;;  %v2859_v49 = vmul.f32 %v2847_v59, %v7573_v28 }
 0x4ab   : > { %2958 = vmatpush.bf16.msra.mxu2 %v2944_v23  ;;  %v2873_v15 = vpack.c.bf16 %v2865_v39, %v2863_v55  ;;  %v7580_v37 = vpack.c.bf16 %v6588_v38, %v6582_v20  ;;  %v2860_v41 = vmul.f32 %v2839_v1, %v7574_v34  ;;  %v7581_v38 = vpack.c.bf16 %v6637_v27, %v6631_v18  ;;  %v7588_v39 = vld [vmem:[#allocation40_spill] sm:$0xff] }
 0x4ac   : > { %2971 = vmatpush.bf16.msra.mxu3 %v2945_v8  ;;  %v2871_v56 = vpack.c.bf16 %v2861_v35, %v2859_v49  ;;  %v7582_v60 = vpack.c.bf16 %v6640_v13, %v6634_v31  ;;  %v7583_v23 = vpack.c.bf16 %v6559_v32, %v6553_v46  ;;  %v7584_v27 = vpack.c.bf16 %v6562_v0, %v6556_v16  ;;  %v2875_v46 = vld [vmem:[%s7286_s6] sm:$0x1]  ;;  %v7586_v8 = vld [vmem:[#allocation39_spill] sm:$0xff] }
 0x4ad   : > { %v2872_v28 = vpack.c.bf16 %v2862_v21, %v2860_v41  ;;  %v7585_v32 = vld [vmem:[#allocation61_spill] sm:$0xff] }
 0x4ae   : > { %3259 = vrot.lane.b32.xlu1 %v6373_v57, %s4179_s19  ;;  %3394 = vrot.lane.b32.xlu0 %v6462_v33, %s4186_s22 }
 0x4af   : > { %3392 = vrot.lane.b32.xlu2 %v6458_v25, %s4186_s22  ;;  %2959 = vmatpush.bf16.msra.mxu2 %v2942_v29  ;;  %v7587_v29 = vld [vmem:[#allocation33_spill] sm:$0xff] }
 0x4b0   : > { %2972 = vmatpush.bf16.msra.mxu3 %v2943_v42  ;;  %v3021_v10 = vpop.permute.xlu1 %3020  ;;  %v3019_v62 = vpop.permute.xlu0 %3018 }
 0x4b1   : > { %v3035_v45 = vpop.permute.xlu2 %3034 }
 0x4b2   : > { %v3053_v19 = vsel %vm526_vm2, %v3035_v45, %v3019_v62 }
 0x4b3   : > { %2960 = vmatpush.bf16.msra.mxu2 %v7579_v3  ;;  %v3050_v3 = vsel %vm526_vm2, %v6738_v14, %v6734_v53 }
 0x4b4   : > { %2973 = vmatpush.bf16.msra.mxu3 %v7580_v37 }
 0x4b6   : > { %3277 = vrot.lane.b32.xlu1 %v6394_v11, %s4179_s19  ;;  %3275 = vrot.lane.b32.xlu0 %v6375_v36, %s4179_s19 }
 0x4b7   : > { %2986 = vmatpush.bf16.msrb.mxu2 %v2873_v15  ;;  %3261 = vrot.lane.b32.xlu2 %v6384_v58, %s4179_s19  ;;  %s319_s19 = scalar_lea.vmem %s7288_s8, %s3770_s15 }
 0x4b8   : > { %2999 = vmatpush.bf16.msrb.mxu3 %v2874_v17  ;;  %3989 = vmatmul.msk.bf16.vlgmr.msra.gmra.mxu2 %vm1313_vm8, %v3988_v50  ;;  %v3027_v20 = vpop.permute.xlu1 %3026  ;;  %v3025_v12 = vpop.permute.xlu0 %3024  ;;  %v3066_v17 = vmul.f32 %v3053_v19, %v7587_v29 }
 0x4b9   : > { %3990 = vmatmul.msk.bf16.vlgmr.msra.gmra.mxu3 %vm1313_vm8, %v3988_v50  ;;  %v6799_v34 = vpop.permute.xlu2 %3113 }
 0x4bb   : > { %2987 = vmatpush.bf16.msrb.mxu2 %v2871_v56 }
 0x4bc   : > { %3000 = vmatpush.bf16.msrb.mxu3 %v2872_v28 }
 0x4be   : > { %3388 = vrot.lane.b32.xlu1 %v6444_v9, %s4186_s22  ;;  %3374 = vrot.lane.b32.xlu0 %v6452_v54, %s4186_s22 }
 0x4bf   : > { %2988 = vmatpush.bf16.msrb.mxu2 %v7581_v38  ;;  %3372 = vrot.lane.b32.xlu2 %v6426_v47, %s4186_s22  ;;  %v7590_v38 = vld [vmem:[#allocation15_spill] sm:$0xff] }
 0x4c0   : > { %3001 = vmatpush.bf16.msrb.mxu3 %v7582_v60  ;;  %v3033_v43 = vpop.permute.xlu1 %3032  ;;  %v3031_v18 = vpop.permute.xlu0 %3030  ;;  %v3049_v60 = vsel %vm526_vm2, %v3027_v20, %v7590_v38 }
 0x4c1   : > { %v6819_v31 = vpop.permute.xlu2 %3119  ;;  %v3052_v16 = vsel %vm526_vm2, %v3033_v43, %v7585_v32  ;;  %v3044_v5 = vsel %vm526_vm2, %v7585_v32, %v3033_v43  ;;  %v3051_v21 = vsel %vm526_vm2, %v3031_v18, %v6732_v61 }
 0x4c2   : > { %v3064_v35 = vmul.f32 %v3052_v16, %v7587_v29  ;;  %v3065_v15 = vmul.f32 %v3044_v5, %v7588_v39  ;;  %v3062_v41 = vmul.f32 %v3051_v21, %v7587_v29  ;;  %v3058_v16 = vmul.f32 %v3049_v60, %v7587_v29 }
 0x4c3   : > { %2989 = vmatpush.bf16.msrb.mxu2 %v7583_v23  ;;  %v7591_v23 = vld [vmem:[#allocation17_spill] sm:$0xff] }
 0x4c4   : > { %3002 = vmatpush.bf16.msrb.mxu3 %v7584_v27  ;;  %v3076_v28 = vpack.c.bf16 %v3066_v17, %v3064_v35  ;;  %v3048_v43 = vsel %vm526_vm2, %v3025_v12, %v7591_v23 }
 0x4c6   : > { %3370 = vrot.lane.b32.xlu1 %v6415_v44, %s4186_s22  ;;  %3368 = vrot.lane.b32.xlu0 %v6403_v30, %s4186_s22 }
 0x4c7   : > { %3390 = vrot.lane.b32.xlu2 %v6454_v2, %s4186_s22 }
 0x4c8   : > { %v3039_v0 = vpop.permute.xlu1 %3038  ;;  %v3037_v13 = vpop.permute.xlu0 %3036  ;;  %3991 = vmatmul.msk.bf16.vlgmr.msrb.gmra.mxu2 %vm1313_vm8, %v2875_v46 }
 0x4c9   : > { %3992 = vmatmul.msk.bf16.vlgmr.msrb.gmra.mxu3 %vm1313_vm8, %v2875_v46  ;;  %v6835_v48 = vpop.permute.xlu2 %3127  ;;  %v3047_v26 = vsel %vm526_vm2, %v7586_v8, %v3039_v0  ;;  %v3055_v51 = vsel %vm526_vm2, %v3039_v0, %v7586_v8  ;;  %v3046_v40 = vsel %vm526_vm2, %v3021_v10, %v3037_v13  ;;  %v3054_v63 = vsel %vm526_vm2, %v3037_v13, %v3021_v10 }
 0x4ca   : > { %v3070_v55 = vmul.f32 %v3055_v51, %v7587_v29  ;;  %v3071_v42 = vmul.f32 %v3047_v26, %v7588_v39  ;;  %v3068_v22 = vmul.f32 %v3054_v63, %v7587_v29  ;;  %v3069_v7 = vmul.f32 %v3046_v40, %v7588_v39 }
 0x4cb   : > { %v3045_v10 = vsel %vm526_vm2, %v3019_v62, %v3035_v45  ;;  %v3043_v62 = vsel %vm526_vm2, %v6732_v61, %v3031_v18  ;;  %v7589_v45 = vld [vmem:[#allocation23_spill] sm:$0xff]  ;;  %v3042_v61 = vsel %vm526_vm2, %v6734_v53, %v6738_v14  ;;  %v3060_v46 = vmul.f32 %v3050_v3, %v7587_v29 }
 0x4cc   : > { %v3078_v59 = vpack.c.bf16 %v3070_v55, %v3068_v22  ;;  %v3079_v1 = vpack.c.bf16 %v3071_v42, %v3069_v7  ;;  %v3067_v49 = vmul.f32 %v3045_v10, %v7588_v39  ;;  %v3063_v18 = vmul.f32 %v3043_v62, %v7588_v39  ;;  %v7593_v10 = vld [vmem:[#allocation12_spill] sm:$0xff] }
 0x4cd   : > { %v3041_v53 = vsel %vm526_vm2, %v7590_v38, %v3027_v20  ;;  %v3040_v14 = vsel %vm526_vm2, %v7591_v23, %v3025_v12  ;;  %v3061_v32 = vmul.f32 %v3042_v61, %v7588_v39  ;;  %v3056_v0 = vmul.f32 %v3048_v43, %v7587_v29 }
 0x4ce   : > { %3481 = vrot.lane.b32.xlu1 %v6456_v4, %s4182_s20  ;;  %3386 = vrot.lane.b32.xlu0 %v6424_v6, %s4186_s22  ;;  %v3077_v27 = vpack.c.bf16 %v3067_v49, %v3065_v15  ;;  %v3074_v13 = vpack.c.bf16 %v3062_v41, %v3060_v46  ;;  %v3059_v8 = vmul.f32 %v3041_v53, %v7588_v39 }
 0x4cf   : > { %3384 = vrot.lane.b32.xlu2 %v7589_v45, %s4186_s22  ;;  %3089 = vmatpush.bf16.msra.mxu2 %v3078_v59  ;;  %v3057_v26 = vmul.f32 %v3040_v14, %v7588_v39  ;;  %v3075_v20 = vpack.c.bf16 %v3063_v18, %v3061_v32  ;;  %v3072_v63 = vpack.c.bf16 %v3058_v16, %v3056_v0  ;;  %v7592_v59 = vld [vmem:[#allocation60_spill] sm:$0xff] }
 0x4d0   : > { %3102 = vmatpush.bf16.msra.mxu3 %v3079_v1  ;;  %v6878_v37 = vpop.permute.xlu1 %3117  ;;  %v6880_v50 = vpop.permute.xlu0 %3115 }
 0x4d1   : > { %v3124_v56 = vpop.permute.xlu2 %3123  ;;  %v3073_v29 = vpack.c.bf16 %v3059_v8, %v3057_v26 }
 0x4d3   : > { %3090 = vmatpush.bf16.msra.mxu2 %v3076_v28 }
 0x4d4   : > { %3103 = vmatpush.bf16.msra.mxu3 %v3077_v27 }
 0x4d6   : > { %3499 = vrot.lane.b32.xlu1 %v6462_v33, %s4182_s20  ;;  %3497 = vrot.lane.b32.xlu0 %v6458_v25, %s4182_s20 }
 0x4d7   : > { %3483 = vrot.lane.b32.xlu2 %v6460_v52, %s4182_s20  ;;  %3091 = vmatpush.bf16.msra.mxu2 %v3074_v13 }
 0x4d8   : > { %3104 = vmatpush.bf16.msra.mxu3 %v3075_v20  ;;  %v3126_v12 = vpop.permute.xlu1 %3125  ;;  %v3122_v51 = vpop.permute.xlu0 %3121 }
 0x4d9   : > { %v3134_v40 = vpop.permute.xlu2 %3133 }
 0x4da   : > { %v3147_v14 = vsel %vm605_vm3, %v6878_v37, %v3134_v40 }
 0x4db   : > { %3092 = vmatpush.bf16.msra.mxu2 %v3072_v63 }
 0x4dc   : > { %3105 = vmatpush.bf16.msra.mxu3 %v3073_v29 }
 0x4de   : > { %3380 = vrot.lane.b32.xlu1 %v6375_v36, %s4186_s22  ;;  %3366 = vrot.lane.b32.xlu0 %v6384_v58, %s4186_s22 }
 0x4df   : > { %3364 = vrot.lane.b32.xlu2 %v6373_v57, %s4186_s22 }
 0x4e0   : > { %v3144_v55 = vpop.permute.xlu1 %3143  ;;  %v3142_v39 = vpop.permute.xlu0 %3141 }
 0x4e1   : > { %v3132_v42 = vpop.permute.xlu2 %3131  ;;  %v3152_v22 = vsel %vm605_vm3, %v6835_v48, %v3144_v55  ;;  %v3160_v7 = vsel %vm605_vm3, %v3144_v55, %v6835_v48  ;;  %v3151_v5 = vsel %vm605_vm3, %v3126_v12, %v3142_v39  ;;  %v3159_v19 = vsel %vm605_vm3, %v3142_v39, %v3126_v12  ;;  %v3993_v48 = vld [vmem:[%s7286_s6 + $0x2] sm:$0x1] }
 0x4e2   : > { %v3175_v1 = vmul.f32 %v3160_v7, %v7592_v59  ;;  %v3176_v35 = vmul.f32 %v3152_v22, %v7593_v10  ;;  %v3173_v15 = vmul.f32 %v3159_v19, %v7592_v59  ;;  %v3174_v21 = vmul.f32 %v3151_v5, %v7593_v10  ;;  %3994 = vmatmul.msk.bf16.vlgmr.msra.gmra.mxu2 %vm1313_vm8, %v3993_v48 }
 0x4e3   : > { %3995 = vmatmul.msk.bf16.vlgmr.msra.gmra.mxu3 %vm1313_vm8, %v3993_v48  ;;  %v3154_v63 = vsel %vm605_vm3, %v3132_v42, %v6880_v50  ;;  %v3146_v55 = vsel %vm605_vm3, %v6880_v50, %v3132_v42  ;;  %v7595_v48 = vld [vmem:[#allocation59_spill] sm:$0xff] }
 0x4e4   : > { %v3183_v17 = vpack.c.bf16 %v3175_v1, %v3173_v15  ;;  %v3184_v62 = vpack.c.bf16 %v3176_v35, %v3174_v21  ;;  %v3164_v7 = vmul.f32 %v3146_v55, %v7593_v10 }
 0x4e6   : > { %3479 = vrot.lane.b32.xlu1 %v6452_v54, %s4182_s20  ;;  %3477 = vrot.lane.b32.xlu0 %v6426_v47, %s4182_s20 }
 0x4e7   : > { %3382 = vrot.lane.b32.xlu2 %v6394_v11, %s4186_s22  ;;  %3194 = vmatpush.bf16.msrb.mxu2 %v3183_v17 }
 0x4e8   : > { %3207 = vmatpush.bf16.msrb.mxu3 %v3184_v62  ;;  %v3140_v3 = vpop.permute.xlu1 %3139  ;;  %v3138_v49 = vpop.permute.xlu0 %3137  ;;  %v7594_v62 = vld [vmem:[#allocation29_spill] sm:$0xff] }
 0x4e9   : > { %v3288_v61 = vpop.permute.xlu2 %3287  ;;  %v3150_v41 = vsel %vm605_vm3, %v3124_v56, %v3140_v3  ;;  %v3158_v28 = vsel %vm605_vm3, %v3140_v3, %v3124_v56  ;;  %v3149_v38 = vsel %vm605_vm3, %v3122_v51, %v3138_v49  ;;  %v3157_v60 = vsel %vm605_vm3, %v3138_v49, %v3122_v51 }
 0x4ea   : > { %v3171_v23 = vmul.f32 %v3158_v28, %v7592_v59  ;;  %v3172_v43 = vmul.f32 %v3150_v41, %v7593_v10  ;;  %v3169_v18 = vmul.f32 %v3157_v60, %v7592_v59  ;;  %v3170_v27 = vmul.f32 %v3149_v38, %v7593_v10 }
 0x4eb   : > { %v3155_v56 = vsel %vm605_vm3, %v3134_v40, %v6878_v37  ;;  %v3166_v37 = vmul.f32 %v3147_v14, %v7593_v10 }
 0x4ec   : > { %v3181_v46 = vpack.c.bf16 %v3171_v23, %v3169_v18  ;;  %v3182_v53 = vpack.c.bf16 %v3172_v43, %v3170_v27  ;;  %v3165_v0 = vmul.f32 %v3155_v56, %v7592_v59 }
 0x4ee   : > { %3473 = vrot.lane.b32.xlu1 %v6403_v30, %s4182_s20  ;;  %3495 = vrot.lane.b32.xlu0 %v6454_v2, %s4182_s20 }
 0x4ef   : > { %3493 = vrot.lane.b32.xlu2 %v6444_v9, %s4182_s20  ;;  %3195 = vmatpush.bf16.msrb.mxu2 %v3181_v46 }
 0x4f0   : > { %3208 = vmatpush.bf16.msrb.mxu3 %v3182_v53  ;;  %v3130_v32 = vpop.permute.xlu1 %3129  ;;  %v3136_v16 = vpop.permute.xlu0 %3135 }
 0x4f1   : > { %v3270_v13 = vpop.permute.xlu2 %3269  ;;  %v3148_v8 = vsel %vm605_vm3, %v6819_v31, %v3136_v16  ;;  %v3156_v26 = vsel %vm605_vm3, %v3136_v16, %v6819_v31  ;;  %v3153_v20 = vsel %vm605_vm3, %v3130_v32, %v6799_v34  ;;  %v3145_v40 = vsel %vm605_vm3, %v6799_v34, %v3130_v32 }
 0x4f2   : > { %v3167_v12 = vmul.f32 %v3156_v26, %v7592_v59  ;;  %v3168_v51 = vmul.f32 %v3148_v8, %v7593_v10  ;;  %v3161_v39 = vmul.f32 %v3153_v20, %v7592_v59  ;;  %v3162_v22 = vmul.f32 %v3145_v40, %v7593_v10 }
 0x4f3   : > { %v3163_v34 = vmul.f32 %v3154_v63, %v7592_v59 }
 0x4f4   : > { %v3179_v29 = vpack.c.bf16 %v3167_v12, %v3165_v0  ;;  %v3180_v31 = vpack.c.bf16 %v3168_v51, %v3166_v37  ;;  %v3178_v1 = vpack.c.bf16 %v3164_v7, %v3162_v22 }
 0x4f5   : > { %v3177_v19 = vpack.c.bf16 %v3163_v34, %v3161_v39 }
 0x4f6   : > { %3491 = vrot.lane.b32.xlu1 %v6424_v6, %s4182_s20  ;;  %3489 = vrot.lane.b32.xlu0 %v7589_v45, %s4182_s20 }
 0x4f7   : > { %3475 = vrot.lane.b32.xlu2 %v6415_v44, %s4182_s20  ;;  %3196 = vmatpush.bf16.msrb.mxu2 %v3179_v29 }
 0x4f8   : > { %3209 = vmatpush.bf16.msrb.mxu3 %v3180_v31  ;;  %v3274_v50 = vpop.permute.xlu1 %3273  ;;  %v3272_v42 = vpop.permute.xlu0 %3271 }
 0x4f9   : > { %v3264_v5 = vpop.permute.xlu2 %3263  ;;  %v3297_v59 = vsel %vm748_vm4, %v3272_v42, %v3288_v61  ;;  %v3305_v10 = vsel %vm748_vm4, %v3288_v61, %v3272_v42  ;;  %v7597_v42 = vld [vmem:[#allocation58_spill] sm:$0xff] }
 0x4fa   : > { %v3320_v3 = vmul.f32 %v3305_v10, %v7595_v48 }
 0x4fb   : > { %3197 = vmatpush.bf16.msrb.mxu2 %v3177_v19 }
 0x4fc   : > { %3210 = vmatpush.bf16.msrb.mxu3 %v3178_v1 }
 0x4fe   : > { %3602 = vrot.lane.b32.xlu1 %v6458_v25, %s4184_s21  ;;  %3588 = vrot.lane.b32.xlu0 %v6460_v52, %s4184_s21  ;;  %v3319_v52 = vmul.f32 %v3297_v59, %v7594_v62 }
 0x4ff   : > { %3586 = vrot.lane.b32.xlu2 %v6456_v4, %s4184_s21 }
 0x500   : > { %v3268_v35 = vpop.permute.xlu1 %3267  ;;  %v3290_v15 = vpop.permute.xlu0 %3289 }
 0x501   : > { %v3282_v21 = vpop.permute.xlu2 %3281  ;;  %v3298_v17 = vsel %vm748_vm4, %v3274_v50, %v3290_v15  ;;  %v3306_v25 = vsel %vm748_vm4, %v3290_v15, %v3274_v50  ;;  %v7596_v50 = vld [vmem:[#allocation48_spill] sm:$0xff] }
 0x502   : > { %v3321_v49 = vmul.f32 %v3298_v17, %v7594_v62  ;;  %v3322_v61 = vmul.f32 %v3306_v25, %v7595_v48 }
 0x504   : > { %v3329_v41 = vpack.c.bf16 %v3321_v49, %v3319_v52  ;;  %v3330_v28 = vpack.c.bf16 %v3322_v61, %v3320_v3  ;;  %v349_v49 = vld [vmem:[#allocation2] sm:$0x1] }
 0x506   : > { %3471 = vrot.lane.b32.xlu1 %v6384_v58, %s4182_s20  ;;  %3469 = vrot.lane.b32.xlu0 %v6373_v57, %s4182_s20 }
 0x507   : > { %3604 = vrot.lane.b32.xlu2 %v6462_v33, %s4184_s21  ;;  %3340 = vmatpush.bf16.msra.mxu2 %v3329_v41 }
 0x508   : > { %3353 = vmatpush.bf16.msra.mxu3 %v3330_v28  ;;  %v3286_v4 = vpop.permute.xlu1 %3285  ;;  %v3284_v38 = vpop.permute.xlu0 %3283  ;;  %v3996_v28 = vld [vmem:[%s7286_s6 + $0x3] sm:$0x1] }
 0x509   : > { %v3393_v60 = vpop.permute.xlu2 %3392  ;;  %v3296_v23 = vsel %vm748_vm4, %v3270_v13, %v3286_v4  ;;  %v3304_v43 = vsel %vm748_vm4, %v3286_v4, %v3270_v13  ;;  %v3295_v18 = vsel %vm748_vm4, %v3268_v35, %v3284_v38  ;;  %v3303_v27 = vsel %vm748_vm4, %v3284_v38, %v3268_v35  ;;  %3997 = vmatmul.msk.bf16.vlgmr.msrb.gmra.mxu2 %vm1313_vm8, %v3996_v28 }
 0x50a   : > { %v3317_v46 = vmul.f32 %v3296_v23, %v7594_v62  ;;  %v3318_v33 = vmul.f32 %v3304_v43, %v7595_v48  ;;  %v3315_v53 = vmul.f32 %v3295_v18, %v7594_v62  ;;  %v3316_v56 = vmul.f32 %v3303_v27, %v7595_v48  ;;  %3998 = vmatmul.msk.bf16.vlgmr.msrb.gmra.mxu3 %vm1313_vm8, %v3996_v28 }
 0x50c   : > { %v3327_v14 = vpack.c.bf16 %v3317_v46, %v3315_v53  ;;  %v3328_v32 = vpack.c.bf16 %v3318_v33, %v3316_v56  ;;  %v3999_v53 = vld [vmem:[%s7286_s6 + $0x4] sm:$0x1] }
 0x50d   : > { %4001 = vmatmul.msk.bf16.vlgmr.msrb.gmra.mxu1 %vm1313_vm8, %v3999_v53  ;;  %4000 = vmatmul.msk.bf16.vlgmr.msrb.gmra.mxu0 %vm1313_vm8, %v3999_v53 }
 0x50e   : > { %3582 = vrot.lane.b32.xlu1 %v6426_v47, %s4184_s21  ;;  %3487 = vrot.lane.b32.xlu0 %v6394_v11, %s4182_s20 }
 0x50f   : > { %3485 = vrot.lane.b32.xlu2 %v6375_v36, %s4182_s20  ;;  %3341 = vmatpush.bf16.msra.mxu2 %v3327_v14 }
 0x510   : > { %3354 = vmatpush.bf16.msra.mxu3 %v3328_v32  ;;  %v3280_v16 = vpop.permute.xlu1 %3279  ;;  %v3266_v0 = vpop.permute.xlu0 %3265 }
 0x511   : > { %v3262_v13 = vpop.permute.xlu2 %3261  ;;  %v3293_v8 = vsel %vm748_vm4, %v3264_v5, %v3280_v16  ;;  %v3301_v26 = vsel %vm748_vm4, %v3280_v16, %v3264_v5  ;;  %v3294_v47 = vsel %vm748_vm4, %v3266_v0, %v3282_v21  ;;  %v3302_v37 = vsel %vm748_vm4, %v3282_v21, %v3266_v0  ;;  %v4002_v16 = vld [vmem:[%s7286_s6 + $0x5] sm:$0x1] }
 0x512   : > { %v3311_v20 = vmul.f32 %v3293_v8, %v7594_v62  ;;  %v3312_v12 = vmul.f32 %v3301_v26, %v7595_v48  ;;  %v3313_v51 = vmul.f32 %v3294_v47, %v7594_v62  ;;  %v3314_v40 = vmul.f32 %v3302_v37, %v7595_v48 }
 0x514   : > { %v3325_v63 = vpack.c.bf16 %v3313_v51, %v3311_v20  ;;  %v3326_v29 = vpack.c.bf16 %v3314_v40, %v3312_v12 }
 0x516   : > { %3600 = vrot.lane.b32.xlu1 %v6454_v2, %s4184_s21  ;;  %3598 = vrot.lane.b32.xlu0 %v6444_v9, %s4184_s21 }
 0x517   : > { %3584 = vrot.lane.b32.xlu2 %v6452_v54, %s4184_s21  ;;  %3342 = vmatpush.bf16.msra.mxu2 %v3325_v63 }
 0x518   : > { %3355 = vmatpush.bf16.msra.mxu3 %v3326_v29  ;;  %v3379_v31 = vpop.permute.xlu1 %3378  ;;  %v3377_v55 = vpop.permute.xlu0 %3376 }
 0x519   : > { %v3373_v39 = vpop.permute.xlu2 %3372  ;;  %v3402_v2 = vsel %vm827_vm5, %v3377_v55, %v3393_v60  ;;  %v3410_v9 = vsel %vm827_vm5, %v3393_v60, %v3377_v55 }
 0x51a   : > { %v3425_v5 = vmul.f32 %v3410_v9, %v7597_v42 }
 0x51e   : > { %3594 = vrot.lane.b32.xlu1 %v7589_v45, %s4184_s21  ;;  %3580 = vrot.lane.b32.xlu0 %v6415_v44, %s4184_s21  ;;  %v3424_v44 = vmul.f32 %v3402_v2, %v7596_v50 }
 0x51f   : > { %3578 = vrot.lane.b32.xlu2 %v6403_v30, %s4184_s21 }
 0x520   : > { %v3260_v54 = vpop.permute.xlu1 %3259  ;;  %v3395_v22 = vpop.permute.xlu0 %3394 }
 0x521   : > { %v3391_v34 = vpop.permute.xlu2 %3390  ;;  %v3403_v7 = vsel %vm827_vm5, %v3379_v31, %v3395_v22  ;;  %v3411_v45 = vsel %vm827_vm5, %v3395_v22, %v3379_v31 }
 0x522   : > { %v3426_v19 = vmul.f32 %v3403_v7, %v7596_v50  ;;  %v3427_v1 = vmul.f32 %v3411_v45, %v7597_v42  ;;  %v7598_v7 = vld [vmem:[#allocation16_spill] sm:$0xff] }
 0x524   : > { %v3434_v59 = vpack.c.bf16 %v3426_v19, %v3424_v44  ;;  %v3435_v10 = vpack.c.bf16 %v3427_v1, %v3425_v5  ;;  %v7599_v44 = vld [vmem:[#allocation41_spill] sm:$0xff] }
 0x526   : > { %3576 = vrot.lane.b32.xlu1 %v6384_v58, %s4184_s21  ;;  %3574 = vrot.lane.b32.xlu0 %v6373_v57, %s4184_s21 }
 0x527   : > { %3596 = vrot.lane.b32.xlu2 %v6424_v6, %s4184_s21  ;;  %3445 = vmatpush.bf16.msra.mxu0 %v3434_v59 }
 0x528   : > { %3458 = vmatpush.bf16.msra.mxu1 %v3435_v10  ;;  %v3278_v30 = vpop.permute.xlu1 %3277  ;;  %v3276_v35 = vpop.permute.xlu0 %3275 }
 0x529   : > { %v3385_v15 = vpop.permute.xlu2 %3384  ;;  %v3292_v21 = vsel %vm748_vm4, %v3262_v13, %v3278_v30  ;;  %v3300_v17 = vsel %vm748_vm4, %v3278_v30, %v3262_v13  ;;  %v3291_v58 = vsel %vm748_vm4, %v3260_v54, %v3276_v35  ;;  %v3299_v57 = vsel %vm748_vm4, %v3276_v35, %v3260_v54 }
 0x52a   : > { %v3309_v25 = vmul.f32 %v3292_v21, %v7594_v62  ;;  %v3310_v6 = vmul.f32 %v3300_v17, %v7595_v48  ;;  %v3307_v52 = vmul.f32 %v3291_v58, %v7594_v62  ;;  %v3308_v3 = vmul.f32 %v3299_v57, %v7595_v48 }
 0x52c   : > { %v3323_v61 = vpack.c.bf16 %v3309_v25, %v3307_v52  ;;  %v3324_v41 = vpack.c.bf16 %v3310_v6, %v3308_v3 }
 0x52e   : > { %3681 = vperm.xlu1 %4117, %v349_v49   ;;  %3592 = vrot.lane.b32.xlu0 %v6394_v11, %s4184_s21 }
 0x52f   : > { %3590 = vrot.lane.b32.xlu2 %v6375_v36, %s4184_s21  ;;  %3343 = vmatpush.bf16.msra.mxu2 %v3323_v61 }
 0x530   : > { %3356 = vmatpush.bf16.msra.mxu3 %v3324_v41  ;;  %v3389_v62 = vpop.permute.xlu1 %3388  ;;  %v3375_v48 = vpop.permute.xlu0 %3374  ;;  %v4005_v41 = vld [vmem:[%s7286_s6 + $0x6] sm:$0x1] }
 0x531   : > { %v3484_v4 = vpop.permute.xlu2 %3483  ;;  %v3400_v38 = vsel %vm827_vm5, %v3373_v39, %v3389_v62  ;;  %v3408_v60 = vsel %vm827_vm5, %v3389_v62, %v3373_v39  ;;  %v3401_v23 = vsel %vm827_vm5, %v3375_v48, %v3391_v34  ;;  %v3409_v11 = vsel %vm827_vm5, %v3391_v34, %v3375_v48 }
 0x532   : > { %v3420_v43 = vmul.f32 %v3400_v38, %v7596_v50  ;;  %v3421_v36 = vmul.f32 %v3408_v60, %v7597_v42  ;;  %v3422_v18 = vmul.f32 %v3401_v23, %v7596_v50  ;;  %v3423_v27 = vmul.f32 %v3409_v11, %v7597_v42  ;;  %4003 = vmatmul.msk.bf16.vlgmr.msra.gmra.mxu2 %vm1313_vm8, %v4002_v16 }
 0x533   : > { %4004 = vmatmul.msk.bf16.vlgmr.msra.gmra.mxu3 %vm1313_vm8, %v4002_v16 }
 0x534   : > { %v3432_v46 = vpack.c.bf16 %v3422_v18, %v3420_v43  ;;  %v3433_v33 = vpack.c.bf16 %v3423_v27, %v3421_v36 }
 0x536   : > { %3446 = vmatpush.bf16.msra.mxu0 %v3432_v46  ;;  %3459 = vmatpush.bf16.msra.mxu1 %v3433_v33 }
 0x538   : > { %v3371_v56 = vpop.permute.xlu1 %3370  ;;  %v3369_v14 = vpop.permute.xlu0 %3368 }
 0x539   : > { %v3365_v32 = vpop.permute.xlu2 %3364  ;;  %v3398_v0 = vsel %vm827_vm5, %v3369_v14, %v3385_v15  ;;  %v3406_v13 = vsel %vm827_vm5, %v3385_v15, %v3369_v14 }
 0x53a   : > { %v3416_v12 = vmul.f32 %v3398_v0, %v7596_v50  ;;  %v3417_v51 = vmul.f32 %v3406_v13, %v7597_v42 }
 0x540   : > { %v3482_v8 = vpop.permute.xlu1 %3481  ;;  %v3387_v26 = vpop.permute.xlu0 %3386 }
 0x541   : > { %v3383_v47 = vpop.permute.xlu2 %3382  ;;  %v3399_v37 = vsel %vm827_vm5, %v3371_v56, %v3387_v26  ;;  %v3407_v20 = vsel %vm827_vm5, %v3387_v26, %v3371_v56 }
 0x542   : > { %v3418_v40 = vmul.f32 %v3399_v37, %v7596_v50  ;;  %v3419_v63 = vmul.f32 %v3407_v20, %v7597_v42 }
 0x544   : > { %v3430_v29 = vpack.c.bf16 %v3418_v40, %v3416_v12  ;;  %v3431_v31 = vpack.c.bf16 %v3419_v63, %v3417_v51 }
 0x546   : > { %3447 = vmatpush.bf16.msra.mxu0 %v3430_v29  ;;  %3460 = vmatpush.bf16.msra.mxu1 %v3431_v31 }
 0x548   : > { %v3500_v55 = vpop.permute.xlu1 %3499  ;;  %v3498_v39 = vpop.permute.xlu0 %3497 }
 0x549   : > { %v3494_v2 = vpop.permute.xlu2 %3493  ;;  %v3508_v9 = vsel %vm906_vm7, %v3484_v4, %v3500_v55  ;;  %v3516_v54 = vsel %vm906_vm7, %v3500_v55, %v3484_v4  ;;  %v3507_v22 = vsel %vm906_vm7, %v3482_v8, %v3498_v39  ;;  %v3515_v34 = vsel %vm906_vm7, %v3498_v39, %v3482_v8  ;;  %v7202_v39 = vld [vmem:[%s7281_s1 + $0x10] ss:$0 sm:$0xff] }
 0x54a   : > { %v3531_v45 = vmul.f32 %v3508_v9, %v7598_v7  ;;  %v3532_v5 = vmul.f32 %v3516_v54, %v7599_v44  ;;  %v3529_v19 = vmul.f32 %v3507_v22, %v7598_v7  ;;  %v3530_v1 = vmul.f32 %v3515_v34, %v7599_v44  ;;  %v7208_v9 = vld [vmem:[%s7281_s1 + $0x18] ss:$0 sm:$0xff] }
 0x54c   : > { %v3539_v59 = vpack.c.bf16 %v3531_v45, %v3529_v19  ;;  %v3540_v10 = vpack.c.bf16 %v3532_v5, %v3530_v1 }
 0x54e   : > { %3550 = vmatpush.bf16.msrb.mxu2 %v3539_v59  ;;  %3563 = vmatpush.bf16.msrb.mxu3 %v3540_v10 }
 0x550   : > { %v3381_v30 = vpop.permute.xlu1 %3380  ;;  %v3367_v35 = vpop.permute.xlu0 %3366 }
 0x551   : > { %v3396_v15 = vsel %vm827_vm5, %v3365_v32, %v3381_v30  ;;  %v3404_v21 = vsel %vm827_vm5, %v3381_v30, %v3365_v32  ;;  %v3397_v17 = vsel %vm827_vm5, %v3367_v35, %v3383_v47  ;;  %v3405_v58 = vsel %vm827_vm5, %v3383_v47, %v3367_v35  ;;  %v3476_v3 = vpop.permute.xlu2 %3475 }
 0x552   : > { %v3412_v57 = vmul.f32 %v3396_v15, %v7596_v50  ;;  %v3413_v25 = vmul.f32 %v3404_v21, %v7597_v42  ;;  %v3414_v6 = vmul.f32 %v3397_v17, %v7596_v50  ;;  %v3415_v52 = vmul.f32 %v3405_v58, %v7597_v42  ;;  %v2975_v58 = vpop.f32.mrf.mxu3 }
 0x554   : > { %v3428_v49 = vpack.c.bf16 %v3414_v6, %v3412_v57  ;;  %v3429_v61 = vpack.c.bf16 %v3415_v52, %v3413_v25 }
 0x556   : > { %3448 = vmatpush.bf16.msra.mxu0 %v3428_v49  ;;  %3461 = vmatpush.bf16.msra.mxu1 %v3429_v61 }
 0x558   : > { %v3480_v28 = vpop.permute.xlu1 %3479  ;;  %v3478_v62 = vpop.permute.xlu0 %3477 }
 0x559   : > { %4007 = vmatmul.msk.bf16.vlgmr.msra.gmra.mxu1 %vm1313_vm8, %v4005_v41  ;;  %4006 = vmatmul.msk.bf16.vlgmr.msra.gmra.mxu0 %vm1313_vm8, %v4005_v41  ;;  %v3587_v48 = vpop.permute.xlu2 %3586  ;;  %v3505_v50 = vsel %vm906_vm7, %v3478_v62, %v3494_v2  ;;  %v3513_v42 = vsel %vm906_vm7, %v3494_v2, %v3478_v62 }
 0x55a   : > { %v3525_v11 = vmul.f32 %v3505_v50, %v7598_v7  ;;  %v3526_v43 = vmul.f32 %v3513_v42, %v7599_v44 }
 0x560   : > { %v3474_v4 = vpop.permute.xlu1 %3473  ;;  %v3496_v38 = vpop.permute.xlu0 %3495 }
 0x561   : > { %v3506_v60 = vsel %vm906_vm7, %v3480_v28, %v3496_v38  ;;  %v3514_v23 = vsel %vm906_vm7, %v3496_v38, %v3480_v28  ;;  %v3605_v33 = vpop.permute.xlu2 %3604  ;;  %v4008_v28 = vld [vmem:[%s7286_s6 + $0x7] sm:$0x1] }
 0x562   : > { %v3527_v36 = vmul.f32 %v3506_v60, %v7598_v7  ;;  %v3528_v18 = vmul.f32 %v3514_v23, %v7599_v44 }
 0x564   : > { %v3537_v27 = vpack.c.bf16 %v3527_v36, %v3525_v11  ;;  %v3538_v46 = vpack.c.bf16 %v3528_v18, %v3526_v43 }
 0x566   : > { %3551 = vmatpush.bf16.msrb.mxu2 %v3537_v27  ;;  %3564 = vmatpush.bf16.msrb.mxu3 %v3538_v46 }
 0x568   : > { %v3492_v53 = vpop.permute.xlu1 %3491  ;;  %v3490_v56 = vpop.permute.xlu0 %3489 }
 0x569   : > { %v3504_v14 = vsel %vm906_vm7, %v3476_v3, %v3492_v53  ;;  %v3512_v32 = vsel %vm906_vm7, %v3492_v53, %v3476_v3  ;;  %v3503_v16 = vsel %vm906_vm7, %v3474_v4, %v3490_v56  ;;  %v3511_v0 = vsel %vm906_vm7, %v3490_v56, %v3474_v4  ;;  %v3486_v40 = vpop.permute.xlu2 %3485  ;;  %v2962_v3 = vpop.f32.mrf.mxu2 }
 0x56a   : > { %v3523_v13 = vmul.f32 %v3504_v14, %v7598_v7  ;;  %v3524_v8 = vmul.f32 %v3512_v32, %v7599_v44  ;;  %v3521_v26 = vmul.f32 %v3503_v16, %v7598_v7  ;;  %v3522_v47 = vmul.f32 %v3511_v0, %v7599_v44  ;;  %v2977_v4 = vpop.f32.mrf.mxu3 }
 0x56c   : > { %v3535_v37 = vpack.c.bf16 %v3523_v13, %v3521_v26  ;;  %v3536_v20 = vpack.c.bf16 %v3524_v8, %v3522_v47 }
 0x56e   : > { %3552 = vmatpush.bf16.msrb.mxu2 %v3535_v37  ;;  %3565 = vmatpush.bf16.msrb.mxu3 %v3536_v20 }
 0x570   : > { %v3603_v12 = vpop.permute.xlu1 %3602  ;;  %v3589_v51 = vpop.permute.xlu0 %3588 }
 0x571   : > { %v3612_v63 = vsel %vm985_vm6, %v3587_v48, %v3603_v12  ;;  %v3620_v29 = vsel %vm985_vm6, %v3603_v12, %v3587_v48  ;;  %v3613_v31 = vsel %vm985_vm6, %v3589_v51, %v3605_v33  ;;  %v3621_v55 = vsel %vm985_vm6, %v3605_v33, %v3589_v51  ;;  %v3585_v59 = vpop.permute.xlu2 %3584  ;;  %v2964_v43 = vpop.f32.mrf.mxu2 }
 0x572   : > { %v3634_v2 = vmul.f32 %v7202_v39, %v3612_v63  ;;  %v3635_v54 = vmul.f32 %v7208_v9, %v3620_v29  ;;  %v3636_v22 = vmul.f32 %v7202_v39, %v3613_v31  ;;  %v3637_v34 = vmul.f32 %v7208_v9, %v3621_v55  ;;  %v3004_v16 = vpop.f32.mrf.mxu3 }
 0x573   : > { %v3005_v47 = vadd.f32 %v3004_v16, %v2975_v58  ;;  %v4011_v58 = vld [vmem:[%s7286_s6 + $0x8] sm:$0x1] }
 0x574   : > { %v3644_v45 = vpack.c.bf16 %v3636_v22, %v3634_v2  ;;  %v3645_v5 = vpack.c.bf16 %v3637_v34, %v3635_v54 }
 0x576   : > { %3655 = vmatpush.bf16.msrb.mxu0 %v3644_v45  ;;  %3668 = vmatpush.bf16.msrb.mxu1 %v3645_v5 }
 0x578   : > { %v3472_v19 = vpop.permute.xlu1 %3471  ;;  %v3470_v1 = vpop.permute.xlu0 %3469 }
 0x579   : > { %v3501_v10 = vsel %vm906_vm7, %v3470_v1, %v3486_v40  ;;  %v3509_v30 = vsel %vm906_vm7, %v3486_v40, %v3470_v1  ;;  %v3579_v41 = vpop.permute.xlu2 %3578  ;;  %v2991_v37 = vpop.f32.mrf.mxu2 }
 0x57a   : > { %v3517_v57 = vmul.f32 %v3501_v10, %v7598_v7  ;;  %v3518_v25 = vmul.f32 %v3509_v30, %v7599_v44  ;;  %v2992_v51 = vadd.f32 %v2991_v37, %v2962_v3  ;;  %v3006_v63 = vpop.f32.mrf.mxu3 }
 0x580   : > { %v3583_v35 = vpop.permute.xlu1 %3582  ;;  %v3488_v15 = vpop.permute.xlu0 %3487 }
 0x581   : > { %v3502_v21 = vsel %vm906_vm7, %v3472_v19, %v3488_v15  ;;  %v3510_v17 = vsel %vm906_vm7, %v3488_v15, %v3472_v19  ;;  %v3597_v27 = vpop.permute.xlu2 %3596  ;;  %v2993_v29 = vpop.f32.mrf.mxu2 }
 0x582   : > { %v3519_v6 = vmul.f32 %v3502_v21, %v7598_v7  ;;  %v3520_v52 = vmul.f32 %v3510_v17, %v7599_v44  ;;  %v3107_v19 = vpop.f32.mrf.mxu3 }
 0x583   : > { %v3112_v30 = vadd.f32 %v3107_v19, %v3005_v47 }
 0x584   : > { %v3533_v49 = vpack.c.bf16 %v3519_v6, %v3517_v57  ;;  %v3534_v61 = vpack.c.bf16 %v3520_v52, %v3518_v25 }
 0x586   : > { %3553 = vmatpush.bf16.msrb.mxu2 %v3533_v49  ;;  %3566 = vmatpush.bf16.msrb.mxu3 %v3534_v61 }
 0x588   : > { %v3601_v62 = vpop.permute.xlu1 %3600  ;;  %v3599_v48 = vpop.permute.xlu0 %3598 }
 0x589   : > { %v3611_v50 = vsel %vm985_vm6, %v3585_v59, %v3601_v62  ;;  %v3619_v7 = vsel %vm985_vm6, %v3601_v62, %v3585_v59  ;;  %v3610_v44 = vsel %vm985_vm6, %v3583_v35, %v3599_v48  ;;  %v3618_v42 = vsel %vm985_vm6, %v3599_v48, %v3583_v35  ;;  %4009 = vmatmul.msk.bf16.vlgmr.msrb.gmra.mxu2 %vm1313_vm8, %v4008_v28  ;;  %v3591_v31 = vpop.permute.xlu2 %3590  ;;  %v3094_v35 = vpop.f32.mrf.mxu2 }
 0x58a   : > { %v3632_v38 = vmul.f32 %v7202_v39, %v3611_v50  ;;  %v3633_v60 = vmul.f32 %v7208_v9, %v3619_v7  ;;  %v3630_v23 = vmul.f32 %v7202_v39, %v3610_v44  ;;  %v3631_v11 = vmul.f32 %v7208_v9, %v3618_v42  ;;  %4010 = vmatmul.msk.bf16.vlgmr.msrb.gmra.mxu3 %vm1313_vm8, %v4008_v28  ;;  %v3109_v24 = vpop.f32.mrf.mxu3  ;;  %v3253_v52 = vpop.f32.mrf.mxu1 }
 0x58b   : > { %v3111_v17 = vadd.f32 %v3094_v35, %v2992_v51  ;;  %v3240_v3 = vpop.f32.mrf.mxu0 }
 0x58c   : > { %v3642_v36 = vpack.c.bf16 %v3632_v38, %v3630_v23  ;;  %v3643_v18 = vpack.c.bf16 %v3633_v60, %v3631_v11 }
 0x58e   : > { %3656 = vmatpush.bf16.msrb.mxu0 %v3642_v36  ;;  %3669 = vmatpush.bf16.msrb.mxu1 %v3643_v18 }
 0x590   : > { %v3595_v46 = vpop.permute.xlu1 %3594  ;;  %v3581_v33 = vpop.permute.xlu0 %3580 }
 0x591   : > { %v3608_v53 = vsel %vm985_vm6, %v3579_v41, %v3595_v46  ;;  %v3616_v56 = vsel %vm985_vm6, %v3595_v46, %v3579_v41  ;;  %v3609_v14 = vsel %vm985_vm6, %v3581_v33, %v3597_v27  ;;  %v3617_v32 = vsel %vm985_vm6, %v3597_v27, %v3581_v33  ;;  %v3096_v57 = vpop.f32.mrf.mxu2 }
 0x592   : > { %v3626_v0 = vmul.f32 %v7202_v39, %v3608_v53  ;;  %v3627_v13 = vmul.f32 %v7208_v9, %v3616_v56  ;;  %v3628_v8 = vmul.f32 %v7202_v39, %v3609_v14  ;;  %v3629_v26 = vmul.f32 %v7208_v9, %v3617_v32  ;;  %v3255_v62 = vpop.f32.mrf.mxu1 }
 0x593   : > { %v3242_v48 = vpop.f32.mrf.mxu0 }
 0x594   : > { %v3640_v20 = vpack.c.bf16 %v3628_v8, %v3626_v0  ;;  %v3641_v12 = vpack.c.bf16 %v3629_v26, %v3627_v13 }
 0x596   : > { %3657 = vmatpush.bf16.msrb.mxu0 %v3640_v20  ;;  %3670 = vmatpush.bf16.msrb.mxu1 %v3641_v12  ;;  %v7600_v12 = vlaneseq }
 0x598   : > { %v3575_v40 = vpop.permute.xlu0 %3574  ;;  %v3577_v54 = vpop.permute.xlu1 %3576  ;;  %vm3695_vm10 = vcmp.lt.s32.totalorder %v7600_v12, 256 }
 0x599   : > { %v3606_v55 = vsel %vm985_vm6, %v3575_v40, %v3591_v31  ;;  %v3614_v2 = vsel %vm985_vm6, %v3591_v31, %v3575_v40 }
 0x59a   : > { %v3622_v34 = vmul.f32 %v7202_v39, %v3606_v55  ;;  %v3623_v1 = vmul.f32 %v7208_v9, %v3614_v2 }
 0x5a0   : > { %v3593_v22 = vpop.permute.xlu0 %3592  ;;  %v3682_v56 = vpop.permute.xlu1 %3681 }
 0x5a1   : > { %v3607_v45 = vsel %vm985_vm6, %v3577_v54, %v3593_v22  ;;  %v3615_v5 = vsel %vm985_vm6, %v3593_v22, %v3577_v54  ;;  %v3684_v13 = vperm.slane %v3682_v56, 0 }
 0x5a2   : > { %v3624_v59 = vmul.f32 %v7202_v39, %v3607_v45  ;;  %v3625_v10 = vmul.f32 %v7208_v9, %v3615_v5  ;;  %v3212_v39 = vpop.f32.mrf.mxu3  ;;  %v3199_v9 = vpop.f32.mrf.mxu2 }
 0x5a3   : > { %v3217_v25 = vadd.f32 %v3212_v39, %v3112_v30  ;;  %v3216_v6 = vadd.f32 %v3199_v9, %v3111_v17 }
 0x5a4   : > { %v3638_v15 = vpack.c.bf16 %v3624_v59, %v3622_v34  ;;  %v3639_v21 = vpack.c.bf16 %v3625_v10, %v3623_v1 }
 0x5a5   : > { %v3258_v49 = vadd.f32 %v3253_v52, %v3217_v25  ;;  %v3257_v61 = vadd.f32 %v3240_v3, %v3216_v6 }
 0x5a6   : > { %3658 = vmatpush.bf16.msrb.mxu0 %v3638_v15  ;;  %3671 = vmatpush.bf16.msrb.mxu1 %v3639_v21 }
 0x5a9   : > { %4012 = vmatmul.msk.bf16.vlgmr.msrb.gmra.mxu0 %vm1313_vm8, %v4011_v58  ;;  %4013 = vmatmul.msk.bf16.vlgmr.msrb.gmra.mxu1 %vm1313_vm8, %v4011_v58 }
 0x5aa   : > { %v3214_v41 = vpop.f32.mrf.mxu3  ;;  %v3201_v28 = vpop.f32.mrf.mxu2 }
 0x5b5   : > { %v3345_v44 = vpop.f32.mrf.mxu2 }
 0x5b6   : > { %v3358_v50 = vpop.f32.mrf.mxu3  ;;  %v3362_v42 = vadd.f32 %v3345_v44, %v3257_v61 }
 0x5b7   : > { %v3363_v7 = vadd.f32 %v3358_v50, %v3258_v49 }
 0x5bd   : > { %v3347_v38 = vpop.f32.mrf.mxu2 }
 0x5be   : > { %v3360_v4 = vpop.f32.mrf.mxu3 }
 0x5d6   : > { %v3463_v60 = vpop.f32.mrf.mxu1  ;;  %v3450_v23 = vpop.f32.mrf.mxu0 }
 0x5d7   : > { %v3468_v11 = vadd.f32 %v3463_v60, %v3363_v7  ;;  %v3467_v43 = vadd.f32 %v3450_v23, %v3362_v42 }
 0x5de   : > { %v3452_v36 = vpop.f32.mrf.mxu0  ;;  %v3465_v18 = vpop.f32.mrf.mxu1 }
 0x60c   : > { %v3555_v27 = vpop.f32.mrf.mxu2 }
 0x60d   : > { %v3568_v46 = vpop.f32.mrf.mxu3  ;;  %v3572_v14 = vadd.f32 %v3555_v27, %v3467_v43 }
 0x60e   : > { %v3573_v32 = vadd.f32 %v3568_v46, %v3468_v11 }
 0x614   : > { %v3557_v33 = vpop.f32.mrf.mxu2 }
 0x615   : > { %v3570_v53 = vpop.f32.mrf.mxu3 }
 0x626   : > { %v3660_v16 = vpop.f32.mrf.mxu0  ;;  %v3673_v0 = vpop.f32.mrf.mxu1 }
 0x627   : > { %v3677_v8 = vadd.f32 %v3660_v16, %v3572_v14  ;;  %v3678_v26 = vadd.f32 %v3673_v0, %v3573_v32 }
 0x629   : > { %v3686_v47 = vadd.f32 %v3684_v13, %v3678_v26  ;;  %v3685_v37 = vadd.f32 %v3684_v13, %v3677_v8 }
 0x62b   : > { %v3689_v20 = vrot.slane %v3686_v47, 7 }
 0x62d   : > { %v3691_v51 = vsel %vm3690_vm9, %v3685_v37, %v3689_v20 }
 0x62e   : > { %3697 = vst.msk [vmem:[%s319_s19] sm:$0x3] %vm3695_vm10, %v3691_v51  ;;  %v3662_v40 = vpop.f32.mrf.mxu0  ;;  %v3675_v63 = vpop.f32.mrf.mxu1 }
 0x62f PF: > { %s21_s29 = sadd.s32 1, %s4165_s29  }
 0x630   : > { %p18_p7 = scmp.ge.s32.totalorder %s21_s29, 4  }
 0x632   :  { %20 = sbr.rel (!%p18_p7) target bundleno = 4 (0x4), region = 103 }
 0x637   :  { %3717 = vsyncpa [#allocation4], 1 }
 0x638   :  { %3719 = vsyncpa [#allocation4 + $0x1], 1 }

</bundles_post_ra>
